<compile_context>
chip_gen: v7x
topology: tpu7x:2x2x1
jax: 0.10.0
libtpu: 0.0.40
codegen_flags: <defaults>
</compile_context>

<pallas_src>
import functools

import numpy as np

import jax
import jax.numpy as jnp
from jax import lax
from jax.experimental import pallas as pl
from jax.experimental.pallas import tpu as pltpu


def _resnet_layer2_kernel(lhs_ref, w_ref, out_ref, *, n, ho, wo, cin, cout):
    f32 = jnp.float32
    hi = lax.Precision.HIGHEST
    rows = n * ho * wo          # flat rows, ordered (w, n, h)
    grp = n * ho                # rows per spatial column (w index)
    ka = 10 * cin + 8           # K of fused conv-a/c2 matmul (8 zero-weight mask lanes)

    # ---- packed weight / parameter slab (one DMA), static sublane slices ----
    w_ac2 = w_ref[0:ka, :]                                    # (ka, 2*cout) block-diag
    wc = w_ref[ka:ka + 9 * cout, 0:cout]                      # (9*cout, cout)
    pk = w_ref[ka + 9 * cout:ka + 9 * cout + 8, 0:cout]       # (8, cout) per-channel params
    ba, gb, bb = pk[0:1, :], pk[1:2, :], pk[2:3, :]
    bc, gd, bd = pk[3:4, :], pk[4:5, :], pk[5:6, :]
    bc2 = pk[6:7, :]

    # training-mode BatchNorm2d (eps = 0, biased batch stats) with a SINGLE
    # MXU moment matmul: ones @ [x | x*x] -> [mean | E[x^2]].
    ones_row = jnp.full((8, rows), 1.0 / rows, f32)           # splat constant

    def bn_train(x, gamma, beta):
        mom = jnp.dot(ones_row, jnp.concatenate([x, x * x], axis=1),
                      precision=hi, preferred_element_type=f32)
        mean = mom[0:1, 0:cout]
        var = mom[0:1, cout:2 * cout] - mean * mean           # eps = 0 (module parity)
        scale = gamma * lax.rsqrt(var)                        # EUP rsqrt, gamma folded
        return scale * x + (beta - scale * mean)

    # ---- fused conv `a` (3x3, s2) + shortcut `c2` (1x1, s2): ONE matmul ----
    lhs = lhs_ref[...]                                        # (rows, ka)
    masks = lhs[:, 10 * cin:10 * cin + 8]                     # conv-c boundary masks
    y_ac2 = jnp.dot(lhs, w_ac2, precision=hi, preferred_element_type=f32)
    ya = y_ac2[:, 0:cout] + ba                                # conv a
    z = y_ac2[:, cout:2 * cout] + bc2                         # shortcut branch
    yr = jnp.maximum(bn_train(ya, gb, bb), 0.0)               # BN b + ReLU

    # ---- conv `c` (3x3, s1, pad 1): 9 taps via static XLU rolls + baked masks,
    #      then one K=9*cout matmul.
    taps = []
    mi = 0
    for kh in range(3):
        for kw in range(3):
            dh, dw = kh - 1, kw - 1
            if dh == 0 and dw == 0:
                taps.append(yr)
                continue
            # shifted[r] = yr[(r + dw*grp + dh) % rows]  (np.roll semantics)
            shift = (-(dw * grp + dh)) % rows
            shifted = pltpu.roll(yr, shift, axis=0)
            taps.append(shifted * masks[:, mi:mi + 1])
            mi += 1
    patches = jnp.concatenate(taps, axis=1)                   # (rows, 9*cout)
    yc = jnp.dot(patches, wc, precision=hi, preferred_element_type=f32) + bc
    yd = bn_train(yc, gd, bd)                                 # BN d

    res = z + yd                                              # residual add

    # ---- lane-dense store: fold the spatial column into the lane axis so the
    #      minor output dim is wo*cout (= 128 here) -> unmasked full-lane stores.
    out_ref[...] = jnp.concatenate(
        [res[j * grp:(j + 1) * grp, :] for j in range(wo)], axis=1)


@jax.jit
def resnet_layer2_forward(x_nchw, params):
    """x_nchw: (N, C_in, H, W) float32 -> (N, C_out, H//2, W//2) float32."""
    wa, ba, gb, bb, wc, bc, wc2, bc2, gd, bd = params
    n, cin, h, w = x_nchw.shape
    cout = wa.shape[-1]
    ho = (h + 1 - 3) // 2 + 1
    wo = (w + 1 - 3) // 2 + 1
    rows = n * ho * wo
    grp = n * ho

    x = jnp.transpose(x_nchw, (0, 2, 3, 1)).astype(jnp.float32)       # NHWC
    # F.pad(x, (0,1,0,1)): +1 on the right of W, +1 at the bottom of H
    xp = jnp.pad(x, ((0, 0), (0, 1), (0, 1), (0, 0)))

    # im2col patches for conv `a`, rows ordered (w, n, h) for a lane-dense output.
    # TODO(synk): at production shapes, build these taps in-kernel from a single
    # DMA of xp (this wrapper path writes ~9x the input to HBM).
    cols = [xp[:, kh:kh + 2 * ho - 1:2, kw:kw + 2 * wo - 1:2, :]
            for kh in range(3) for kw in range(3)]
    a_cols = jnp.transpose(jnp.stack(cols, axis=3),
                           (2, 0, 1, 3, 4)).reshape(rows, 9 * cin)
    # pre-strided input for the 1x1 stride-2 shortcut conv `c2`, same row order
    xs2 = jnp.transpose(x[:, ::2, ::2, :], (2, 0, 1, 3)).reshape(rows, cin)

    # conv-`c` boundary masks: baked at trace time (shapes are Python ints) and
    # carried as 8 extra activation lanes that hit zero weight rows in the fused
    # matmul -> exact, zero in-kernel iota/div/mod, no extra DMA descriptor.
    r = np.arange(rows)
    jw_i, ih_i = r // grp, r % ho
    mcols = []
    for kh in range(3):
        for kw in range(3):
            dh, dw = kh - 1, kw - 1
            if dh == 0 and dw == 0:
                continue
            mcols.append((jw_i + dw >= 0) & (jw_i + dw < wo)
                         & (ih_i + dh >= 0) & (ih_i + dh < ho))
    masks = jnp.asarray(np.stack(mcols, axis=1).astype(np.float32))   # (rows, 8)

    # activation slab: [a_cols | xs2 | masks]  -> one DMA
    lhs = jnp.concatenate([a_cols, xs2, masks], axis=1)               # (rows, 10*cin+8)

    # weight/param slab: block-diag [wa | wc2] (+ zero rows for the mask lanes),
    # then wc (lane-padded), then the 7 packed per-channel vectors -> one DMA
    zf = functools.partial(jnp.zeros, dtype=jnp.float32)
    w_ac2 = jnp.concatenate([
        jnp.concatenate([wa.reshape(9 * cin, cout).astype(jnp.float32),
                         zf((9 * cin, cout))], axis=1),
        jnp.concatenate([zf((cin, cout)),
                         wc2.reshape(cin, cout).astype(jnp.float32)], axis=1),
        zf((8, 2 * cout)),                                            # mask lanes -> 0
    ], axis=0)                                                        # (10*cin+8, 2*cout)
    wc_pad = jnp.concatenate([wc.reshape(9 * cout, cout).astype(jnp.float32),
                              zf((9 * cout, cout))], axis=1)          # (9*cout, 2*cout)
    pk = jnp.stack([ba, gb, bb, bc, gd, bd, bc2, jnp.zeros_like(ba)],
                   axis=0).astype(jnp.float32)                        # (8, cout)
    pk_pad = jnp.concatenate([pk, zf((8, cout))], axis=1)             # (8, 2*cout)
    wslab = jnp.concatenate([w_ac2, wc_pad, pk_pad], axis=0)          # (320, 2*cout)

    out_dense = pl.pallas_call(
        functools.partial(_resnet_layer2_kernel,
                          n=n, ho=ho, wo=wo, cin=cin, cout=cout),
        out_shape=jax.ShapeDtypeStruct((n * ho, wo * cout), jnp.float32),
        in_specs=[pl.BlockSpec(memory_space=pltpu.MemorySpace.VMEM)] * 2,
        out_specs=pl.BlockSpec(memory_space=pltpu.MemorySpace.VMEM),
    )(lhs, wslab)

    out = out_dense.reshape(n, ho, wo, cout)
    return jnp.transpose(out, (0, 3, 1, 2))                           # back to NCHW


def _reference(x_nchw, params):
    """Pure-JAX reference (NHWC convs) mirroring the PyTorch forward."""
    wa, ba, gb, bb, wc, bc, wc2, bc2, gd, bd = params
    dn = ('NHWC', 'HWIO', 'NHWC')
    hi = lax.Precision.HIGHEST
    x = jnp.transpose(x_nchw, (0, 2, 3, 1)).astype(jnp.float32)
    xp = jnp.pad(x, ((0, 0), (0, 1), (0, 1), (0, 0)))
    ya = lax.conv_general_dilated(xp, wa, (2, 2), 'VALID',
                                  dimension_numbers=dn, precision=hi) + ba
    mb, vb = ya.mean((0, 1, 2)), ya.var((0, 1, 2))
    yb = gb * (ya - mb) / jnp.sqrt(vb) + bb
    yr = jnp.maximum(yb, 0.0)
    yc = lax.conv_general_dilated(yr, wc, (1, 1), ((1, 1), (1, 1)),
                                  dimension_numbers=dn, precision=hi) + bc
    md, vd = yc.mean((0, 1, 2)), yc.var((0, 1, 2))
    yd = gd * (yc - md) / jnp.sqrt(vd) + bd
    z = lax.conv_general_dilated(x, wc2, (2, 2), 'VALID',
                                 dimension_numbers=dn, precision=hi) + bc2
    return jnp.transpose(z + yd, (0, 3, 1, 2))


def init_params(key, cin=16, cout=16):
    ks = jax.random.split(key, 6)
    wa = 0.2 * jax.random.normal(ks[0], (3, 3, cin, cout), jnp.float32)   # HWIO
    ba = 0.1 * jax.random.normal(ks[1], (cout,), jnp.float32)
    wc = 0.2 * jax.random.normal(ks[2], (3, 3, cout, cout), jnp.float32)  # HWIO
    bc = 0.1 * jax.random.normal(ks[3], (cout,), jnp.float32)
    wc2 = 0.2 * jax.random.normal(ks[4], (1, 1, cin, cout), jnp.float32)  # HWIO
    bc2 = 0.1 * jax.random.normal(ks[5], (cout,), jnp.float32)
    gb = jnp.ones((cout,), jnp.float32)              # BatchNorm2d default weight
    bb = jnp.zeros((cout,), jnp.float32)             # BatchNorm2d default bias
    gd = jnp.full((cout,), 1.5, jnp.float32)
    bd = jnp.full((cout,), -0.25, jnp.float32)
    return (wa, ba, gb, bb, wc, bc, wc2, bc2, gd, bd)


if __name__ == "__main__":
    key = jax.random.PRNGKey(0)
    kx, kp = jax.random.split(key)
    # module defaults: prior_filters=16, num_filters=16 -> input (N=2, C=16, H=W=16)
    x = jax.random.normal(kx, (2, 16, 16, 16), jnp.float32)
    params = init_params(kp, cin=16, cout=16)

    out = jax.block_until_ready(resnet_layer2_forward(x, params))
    ref = jax.block_until_ready(_reference(x, params))

    assert out.shape == (2, 16, 8, 8), out.shape
    max_err = float(jnp.max(jnp.abs(out - ref)))
    assert jnp.allclose(out, ref, rtol=2e-3, atol=2e-3), f"max abs err {max_err}"
    print("KERNEL_OK")
</pallas_src>

<mosaic_0001>
module attributes {stable_mosaic.version = 11 : i64} {
  func.func @_resnet_layer2_kernel(%arg0: memref<128x168xf32, #tpu.memory_space<vmem>>, %arg1: memref<320x32xf32, #tpu.memory_space<vmem>>, %arg2: memref<16x128xf32, #tpu.memory_space<vmem>>) attributes {dimension_semantics = [], scalar_prefetch = 0 : i64, scratch_operands = 0 : i64, tpu.core_type = #tpu.core_type<tc>} {
    %c0 = arith.constant 0 : index
    %c0_0 = arith.constant 0 : index
    %0 = vector.load %arg1[%c0, %c0_0] : memref<320x32xf32, #tpu.memory_space<vmem>>, vector<168x32xf32>
    %c168 = arith.constant 168 : index
    %c0_1 = arith.constant 0 : index
    %1 = vector.load %arg1[%c168, %c0_1] : memref<320x32xf32, #tpu.memory_space<vmem>>, vector<144x16xf32>
    %c312 = arith.constant 312 : index
    %c0_2 = arith.constant 0 : index
    %2 = vector.load %arg1[%c312, %c0_2] : memref<320x32xf32, #tpu.memory_space<vmem>>, vector<8x16xf32>
    %3 = vector.extract_strided_slice %2 {offsets = [0, 0], sizes = [1, 16], strides = [1, 1]} : vector<8x16xf32> to vector<1x16xf32>
    %4 = vector.extract_strided_slice %2 {offsets = [1, 0], sizes = [1, 16], strides = [1, 1]} : vector<8x16xf32> to vector<1x16xf32>
    %5 = vector.extract_strided_slice %2 {offsets = [2, 0], sizes = [1, 16], strides = [1, 1]} : vector<8x16xf32> to vector<1x16xf32>
    %6 = vector.extract_strided_slice %2 {offsets = [3, 0], sizes = [1, 16], strides = [1, 1]} : vector<8x16xf32> to vector<1x16xf32>
    %7 = vector.extract_strided_slice %2 {offsets = [4, 0], sizes = [1, 16], strides = [1, 1]} : vector<8x16xf32> to vector<1x16xf32>
    %8 = vector.extract_strided_slice %2 {offsets = [5, 0], sizes = [1, 16], strides = [1, 1]} : vector<8x16xf32> to vector<1x16xf32>
    %9 = vector.extract_strided_slice %2 {offsets = [6, 0], sizes = [1, 16], strides = [1, 1]} : vector<8x16xf32> to vector<1x16xf32>
    %cst = arith.constant 7.812500e-03 : f32
    %10 = vector.broadcast %cst : f32 to vector<8x128xf32>
    %c0_3 = arith.constant 0 : index
    %c0_4 = arith.constant 0 : index
    %11 = vector.load %arg0[%c0_3, %c0_4] : memref<128x168xf32, #tpu.memory_space<vmem>>, vector<128x168xf32>
    %12 = vector.extract_strided_slice %11 {offsets = [0, 160], sizes = [128, 8], strides = [1, 1]} : vector<128x168xf32> to vector<128x8xf32>
    %cst_5 = arith.constant dense<0.000000e+00> : vector<128x32xf32>
    %13 = tpu.matmul %11, %0, %cst_5 {dimension_numbers = #tpu.dot_dimension_numbers<[1], [0], [0], [1], [0, 0, 1, 1], [], []>, precision = #tpu.contract_precision<fp32>} : vector<128x168xf32>, vector<168x32xf32>, vector<128x32xf32> -> vector<128x32xf32>
    %14 = vector.extract_strided_slice %13 {offsets = [0, 0], sizes = [128, 16], strides = [1, 1]} : vector<128x32xf32> to vector<128x16xf32>
    %15 = vector.broadcast %3 : vector<1x16xf32> to vector<128x16xf32>
    %16 = arith.addf %14, %15 : vector<128x16xf32>
    %17 = vector.extract_strided_slice %13 {offsets = [0, 16], sizes = [128, 16], strides = [1, 1]} : vector<128x32xf32> to vector<128x16xf32>
    %18 = vector.broadcast %9 : vector<1x16xf32> to vector<128x16xf32>
    %19 = arith.addf %17, %18 : vector<128x16xf32>
    %20 = arith.mulf %16, %16 : vector<128x16xf32>
    %21 = tpu.concatenate %16, %20 in 1 : vector<128x16xf32>, vector<128x16xf32> -> vector<128x32xf32>
    %cst_6 = arith.constant dense<0.000000e+00> : vector<8x32xf32>
    %22 = tpu.matmul %10, %21, %cst_6 {dimension_numbers = #tpu.dot_dimension_numbers<[1], [0], [0], [1], [0, 0, 1, 1], [], []>, precision = #tpu.contract_precision<fp32>} : vector<8x128xf32>, vector<128x32xf32>, vector<8x32xf32> -> vector<8x32xf32>
    %23 = vector.extract_strided_slice %22 {offsets = [0, 0], sizes = [1, 16], strides = [1, 1]} : vector<8x32xf32> to vector<1x16xf32>
    %24 = vector.extract_strided_slice %22 {offsets = [0, 16], sizes = [1, 16], strides = [1, 1]} : vector<8x32xf32> to vector<1x16xf32>
    %25 = arith.mulf %23, %23 : vector<1x16xf32>
    %26 = arith.subf %24, %25 : vector<1x16xf32>
    %27 = math.rsqrt %26 : vector<1x16xf32>
    %28 = arith.mulf %4, %27 : vector<1x16xf32>
    %29 = vector.broadcast %28 : vector<1x16xf32> to vector<128x16xf32>
    %30 = arith.mulf %29, %16 : vector<128x16xf32>
    %31 = arith.mulf %28, %23 : vector<1x16xf32>
    %32 = arith.subf %5, %31 : vector<1x16xf32>
    %33 = vector.broadcast %32 : vector<1x16xf32> to vector<128x16xf32>
    %34 = arith.addf %30, %33 : vector<128x16xf32>
    %cst_7 = arith.constant 0.000000e+00 : f32
    %35 = vector.broadcast %cst_7 : f32 to vector<128x16xf32>
    %36 = arith.maximumf %34, %35 : vector<128x16xf32>
    %c17_i32 = arith.constant 17 : i32
    %37 = tpu.dynamic_rotate %36 by %c17_i32 dim 0 : vector<128x16xf32>, i32 -> vector<128x16xf32>
    %38 = vector.extract_strided_slice %12 {offsets = [0, 0], sizes = [128, 1], strides = [1, 1]} : vector<128x8xf32> to vector<128x1xf32>
    %39 = vector.broadcast %38 : vector<128x1xf32> to vector<128x16xf32>
    %40 = arith.mulf %37, %39 : vector<128x16xf32>
    %c1_i32 = arith.constant 1 : i32
    %41 = tpu.dynamic_rotate %36 by %c1_i32 dim 0 : vector<128x16xf32>, i32 -> vector<128x16xf32>
    %42 = vector.extract_strided_slice %12 {offsets = [0, 1], sizes = [128, 1], strides = [1, 1]} : vector<128x8xf32> to vector<128x1xf32>
    %43 = vector.broadcast %42 : vector<128x1xf32> to vector<128x16xf32>
    %44 = arith.mulf %41, %43 : vector<128x16xf32>
    %c113_i32 = arith.constant 113 : i32
    %45 = tpu.dynamic_rotate %36 by %c113_i32 dim 0 : vector<128x16xf32>, i32 -> vector<128x16xf32>
    %46 = vector.extract_strided_slice %12 {offsets = [0, 2], sizes = [128, 1], strides = [1, 1]} : vector<128x8xf32> to vector<128x1xf32>
    %47 = vector.broadcast %46 : vector<128x1xf32> to vector<128x16xf32>
    %48 = arith.mulf %45, %47 : vector<128x16xf32>
    %c16_i32 = arith.constant 16 : i32
    %49 = tpu.dynamic_rotate %36 by %c16_i32 dim 0 : vector<128x16xf32>, i32 -> vector<128x16xf32>
    %50 = vector.extract_strided_slice %12 {offsets = [0, 3], sizes = [128, 1], strides = [1, 1]} : vector<128x8xf32> to vector<128x1xf32>
    %51 = vector.broadcast %50 : vector<128x1xf32> to vector<128x16xf32>
    %52 = arith.mulf %49, %51 : vector<128x16xf32>
    %c112_i32 = arith.constant 112 : i32
    %53 = tpu.dynamic_rotate %36 by %c112_i32 dim 0 : vector<128x16xf32>, i32 -> vector<128x16xf32>
    %54 = vector.extract_strided_slice %12 {offsets = [0, 4], sizes = [128, 1], strides = [1, 1]} : vector<128x8xf32> to vector<128x1xf32>
    %55 = vector.broadcast %54 : vector<128x1xf32> to vector<128x16xf32>
    %56 = arith.mulf %53, %55 : vector<128x16xf32>
    %c15_i32 = arith.constant 15 : i32
    %57 = tpu.dynamic_rotate %36 by %c15_i32 dim 0 : vector<128x16xf32>, i32 -> vector<128x16xf32>
    %58 = vector.extract_strided_slice %12 {offsets = [0, 5], sizes = [128, 1], strides = [1, 1]} : vector<128x8xf32> to vector<128x1xf32>
    %59 = vector.broadcast %58 : vector<128x1xf32> to vector<128x16xf32>
    %60 = arith.mulf %57, %59 : vector<128x16xf32>
    %c127_i32 = arith.constant 127 : i32
    %61 = tpu.dynamic_rotate %36 by %c127_i32 dim 0 : vector<128x16xf32>, i32 -> vector<128x16xf32>
    %62 = vector.extract_strided_slice %12 {offsets = [0, 6], sizes = [128, 1], strides = [1, 1]} : vector<128x8xf32> to vector<128x1xf32>
    %63 = vector.broadcast %62 : vector<128x1xf32> to vector<128x16xf32>
    %64 = arith.mulf %61, %63 : vector<128x16xf32>
    %c111_i32 = arith.constant 111 : i32
    %65 = tpu.dynamic_rotate %36 by %c111_i32 dim 0 : vector<128x16xf32>, i32 -> vector<128x16xf32>
    %66 = vector.extract_strided_slice %12 {offsets = [0, 7], sizes = [128, 1], strides = [1, 1]} : vector<128x8xf32> to vector<128x1xf32>
    %67 = vector.broadcast %66 : vector<128x1xf32> to vector<128x16xf32>
    %68 = arith.mulf %65, %67 : vector<128x16xf32>
    %69 = tpu.concatenate %40, %44, %48, %52, %36, %56, %60, %64, %68 in 1 : vector<128x16xf32>, vector<128x16xf32>, vector<128x16xf32>, vector<128x16xf32>, vector<128x16xf32>, vector<128x16xf32>, vector<128x16xf32>, vector<128x16xf32>, vector<128x16xf32> -> vector<128x144xf32>
    %cst_8 = arith.constant dense<0.000000e+00> : vector<128x16xf32>
    %70 = tpu.matmul %69, %1, %cst_8 {dimension_numbers = #tpu.dot_dimension_numbers<[1], [0], [0], [1], [0, 0, 1, 1], [], []>, precision = #tpu.contract_precision<fp32>} : vector<128x144xf32>, vector<144x16xf32>, vector<128x16xf32> -> vector<128x16xf32>
    %71 = vector.broadcast %6 : vector<1x16xf32> to vector<128x16xf32>
    %72 = arith.addf %70, %71 : vector<128x16xf32>
    %73 = arith.mulf %72, %72 : vector<128x16xf32>
    %74 = tpu.concatenate %72, %73 in 1 : vector<128x16xf32>, vector<128x16xf32> -> vector<128x32xf32>
    %cst_9 = arith.constant dense<0.000000e+00> : vector<8x32xf32>
    %75 = tpu.matmul %10, %74, %cst_9 {dimension_numbers = #tpu.dot_dimension_numbers<[1], [0], [0], [1], [0, 0, 1, 1], [], []>, precision = #tpu.contract_precision<fp32>} : vector<8x128xf32>, vector<128x32xf32>, vector<8x32xf32> -> vector<8x32xf32>
    %76 = vector.extract_strided_slice %75 {offsets = [0, 0], sizes = [1, 16], strides = [1, 1]} : vector<8x32xf32> to vector<1x16xf32>
    %77 = vector.extract_strided_slice %75 {offsets = [0, 16], sizes = [1, 16], strides = [1, 1]} : vector<8x32xf32> to vector<1x16xf32>
    %78 = arith.mulf %76, %76 : vector<1x16xf32>
    %79 = arith.subf %77, %78 : vector<1x16xf32>
    %80 = math.rsqrt %79 : vector<1x16xf32>
    %81 = arith.mulf %7, %80 : vector<1x16xf32>
    %82 = vector.broadcast %81 : vector<1x16xf32> to vector<128x16xf32>
    %83 = arith.mulf %82, %72 : vector<128x16xf32>
    %84 = arith.mulf %81, %76 : vector<1x16xf32>
    %85 = arith.subf %8, %84 : vector<1x16xf32>
    %86 = vector.broadcast %85 : vector<1x16xf32> to vector<128x16xf32>
    %87 = arith.addf %83, %86 : vector<128x16xf32>
    %88 = arith.addf %19, %87 : vector<128x16xf32>
    %89 = vector.extract_strided_slice %88 {offsets = [0, 0], sizes = [16, 16], strides = [1, 1]} : vector<128x16xf32> to vector<16x16xf32>
    %90 = vector.extract_strided_slice %88 {offsets = [16, 0], sizes = [16, 16], strides = [1, 1]} : vector<128x16xf32> to vector<16x16xf32>
    %91 = vector.extract_strided_slice %88 {offsets = [32, 0], sizes = [16, 16], strides = [1, 1]} : vector<128x16xf32> to vector<16x16xf32>
    %92 = vector.extract_strided_slice %88 {offsets = [48, 0], sizes = [16, 16], strides = [1, 1]} : vector<128x16xf32> to vector<16x16xf32>
    %93 = vector.extract_strided_slice %88 {offsets = [64, 0], sizes = [16, 16], strides = [1, 1]} : vector<128x16xf32> to vector<16x16xf32>
    %94 = vector.extract_strided_slice %88 {offsets = [80, 0], sizes = [16, 16], strides = [1, 1]} : vector<128x16xf32> to vector<16x16xf32>
    %95 = vector.extract_strided_slice %88 {offsets = [96, 0], sizes = [16, 16], strides = [1, 1]} : vector<128x16xf32> to vector<16x16xf32>
    %96 = vector.extract_strided_slice %88 {offsets = [112, 0], sizes = [16, 16], strides = [1, 1]} : vector<128x16xf32> to vector<16x16xf32>
    %97 = tpu.concatenate %89, %90, %91, %92, %93, %94, %95, %96 in 1 : vector<16x16xf32>, vector<16x16xf32>, vector<16x16xf32>, vector<16x16xf32>, vector<16x16xf32>, vector<16x16xf32>, vector<16x16xf32>, vector<16x16xf32> -> vector<16x128xf32>
    %c0_10 = arith.constant 0 : index
    %c0_11 = arith.constant 0 : index
    %98 = vector.load %arg2[%c0_10, %c0_11] : memref<16x128xf32, #tpu.memory_space<vmem>>, vector<16x128xf32>
    tpu.vector_store %arg2[%c0_10, %c0_11], %97 {strides = array<i32>} : memref<16x128xf32, #tpu.memory_space<vmem>>, vector<16x128xf32>,
    return
  }
}

</mosaic_0001>

<bundles_post_ra>
// kernel: resnet_layer2_forward.1
= control target key start
LH: loop header
LB: loop body
LE: loop exit
PB: predicated region body
PF: predicated region fallthrough
CT: control target
= control target key end

     0   :  { %v12445_v0 = vmov 0.0|0.0   ;;  %vm83_vm0 = vcmask 326656   ;;  %s8054_s5 = smov 16   ;;  %vm8055_vm1 = vmmov 0   ;;  %vm1815_vm2 = vcmask 130048   ;;  %s8066_s13 = smov 64   ;;  %s12439_s1 = inlined_call_operand.vmem [shape: f32[320,32], index: 1, kind: input, shape index: {}]   ;;  %s12440_s0 = inlined_call_operand.vmem [shape: f32[128,168], index: 0, kind: input, shape index: {}]   ;;  %s12441_s2 = inlined_call_operand.vmem [shape: f32[16,128], index: 2, kind: output, shape index: {}]  }
   0x1   :  { %6948 = vmatprep.subr.bf16.mxu0 %v12445_v0  ;;  %v11_v1 = vld [vmem:[%s12439_s1] sm:$0xff]  ;;  %v12_v2 = vld [vmem:[%s12439_s1 + $0x8] sm:$0xff]  ;;  %v13_v3 = vld [vmem:[%s12439_s1 + $0x10] sm:$0xff]  ;;  %7128 = vmatprep.subr.bf16.mxu1 %v12445_v0  ;;  %s8067_s14 = smov 48   ;;  %s8068_s15 = smov 80   ;;  %vm3709_vm5 = vcmask 261120  }
   0x2   :  { %v133_v4 = vand.u32 4294901760, %v11_v1  ;;  %v136_v5 = vand.u32 4294901760, %v12_v2  ;;  %v14_v6 = vld [vmem:[%s12439_s1 + $0x18] sm:$0xff]  ;;  %v139_v7 = vand.u32 4294901760, %v13_v3  ;;  %v15_v9 = vld [vmem:[%s12439_s1 + $0x20] sm:$0xff]  ;;  %v16_v10 = vld [vmem:[%s12439_s1 + $0x28] sm:$0xff] }
   0x3   :  { %v142_v8 = vand.u32 4294901760, %v14_v6  ;;  %v145_v13 = vand.u32 4294901760, %v15_v9  ;;  %v148_v14 = vand.u32 4294901760, %v16_v10  ;;  %v17_v15 = vld [vmem:[%s12439_s1 + $0x30] sm:$0xff]  ;;  %v18_v16 = vld [vmem:[%s12439_s1 + $0x38] sm:$0xff]  ;;  %v19_v20 = vld [vmem:[%s12439_s1 + $0x40] sm:$0xff] }
   0x4   :  { %v8106_v11 = vpack.c.bf16 %v136_v5, %v133_v4  ;;  %v151_v18 = vand.u32 4294901760, %v17_v15  ;;  %v154_v19 = vand.u32 4294901760, %v18_v16  ;;  %v20_v21 = vld [vmem:[%s12439_s1 + $0x48] sm:$0xff]  ;;  %v157_v24 = vand.u32 4294901760, %v19_v20  ;;  %v21_v26 = vld [vmem:[%s12439_s1 + $0x50] sm:$0xff]  ;;  %v22_v27 = vld [vmem:[%s12439_s1 + $0x58] sm:$0xff] }
   0x5   :  { %v8109_v12 = vpack.c.bf16 %v142_v8, %v139_v7  ;;  %v8119_v17 = vpack.c.bf16 %v148_v14, %v145_v13  ;;  %v52_v22 = vld [vmem:[%s12440_s0 + $0x8] sm:$0xff]  ;;  %v160_v25 = vand.u32 4294901760, %v20_v21  ;;  %v8142_v29 = vsub.f32 %v11_v1, %v133_v4  ;;  %v23_v31 = vld [vmem:[%s12439_s1 + $0x60] sm:$0xff]  ;;  %v54_v33 = vld [vmem:[%s12440_s0 + $0x18] sm:$0xff]  ;;  %s8069_s20 = smov 32   ;;  %s8070_s30 = smov 96  }
   0x6   :  { %12893 = vst [vmem:[#allocation2_spill] sm:$0xff] %v8106_v11  ;;  %6950 = vmatpush1.bf16.msra.mxu0 %v8106_v11  ;;  %v8132_v23 = vpack.c.bf16 %v154_v19, %v151_v18  ;;  %v85_v28 = vsel %vm83_vm0, %v52_v22, 0  ;;  %v8144_v30 = vsub.f32 %v12_v2, %v136_v5  ;;  %v8154_v34 = vsub.f32 %v13_v3, %v139_v7  ;;  %v24_v38 = vld [vmem:[%s12439_s1 + $0x68] sm:$0xff]  ;;  %v51_v43 = vld [vmem:[%s12440_s0] sm:$0xff]  ;;  %v25_v47 = vld [vmem:[%s12439_s1 + $0x70] sm:$0xff] }
   0x7   :  { %12894 = vst [vmem:[#allocation3_spill] sm:$0xff] %v8109_v12  ;;  %6951 = vmatprep.subr.bf16.mxu0 %v12445_v0  ;;  %12895 = vst [vmem:[#allocation4_spill] sm:$0xff] %v8119_v17  ;;  %v8149_v32 = vand.u32 4294901760, %v85_v28  ;;  %v8156_v35 = vsub.f32 %v14_v6, %v142_v8  ;;  %v163_v36 = vand.u32 4294901760, %v21_v26  ;;  %v166_v37 = vand.u32 4294901760, %v22_v27  ;;  %v26_v48 = vld [vmem:[%s12439_s1 + $0x78] sm:$0xff] }
   0x8   :  { %12896 = vst [vmem:[#allocation5_spill] sm:$0xff] %v8132_v23  ;;  %v8161_v39 = vsub.f32 %v15_v9, %v145_v13  ;;  %v8163_v40 = vsub.f32 %v16_v10, %v148_v14  ;;  %v8166_v41 = vpack.c.bf16 %v160_v25, %v157_v24  ;;  %v8174_v44 = vsub.f32 %v17_v15, %v151_v18  ;;  %v27_v49 = vld [vmem:[%s12439_s1 + $0x80] sm:$0xff]  ;;  %v28_v54 = vld [vmem:[%s12439_s1 + $0x88] sm:$0xff]  ;;  %v53_v56 = vld [vmem:[%s12440_s0 + $0x10] sm:$0xff] }
   0x9   :  { %12897 = vst [vmem:[#allocation6_spill] sm:$0xff] %v8149_v32  ;;  %v8169_v42 = vsub.f32 %v85_v28, %v8149_v32  ;;  %v8176_v45 = vsub.f32 %v18_v16, %v154_v19  ;;  %v169_v46 = vand.u32 4294901760, %v23_v31  ;;  %v88_v50 = vsel %vm83_vm0, %v54_v33, 0  ;;  %v56_v57 = vld [vmem:[%s12440_s0 + $0x28] sm:$0xff]  ;;  %v29_v61 = vld [vmem:[%s12439_s1 + $0x90] sm:$0xff]  ;;  %v30_v2 = vld [vmem:[%s12439_s1 + $0x98] sm:$0xff] }
   0xa   :  { %6953 = vmatpush1.bf16.msra.mxu0 %v8109_v12  ;;  %12898 = vst [vmem:[#allocation7_spill] sm:$0xff] %v8166_v41  ;;  %v8189_v51 = vsub.f32 %v19_v20, %v157_v24  ;;  %v8191_v52 = vsub.f32 %v20_v21, %v160_v25  ;;  %v172_v53 = vand.u32 4294901760, %v24_v38  ;;  %v8203_v58 = vpack.c.bf16 %v166_v37, %v163_v36  ;;  %v55_v20 = vld [vmem:[%s12440_s0 + $0x20] sm:$0xff]  ;;  %v58_v21 = vld [vmem:[%s12440_s0 + $0x38] sm:$0xff] }
   0xb   :  { %6954 = vmatprep.subr.bf16.mxu0 %v12445_v0  ;;  %12899 = vst [vmem:[#allocation8_spill] sm:$0xff] %v8169_v42  ;;  %v12444_v55 = vand.u32 4294901760, %v8169_v42  ;;  %v8205_v59 = vsub.f32 %v21_v26, %v163_v36  ;;  %v8207_v60 = vsub.f32 %v22_v27, %v166_v37  ;;  %v8212_v62 = vand.u32 4294901760, %v51_v43  ;;  %v60_v27 = vld [vmem:[%s12440_s0 + $0x48] sm:$0xff]  ;;  %v31_v36 = vld [vmem:[%s12439_s1 + $0xa0] sm:$0xff] }
   0xc   :  { %12900 = vst [vmem:[#allocation9_spill] sm:$0xff] %v8203_v58  ;;  %v175_v63 = vand.u32 4294901760, %v25_v47  ;;  %v178_v1 = vand.u32 4294901760, %v26_v48  ;;  %v8221_v4 = vand.u32 4294901760, %v88_v50  ;;  %v181_v5 = vand.u32 4294901760, %v27_v49 }
   0xd   :  { %12901 = vst [vmem:[#allocation10_spill] sm:$0xff] %v8212_v62  ;;  %v220_v3 = vsub.f32 %v8169_v42, %v12444_v55  ;;  %v184_v6 = vand.u32 4294901760, %v28_v54  ;;  %v8224_v7 = vand.u32 4294901760, %v53_v56  ;;  %v91_v8 = vsel %vm83_vm0, %v56_v57, 0 }
   0xe   :  { %6956 = vmatpush1.bf16.msra.mxu0 %v8119_v17  ;;  %12902 = vst [vmem:[#allocation11_spill] sm:$0xff] %v8221_v4  ;;  %v8227_v9 = vpack.c.bf16 %v172_v53, %v169_v46  ;;  %v8229_v10 = vsub.f32 %v23_v31, %v169_v46  ;;  %v187_v13 = vand.u32 4294901760, %v29_v61  ;;  %v8231_v15 = vsub.f32 %v24_v38, %v172_v53 }
   0xf   :  { %6957 = vmatprep.subr.bf16.mxu0 %v12445_v0  ;;  %12903 = vst [vmem:[#allocation12_spill] sm:$0xff] %v8224_v7  ;;  %v221_v14 = vand.u32 4294901760, %v220_v3  ;;  %v190_v16 = vand.u32 4294901760, %v30_v2  ;;  %v8234_v18 = vsub.f32 %v51_v43, %v8212_v62  ;;  %v12443_v19 = vand.u32 4294901760, %v8142_v29  ;;  %v62_v3 = vld [vmem:[%s12440_s0 + $0x58] sm:$0xff] }
  0x10   :  { %12904 = vst [vmem:[#allocation13_spill] sm:$0xff] %v8227_v9  ;;  %v8244_v22 = vsub.f32 %v25_v47, %v175_v63  ;;  %v8247_v24 = vsub.f32 %v88_v50, %v8221_v4  ;;  %v12442_v25 = vand.u32 4294901760, %v8144_v30  ;;  %v8250_v26 = vand.u32 4294901760, %v91_v8 }
  0x11   :  { %12905 = vst [vmem:[#allocation14_spill] sm:$0xff] %v8234_v18  ;;  %222 = vmatprep.mubr.f32.mxu0 %v221_v14  ;;  %v8256_v28 = vpack.c.bf16 %v178_v1, %v175_v63  ;;  %v8258_v31 = vsub.f32 %v26_v48, %v178_v1  ;;  %v8260_v33 = vpack.c.bf16 %v184_v6, %v181_v5  ;;  %v8272_v46 = vand.u32 4294901760, %v55_v20  ;;  %v57_v48 = vld [vmem:[%s12440_s0 + $0x30] sm:$0xff] }
  0x12   :  { %6959 = vmatpush1.bf16.msra.mxu0 %v8132_v23  ;;  %12906 = vst [vmem:[#allocation15_spill] sm:$0xff] %v8247_v24  ;;  %12907 = vst [vmem:[#allocation16_spill] sm:$0xff] %v8250_v26  ;;  %v8266_v37 = vsub.f32 %v53_v56, %v8224_v7  ;;  %v8268_v38 = vsub.f32 %v27_v49, %v181_v5  ;;  %v8270_v43 = vsub.f32 %v28_v54, %v184_v6  ;;  %vm3726_vm6 = vcmask 392192  }
  0x13   :  { %6960 = vmatprep.subr.bf16.mxu0 %v12445_v0  ;;  %12908 = vst [vmem:[#allocation17_spill] sm:$0xff] %v8256_v28  ;;  %12909 = vst [vmem:[#allocation18_spill] sm:$0xff] %v8260_v33  ;;  %v94_v47 = vsel %vm83_vm0, %v58_v21, 0  ;;  %v8278_v50 = vpack.c.bf16 %v190_v16, %v187_v13  ;;  %v12447_v53 = vand.u32 4294901760, %v8234_v18  ;;  %v462_v56 = vsub.f32 %v8142_v29, %v12443_v19 }
  0x14   :  { %12910 = vst [vmem:[#allocation19_spill] sm:$0xff] %v8266_v37  ;;  %12911 = vst [vmem:[#allocation20_spill] sm:$0xff] %v8272_v46  ;;  %v97_v49 = vsel %vm83_vm0, %v60_v27, 0  ;;  %v8286_v54 = vand.u32 4294901760, %v31_v36  ;;  %v12450_v57 = vand.u32 4294901760, %v8247_v24  ;;  %v469_v63 = vsub.f32 %v8144_v30, %v12442_v25 }
  0x15   :  { %12912 = vst [vmem:[#allocation21_spill] sm:$0xff] %v8278_v50  ;;  %v8293_v1 = vsub.f32 %v91_v8, %v8250_v26  ;;  %v8299_v5 = vsub.f32 %v29_v61, %v187_v13  ;;  %v8302_v14 = vand.u32 4294901760, %v94_v47  ;;  %v8304_v21 = vand.u32 4294901760, %v57_v48  ;;  %v59_v61 = vld [vmem:[%s12440_s0 + $0x40] sm:$0xff] }
  0x16   :  { %6962 = vmatpush1.bf16.msra.mxu0 %v8166_v41  ;;  %12913 = vst [vmem:[#allocation22_spill] sm:$0xff] %v8286_v54  ;;  %v8306_v27 = vsub.f32 %v30_v2, %v190_v16  ;;  %v8309_v25 = vsub.f32 %v31_v36, %v8286_v54  ;;  %v8312_v8 = vsub.f32 %v55_v20, %v8272_v46  ;;  %v8314_v19 = vand.u32 4294901760, %v97_v49 }
  0x17   :  { %6963 = vmatprep.subr.bf16.mxu0 %v12445_v0  ;;  %12914 = vst [vmem:[#allocation23_spill] sm:$0xff] %v8293_v1  ;;  %12915 = vst [vmem:[#allocation24_spill] sm:$0xff] %v8302_v14  ;;  %v8322_v13 = vsub.f32 %v8234_v18, %v12447_v53  ;;  %v463_v55 = vand.u32 4294901760, %v462_v56  ;;  %v100_v16 = vsel %vm83_vm0, %v62_v3, 0  ;;  %v8330_v20 = vsub.f32 %v8247_v24, %v12450_v57  ;;  %v61_v56 = vld [vmem:[%s12440_s0 + $0x50] sm:$0xff]  ;;  %v66_v18 = vld [vmem:[%s12440_s0 + $0x78] sm:$0xff] }
  0x18   :  { %12916 = vst [vmem:[#allocation25_spill] sm:$0xff] %v8304_v21  ;;  %12917 = vst [vmem:[#allocation26_spill] sm:$0xff] %v8312_v8  ;;  %v470_v36 = vand.u32 4294901760, %v469_v63  ;;  %v12919_v53 = vmov 0.0|0.0   ;;  %v12920_v3 = vand.u32 4294901760, %v8266_v37  ;;  %v8347_v63 = vsub.f32 %v57_v48, %v8304_v21 }
  0x19   :  { %12918 = vst [vmem:[#allocation27_spill] sm:$0xff] %v8314_v19  ;;  %v8349_v57 = vand.u32 4294901760, %v59_v61  ;;  %v8353_v6 = vsub.f32 %v97_v49, %v8314_v19  ;;  %v12926_v48 = vand.u32 4294901760, %v8154_v34  ;;  %v236_v49 = vand.u32 4294901760, %v8330_v20 }
  0x1a   :  { %6965 = vmatpush1.bf16.msra.mxu0 %v8203_v58  ;;  %v8341_v2 = vsub.f32 %v8266_v37, %v12920_v3  ;;  %12922 = vst [vmem:[#allocation29_spill] sm:$0xff] %v8347_v63  ;;  %v8356_v58 = vand.u32 4294901760, %v100_v16  ;;  %v64_v3 = vld [vmem:[%s12440_s0 + $0x68] sm:$0xff]  ;;  %v12928_v17 = vand.u32 4294901760, %v8293_v1  ;;  %v12931_v20 = vand.u32 4294901760, %v8312_v8 }
  0x1b   :  { %6966 = vmatprep.subr.bf16.mxu0 %v12445_v0  ;;  %12923 = vst [vmem:[#allocation30_spill] sm:$0xff] %v8349_v57  ;;  %12924 = vst [vmem:[#allocation31_spill] sm:$0xff] %v8353_v6  ;;  %v476_v41 = vsub.f32 %v8154_v34, %v12926_v48  ;;  %v12934_v11 = vand.u32 4294901760, %v8163_v40  ;;  %vm3743_vm7 = vcmask 523264   ;;  %vm3760_vm8 = vcmask 654336  }
  0x1c   :  { %12925 = vst [vmem:[#allocation32_spill] sm:$0xff] %v8356_v58  ;;  %v8373_v12 = vsub.f32 %v8293_v1, %v12928_v17  ;;  %v8388_v17 = vsub.f32 %v8312_v8, %v12931_v20  ;;  %v8395_v48 = vsub.f32 %v100_v16, %v8356_v58  ;;  %v242_v23 = vand.u32 4294901760, %v8341_v2 }
  0x1d   :  { %v12481_v2 = vmov 0.0   ;;  %v12942_v58 = vand.u32 4294901760, %v8174_v44  ;;  %vm3777_vm9 = vcmask 785408   ;;  %vm3794_vm10 = vcmask 916480  }
  0x1e   :  { %6968 = vmatpush1.bf16.msra.mxu0 %v8227_v9  ;;  %v6979_v9 = vpack.c.bf16 %v470_v36, %v463_v55  ;;  %v103_v55 = vsel %vm83_vm0, %v64_v3, 0  ;;  %12933 = vst [vmem:[#allocation35_spill] sm:$0xff] %v8395_v48  ;;  %v497_v3 = vsub.f32 %v8163_v40, %v12934_v11  ;;  %v251_v20 = vand.u32 4294901760, %v8373_v12  ;;  %v65_v11 = vld [vmem:[%s12440_s0 + $0x70] sm:$0xff] }
  0x1f   :  { %6969 = vmatprep.subr.bf16.mxu0 %v12445_v0  ;;  %v8366_v0 = vand.u32 4294901760, %v61_v56  ;;  %v8408_v16 = vand.u32 4294901760, %v103_v55  ;;  %v257_v42 = vand.u32 4294901760, %v8388_v17  ;;  %v8441_v8 = vand.u32 4294901760, %v65_v11 }
  0x20   :  { %v504_v17 = vsub.f32 %v8174_v44, %v12942_v58 }
  0x21   :  { %12927 = vst [vmem:[#allocation33_spill] sm:$0xff] %v8366_v0  ;;  %v8402_v24 = vsub.f32 %v61_v56, %v8366_v0  ;;  %12936 = vst [vmem:[#allocation37_spill] sm:$0xff] %v8408_v16  ;;  %v498_v0 = vand.u32 4294901760, %v497_v3  ;;  %v106_v3 = vsel %vm83_vm0, %v66_v18, 0 }
  0x22   :  { %6971 = vmatpush1.bf16.msra.mxu0 %v8256_v28  ;;  %v8344_v28 = vsub.f32 %v94_v47, %v8302_v14  ;;  %v227_v47 = vand.u32 4294901760, %v8322_v13  ;;  %v12929_v13 = vand.u32 4294901760, %v8156_v35  ;;  %12941 = vst [vmem:[#allocation39_spill] sm:$0xff] %v8441_v8 }
  0x23   :  { %6972 = vmatprep.subr.bf16.mxu0 %v12919_v53  ;;  %12935 = vst [vmem:[#allocation36_spill] sm:$0xff] %v8402_v24 }
  0x24   :  { %12921 = vst [vmem:[#allocation28_spill] sm:$0xff] %v8344_v28  ;;  %v483_v37 = vsub.f32 %v8156_v35, %v12929_v13  ;;  %v12932_v13 = vand.u32 4294901760, %v8161_v39  ;;  %v12937_v12 = vand.u32 4294901760, %v8344_v28 }
  0x26   :  { %6974 = vmatpush1.bf16.msra.mxu0 %v8260_v33  ;;  %v8382_v33 = vsub.f32 %v59_v61, %v8349_v57  ;;  %v490_v1 = vsub.f32 %v8161_v39, %v12932_v13  ;;  %v477_v61 = vand.u32 4294901760, %v476_v41  ;;  %v63_v41 = vld [vmem:[%s12440_s0 + $0x60] sm:$0xff]  ;;  %v484_v56 = vand.u32 4294901760, %v483_v37 }
  0x27   :  { %6975 = vmatprep.subr.bf16.mxu0 %v12919_v53  ;;  %v8420_v36 = vsub.f32 %v8344_v28, %v12937_v12  ;;  %v12938_v13 = vand.u32 4294901760, %v8347_v63  ;;  %v12939_v37 = vand.u32 4294901760, %v8353_v6  ;;  %v12943_v57 = vand.u32 4294901760, %v8176_v45 }
  0x28   :  { %12930 = vst [vmem:[#allocation34_spill] sm:$0xff] %v8382_v33  ;;  %v491_v12 = vand.u32 4294901760, %v490_v1  ;;  %v8451_v1 = vsub.f32 %v103_v55, %v8408_v16  ;;  %v12946_v55 = vand.u32 4294901760, %v8395_v48 }
  0x29   :  { %v266_v28 = vand.u32 4294901760, %v8420_v36  ;;  %v505_v36 = vand.u32 4294901760, %v504_v17 }
  0x2a   :  { %6977 = vmatpush1.bf16.msra.mxu0 %v8278_v50  ;;  %v8425_v50 = vsub.f32 %v8347_v63, %v12938_v13  ;;  %v8439_v63 = vand.u32 4294901760, %v63_v41  ;;  %12944 = vst [vmem:[#allocation40_spill] sm:$0xff] %v8451_v1  ;;  %v6982_v13 = vpack.c.bf16 %v484_v56, %v477_v61  ;;  %v8466_v18 = vsub.f32 %v8395_v48, %v12946_v55 }
  0x2b   :  { %192 = vmatprep.subr.mxu0 %v12481_v2  ;;  %v8435_v2 = vsub.f32 %v8353_v6, %v12939_v37  ;;  %v511_v37 = vsub.f32 %v8176_v45, %v12943_v57  ;;  %v12945_v6 = vand.u32 4294901760, %v8382_v33  ;;  %v8485_v56 = vand.u32 4294901760, %v106_v3 }
  0x2c   :  { %12940 = vst [vmem:[#allocation38_spill] sm:$0xff] %v8439_v63  ;;  %v8483_v61 = vsub.f32 %v63_v41, %v8439_v63  ;;  %v8488_v55 = vsub.f32 %v65_v11, %v8441_v8  ;;  %v6985_v57 = vpack.c.bf16 %v498_v0, %v491_v12  ;;  %v12513_v48 = vand.u32 4294901760, %v8451_v1  ;;  %v72_v0 = vld [vmem:[%s12440_s0 + $0xa8] sm:$0xff] }
  0x2d   :  { %v8460_v58 = vsub.f32 %v8382_v33, %v12945_v6  ;;  %v70_v6 = vld [vmem:[%s12440_s0 + $0x98] sm:$0xff]  ;;  %12949 = vst [vmem:[#allocation42_spill] sm:$0xff] %v8485_v56  ;;  %v296_v11 = vand.u32 4294901760, %v8466_v18  ;;  %v12951_v12 = vand.u32 4294901760, %v8189_v51  ;;  %v115_v41 = vsel %vm83_vm0, %v72_v0, 0 }
  0x2e   :  { %194 = vmatpush1.msra.mxu0 %v8286_v54  ;;  %v272_v54 = vand.u32 4294901760, %v8425_v50  ;;  %v68_v50 = vld [vmem:[%s12440_s0 + $0x88] sm:$0xff]  ;;  %12948 = vst [vmem:[#allocation41_spill] sm:$0xff] %v8483_v61  ;;  %12950 = vst [vmem:[#allocation43_spill] sm:$0xff] %v8488_v55  ;;  %v112_v63 = vsel %vm83_vm0, %v70_v6, 0  ;;  %v12958_v8 = vand.u32 4294901760, %v8207_v60 }
  0x2f   :  { %228 = vmatmul.mubr.f32.vlgmr.msra.gmra.mrb[0].mxu0 %v227_v47  ;;  %6978 = vmatprep.subr.bf16.mxu0 %v12919_v53  ;;  %v512_v47 = vand.u32 4294901760, %v511_v37  ;;  %v109_v33 = vsel %vm83_vm0, %v68_v50, 0  ;;  %v518_v17 = vsub.f32 %v8189_v51, %v12951_v12  ;;  %v12952_v37 = vand.u32 4294901760, %v8191_v52 }
  0x30   :  { %237 = vmatprep.mubr.f32.mxu0 %v236_v49  ;;  %6980 = vmatpush1.bf16.msra.mxu0 %v6979_v9  ;;  %v12947_v9 = vand.u32 4294901760, %v8402_v24  ;;  %v8520_v12 = vand.u32 4294901760, %v112_v63 }
  0x31   :  { %6981 = vmatprep.subr.bf16.mxu0 %v12919_v53  ;;  %v525_v50 = vsub.f32 %v8191_v52, %v12952_v37  ;;  %v69_v37 = vld [vmem:[%s12440_s0 + $0x90] sm:$0xff]  ;;  %v6988_v6 = vpack.c.bf16 %v512_v47, %v505_v36  ;;  %v519_v16 = vand.u32 4294901760, %v518_v17  ;;  %v12959_v36 = vand.u32 4294901760, %v8483_v61 }
  0x32   :  { %v8480_v49 = vsub.f32 %v8402_v24, %v12947_v9  ;;  %v67_v9 = vld [vmem:[%s12440_s0 + $0x80] sm:$0xff]  ;;  %12956 = vst [vmem:[#allocation47_spill] sm:$0xff] %v8520_v12 }
  0x33   :  { %243 = vmatmul.mubr.f32.gmra.mrb[2].mxu0 %v242_v23  ;;  %v287_v23 = vand.u32 4294901760, %v8460_v58  ;;  %v8516_v58 = vand.u32 4294901760, %v109_v33  ;;  %v8518_v18 = vand.u32 4294901760, %v67_v9  ;;  %v526_v19 = vand.u32 4294901760, %v525_v50 }
  0x34   :  { %252 = vmatprep.mubr.f32.mxu0 %v251_v20  ;;  %6983 = vmatpush1.bf16.msra.mxu0 %v6982_v13  ;;  %v8513_v20 = vsub.f32 %v106_v3, %v8485_v56  ;;  %v8529_v3 = vsub.f32 %v8451_v1, %v12513_v48  ;;  %v12957_v13 = vand.u32 4294901760, %v8205_v59  ;;  %v539_v56 = vsub.f32 %v8207_v60, %v12958_v8 }
  0x35   :  { %6984 = vmatprep.subr.bf16.mxu0 %v12919_v53  ;;  %12954 = vst [vmem:[#allocation45_spill] sm:$0xff] %v8516_v58  ;;  %12955 = vst [vmem:[#allocation46_spill] sm:$0xff] %v8518_v18  ;;  %v8543_v0 = vsub.f32 %v8483_v61, %v12959_v36  ;;  %v8546_v48 = vand.u32 4294901760, %v69_v37  ;;  %v8548_v8 = vand.u32 4294901760, %v115_v41  ;;  %v8556_v17 = vsub.f32 %v109_v33, %v8516_v58  ;;  %v74_v61 = vld [vmem:[%s12440_s0 + $0xb8] sm:$0xff] }
  0x36   :  { %12953 = vst [vmem:[#allocation44_spill] sm:$0xff] %v8513_v20  ;;  %v532_v24 = vsub.f32 %v8205_v59, %v12957_v13  ;;  %v8559_v50 = vsub.f32 %v67_v9, %v8518_v18  ;;  %v8562_v36 = vsub.f32 %v112_v63, %v8520_v12  ;;  %v540_v47 = vand.u32 4294901760, %v539_v56 }
  0x37   :  { %258 = vmatmul.mubr.f32.gmra.mrb[4].mxu0 %v257_v42  ;;  %12960 = vst [vmem:[#allocation48_spill] sm:$0xff] %v8546_v48  ;;  %12961 = vst [vmem:[#allocation49_spill] sm:$0xff] %v8548_v8  ;;  %v71_v42 = vld [vmem:[%s12440_s0 + $0xa0] sm:$0xff]  ;;  %v12966_v33 = vand.u32 4294901760, %v8435_v2  ;;  %v311_v9 = vand.u32 4294901760, %v8529_v3  ;;  %v12967_v63 = vand.u32 4294901760, %v8229_v10 }
  0x38   :  { %267 = vmatprep.mubr.f32.mxu0 %v266_v28  ;;  %6986 = vmatpush1.bf16.msra.mxu0 %v6985_v57  ;;  %v12962_v28 = vand.u32 4294901760, %v8488_v55  ;;  %12963 = vst [vmem:[#allocation50_spill] sm:$0xff] %v8556_v17  ;;  %12964 = vst [vmem:[#allocation51_spill] sm:$0xff] %v8559_v50  ;;  %v533_v13 = vand.u32 4294901760, %v532_v24  ;;  %v12969_v2 = vand.u32 4294901760, %v8513_v20  ;;  %v12974_v3 = vand.u32 4294901760, %v8258_v31 }
  0x39   :  { %6987 = vmatprep.subr.bf16.mxu0 %v12919_v53  ;;  %12965 = vst [vmem:[#allocation52_spill] sm:$0xff] %v8562_v36  ;;  %v546_v24 = vsub.f32 %v8229_v10, %v12967_v63 }
  0x3a   :  { %v8553_v57 = vsub.f32 %v8488_v55, %v12962_v28  ;;  %v6991_v55 = vpack.c.bf16 %v526_v19, %v519_v16  ;;  %v317_v28 = vand.u32 4294901760, %v8543_v0  ;;  %v8587_v19 = vsub.f32 %v69_v37, %v8546_v48  ;;  %v73_v0 = vld [vmem:[%s12440_s0 + $0xb0] sm:$0xff] }
  0x3b   :  { %273 = vmatmul.mubr.f32.gmra.mrb[6].mxu0 %v272_v54  ;;  %v12968_v54 = vand.u32 4294901760, %v8231_v15  ;;  %v8590_v16 = vsub.f32 %v115_v41, %v8548_v8  ;;  %v118_v37 = vsel %vm83_vm0, %v74_v61, 0  ;;  %v547_v63 = vand.u32 4294901760, %v546_v24  ;;  %v76_v8 = vld [vmem:[%s12440_s0 + $0xc8] sm:$0xff] }
  0x3c   :  { %282 = vmatprep.mubr.f32.mxu0 %v12966_v33  ;;  %6989 = vmatpush1.bf16.msra.mxu0 %v6988_v6  ;;  %v325_v6 = vsub.f32 %v8513_v20, %v12969_v2  ;;  %12970 = vst [vmem:[#allocation53_spill] sm:$0xff] %v8587_v19  ;;  %v6994_v2 = vpack.c.bf16 %v540_v47, %v533_v13  ;;  %v12973_v20 = vand.u32 4294901760, %v8244_v22  ;;  %v332_v47 = vand.u32 4294901760, %v8553_v57 }
  0x3d   :  { %v553_v56 = vsub.f32 %v8231_v15, %v12968_v54  ;;  %6990 = vmatprep.subr.bf16.mxu0 %v12919_v53  ;;  %12971 = vst [vmem:[#allocation54_spill] sm:$0xff] %v8590_v16  ;;  %v8595_v54 = vand.u32 4294901760, %v71_v42  ;;  %v567_v33 = vsub.f32 %v8258_v31, %v12974_v3  ;;  %v8629_v57 = vand.u32 4294901760, %v118_v37 }
  0x3e   :  { %v560_v41 = vsub.f32 %v8244_v22, %v12973_v20  ;;  %v12979_v20 = vand.u32 4294901760, %v8480_v49  ;;  %v12980_v13 = vand.u32 4294901760, %v8562_v36  ;;  %v78_v49 = vld [vmem:[%s12440_s0 + $0xd8] sm:$0xff] }
  0x3f   :  { %12972 = vst [vmem:[#allocation55_spill] sm:$0xff] %v8595_v54  ;;  %288 = vmatmul.mubr.f32.gmra.mrb[8].mxu0 %v287_v23  ;;  %v554_v1 = vand.u32 4294901760, %v553_v56  ;;  %v12977_v56 = vand.u32 4294901760, %v8559_v50  ;;  %v8627_v61 = vsub.f32 %v71_v42, %v8595_v54  ;;  %12978 = vst [vmem:[#allocation57_spill] sm:$0xff] %v8629_v57  ;;  %v75_v42 = vld [vmem:[%s12440_s0 + $0xc0] sm:$0xff] }
  0x40   :  { %297 = vmatprep.mubr.f32.mxu0 %v296_v11  ;;  %6992 = vmatpush1.bf16.msra.mxu0 %v6991_v55  ;;  %v8616_v11 = vand.u32 4294901760, %v73_v0  ;;  %v12976_v55 = vand.u32 4294901760, %v8556_v17  ;;  %v8636_v23 = vsub.f32 %v8562_v36, %v12980_v13  ;;  %v561_v48 = vand.u32 4294901760, %v560_v41 }
  0x41   :  { %6993 = vmatprep.subr.bf16.mxu0 %v12919_v53  ;;  %v8624_v3 = vsub.f32 %v8559_v50, %v12977_v56  ;;  %v326_v56 = vand.u32 4294901760, %v325_v6  ;;  %v6997_v50 = vpack.c.bf16 %v554_v1, %v547_v63  ;;  %v12984_v6 = vand.u32 4294901760, %v8590_v16 }
  0x42   :  { %12975 = vst [vmem:[#allocation56_spill] sm:$0xff] %v8616_v11  ;;  %v340_v24 = vsub.f32 %v8556_v17, %v12976_v55  ;;  %v568_v55 = vand.u32 4294901760, %v567_v33  ;;  %v121_v17 = vsel %vm83_vm0, %v76_v8, 0  ;;  %v12982_v33 = vand.u32 4294901760, %v8270_v43 }
  0x43   :  { %303 = vmatmul.mubr.f32.gmra.mrb[10].mxu0 %v12979_v20  ;;  %v12981_v20 = vand.u32 4294901760, %v8268_v38  ;;  %v8660_v63 = vsub.f32 %v8590_v16, %v12984_v6  ;;  %v8670_v36 = vand.u32 4294901760, %v121_v17  ;;  %v8673_v12 = vand.u32 4294901760, %v75_v42 }
  0x44   :  { %312 = vmatprep.mubr.f32.mxu0 %v311_v9  ;;  %6995 = vmatpush1.bf16.msra.mxu0 %v6994_v2  ;;  %v581_v8 = vsub.f32 %v8270_v43, %v12982_v33  ;;  %v12983_v9 = vand.u32 4294901760, %v8587_v19  ;;  %v8663_v2 = vsub.f32 %v73_v0, %v8616_v11  ;;  %v8668_v33 = vsub.f32 %v118_v37, %v8629_v57 }
  0x45   :  { %v574_v13 = vsub.f32 %v8268_v38, %v12981_v20  ;;  %6996 = vmatprep.subr.bf16.mxu0 %v12919_v53  ;;  %12987 = vst [vmem:[#allocation60_spill] sm:$0xff] %v8670_v36  ;;  %v7000_v54 = vpack.c.bf16 %v568_v55, %v561_v48  ;;  %12988 = vst [vmem:[#allocation61_spill] sm:$0xff] %v8673_v12  ;;  %v124_v6 = vsel %vm83_vm0, %v78_v49, 0  ;;  %v12989_v20 = vand.u32 4294901760, %v8299_v5 }
  0x46   :  { %v8654_v1 = vsub.f32 %v8587_v19, %v12983_v9  ;;  %12985 = vst [vmem:[#allocation58_spill] sm:$0xff] %v8663_v2  ;;  %12986 = vst [vmem:[#allocation59_spill] sm:$0xff] %v8668_v33  ;;  %v12540_v9 = vand.u32 4294901760, %v8306_v27  ;;  %v341_v19 = vand.u32 4294901760, %v340_v24  ;;  %v582_v41 = vand.u32 4294901760, %v581_v8 }
  0x47   :  { %318 = vmatmul.mubr.f32.gmra.mrb[12].mxu0 %v317_v28  ;;  %v575_v0 = vand.u32 4294901760, %v574_v13  ;;  %v588_v37 = vsub.f32 %v8299_v5, %v12989_v20  ;;  %v347_v28 = vand.u32 4294901760, %v8624_v3  ;;  %v356_v48 = vand.u32 4294901760, %v8636_v23  ;;  %v80_v23 = vld [vmem:[%s12440_s0 + $0xe8] sm:$0xff] }
  0x48   :  { %327 = vmatprep.mubr.f32.mxu0 %v326_v56  ;;  %6998 = vmatpush1.bf16.msra.mxu0 %v6997_v50  ;;  %v595_v16 = vsub.f32 %v8306_v27, %v12540_v9  ;;  %v362_v24 = vand.u32 4294901760, %v8654_v1  ;;  %v371_v55 = vand.u32 4294901760, %v8660_v63  ;;  %v12990_v50 = vand.u32 4294901760, %v8627_v61 }
  0x49   :  { %6999 = vmatprep.subr.bf16.mxu0 %v12919_v53  ;;  %v12541_v49 = vand.u32 4294901760, %v8668_v33  ;;  %v8693_v8 = vsub.f32 %v121_v17, %v8670_v36  ;;  %v8699_v3 = vsub.f32 %v75_v42, %v8673_v12  ;;  %v8701_v1 = vand.u32 4294901760, %v124_v6 }
  0x4a   :  { %v376_v56 = vsub.f32 %v8627_v61, %v12990_v50  ;;  %v7003_v17 = vpack.c.bf16 %v582_v41, %v575_v0  ;;  %v77_v50 = vld [vmem:[%s12440_s0 + $0xd0] sm:$0xff]  ;;  %v589_v9 = vand.u32 4294901760, %v588_v37  ;;  %v12544_v42 = vand.u32 4294901760, %v8309_v25  ;;  %v82_v0 = vld [vmem:[%s12440_s0 + $0xf8] sm:$0xff] }
  0x4b   :  { %12991 = vst [vmem:[#allocation62_spill] sm:$0xff] %v8693_v8  ;;  %333 = vmatmul.mubr.f32.gmra.mrb[14].mxu0 %v332_v47  ;;  %12992 = vst [vmem:[#allocation63_spill] sm:$0xff] %v8701_v1  ;;  %v596_v47 = vand.u32 4294901760, %v595_v16  ;;  %v127_v13 = vsel %vm83_vm0, %v80_v23, 0  ;;  %v385_v41 = vsub.f32 %v8668_v33, %v12541_v49  ;;  %v8739_v20 = vsub.f32 %v124_v6, %v8701_v1 }
  0x4c   :  { %342 = vmatprep.mubr.f32.mxu0 %v341_v19  ;;  %7001 = vmatpush1.bf16.msra.mxu0 %v7000_v54  ;;  %v8730_v19 = vand.u32 4294901760, %v77_v50  ;;  %v8741_v37 = vand.u32 4294901760, %v127_v13  ;;  %v602_v54 = vsub.f32 %v8309_v25, %v12544_v42  ;;  %v130_v63 = vsel %vm83_vm0, %v82_v0, 0 }
  0x4d   :  { %7002 = vmatprep.subr.bf16.mxu0 %v12919_v53  ;;  %v7006_v23 = vpack.c.bf16 %v596_v47, %v589_v9  ;;  %v12995_v6 = vand.u32 4294901760, %v8663_v2  ;;  %v12549_v49 = vand.u32 4294901760, %v8699_v3  ;;  %v386_v16 = vand.u32 4294901760, %v385_v41 }
  0x4e   :  { %12993 = vst [vmem:[#allocation64_spill] sm:$0xff] %v8730_v19  ;;  %12994 = vst [vmem:[#allocation65_spill] sm:$0xff] %v8741_v37  ;;  %v12996_v33 = vand.u32 4294901760, %v8693_v8  ;;  %v8759_v47 = vsub.f32 %v77_v50, %v8730_v19  ;;  %v8765_v0 = vsub.f32 %v127_v13, %v8741_v37  ;;  %v603_v41 = vand.u32 4294901760, %v602_v54 }
  0x4f   :  { %348 = vmatmul.mubr.f32.gmra.mrb[16].mxu0 %v347_v28  ;;  %v79_v28 = vld [vmem:[%s12440_s0 + $0xe0] sm:$0xff] }
  0x50   :  { %357 = vmatprep.mubr.f32.mxu0 %v356_v48  ;;  %7004 = vmatpush1.bf16.msra.mxu0 %v7003_v17  ;;  %v377_v48 = vand.u32 4294901760, %v376_v56  ;;  %v391_v17 = vsub.f32 %v8663_v2, %v12995_v6  ;;  %v400_v9 = vsub.f32 %v8693_v8, %v12996_v33  ;;  %12997 = vst [vmem:[#allocation66_spill] sm:$0xff] %v8759_v47  ;;  %v8761_v42 = vand.u32 4294901760, %v79_v28 }
  0x51   :  { %7005 = vmatprep.subr.bf16.mxu0 %v12919_v53  ;;  %v8767_v6 = vand.u32 4294901760, %v130_v63  ;;  %v13000_v33 = vmov 0.0   ;;  %v12550_v56 = vand.u32 4294901760, %v8759_v47  ;;  %v13002_v2 = vand.u32 4294901760, %v8739_v20 }
  0x52   :  { %12998 = vst [vmem:[#allocation67_spill] sm:$0xff] %v8761_v42  ;;  %v392_v50 = vand.u32 4294901760, %v391_v17  ;;  %v8778_v13 = vsub.f32 %v79_v28, %v8761_v42  ;;  %v401_v8 = vand.u32 4294901760, %v400_v9  ;;  %v12556_v17 = vand.u32 4294901760, %v8765_v0  ;;  %6560 = vmatprep.mubr.msk.f32.mxu1 %vm8055_vm1, %v13000_v33 }
  0x53   :  { %363 = vmatmul.mubr.f32.gmra.mrb[18].mxu0 %v362_v24  ;;  %12999 = vst [vmem:[#allocation68_spill] sm:$0xff] %v8767_v6  ;;  %v81_v24 = vld [vmem:[%s12440_s0 + $0xf0] sm:$0xff]  ;;  %v415_v54 = vsub.f32 %v8739_v20, %v13002_v2  ;;  %v421_v28 = vsub.f32 %v8759_v47, %v12550_v56 }
  0x54   :  { %372 = vmatprep.mubr.f32.mxu0 %v371_v55  ;;  %7007 = vmatpush1.bf16.msra.mxu0 %v7006_v23  ;;  %v406_v55 = vsub.f32 %v8699_v3, %v12549_v49  ;;  %v8780_v23 = vand.u32 4294901760, %v81_v24 }
  0x55   :  { %598 = vmatprep.subr.mxu0 %v13000_v33  ;;  %v416_v2 = vand.u32 4294901760, %v415_v54 }
  0x56   :  { %13001 = vst [vmem:[#allocation69_spill] sm:$0xff] %v8780_v23  ;;  %v407_v49 = vand.u32 4294901760, %v406_v55  ;;  %v8795_v9 = vsub.f32 %v81_v24, %v8780_v23 }
  0x57   :  { %378 = vmatmul.mubr.f32.gmra.mrb[20].mxu0 %v377_v48  ;;  %v8787_v48 = vsub.f32 %v130_v63, %v8767_v6  ;;  %v430_v63 = vsub.f32 %v8765_v0, %v12556_v17  ;;  %v13023_v17 = vpack.c.bf16 %v8306_v27, %v8299_v5 }
  0x58   :  { %387 = vmatprep.mubr.f32.mxu0 %v386_v16  ;;  %604 = vmatpush1.msra.mxu0 %v603_v41  ;;  %v12555_v16 = vand.u32 4294901760, %v8778_v13  ;;  %v12553_v56 = vand.u32 4294901760, %v8795_v9 }
  0x59   :  { %7008 = vmatprep.subr.bf16.mxu0 %v12919_v53  ;;  %v12554_v41 = vand.u32 4294901760, %v8787_v48  ;;  %v431_v47 = vand.u32 4294901760, %v430_v63  ;;  %v13005_v63 = vpack.c.bf16 %v8163_v40, %v8161_v39 }
  0x5a   :  { %v436_v55 = vsub.f32 %v8778_v13, %v12555_v16  ;;  %v451_v54 = vsub.f32 %v8795_v9, %v12553_v56  ;;  %v13018_v56 = vpack.c.bf16 %v8258_v31, %v8244_v22  ;;  %v13022_v16 = vld [vmem:[#allocation49_spill] sm:$0xff] }
  0x5b   :  { %393 = vmatmul.mubr.f32.gmra.mrb[22].mxu0 %v392_v50  ;;  %v422_v50 = vand.u32 4294901760, %v421_v28 }
  0x5c   :  { %402 = vmatprep.mubr.f32.mxu0 %v401_v8  ;;  %v445_v8 = vsub.f32 %v8787_v48, %v12554_v41  ;;  %v437_v24 = vand.u32 4294901760, %v436_v55  ;;  %v452_v28 = vand.u32 4294901760, %v451_v54  ;;  %v13007_v55 = vpack.c.bf16 %v8176_v45, %v8174_v44 }
  0x5d   :  { %v13010_v54 = vpack.c.bf16 %v8191_v52, %v8189_v51  ;;  %v13020_v41 = vpack.c.bf16 %v8270_v43, %v8268_v38 }
  0x5f   :  { %408 = vmatmul.mubr.f32.gmra.mrb[24].mxu0 %v407_v49  ;;  %v446_v49 = vand.u32 4294901760, %v445_v8  ;;  %v13008_v8 = vld [vmem:[#allocation30_spill] sm:$0xff] }
  0x60   :  { %417 = vmatprep.mubr.f32.mxu0 %v416_v2  ;;  %v13003_v2 = vpack.c.bf16 %v8144_v30, %v8142_v29 }
  0x63   :  { %423 = vmatmul.mubr.f32.gmra.mrb[26].mxu0 %v422_v50  ;;  %v13006_v50 = vld [vmem:[#allocation27_spill] sm:$0xff] }
  0x64   :  { %432 = vmatprep.mubr.f32.mxu0 %v431_v47  ;;  %v13004_v47 = vpack.c.bf16 %v8156_v35, %v8154_v34 }
  0x67   :  { %438 = vmatmul.mubr.f32.gmra.mrb[28].mxu0 %v437_v24  ;;  %v13009_v24 = vld [vmem:[#allocation32_spill] sm:$0xff] }
  0x68   :  { %447 = vmatprep.mubr.f32.mxu0 %v446_v49  ;;  %v13011_v49 = vld [vmem:[#allocation33_spill] sm:$0xff] }
  0x6b   :  { %453 = vmatmul.mubr.f32.gmra.mrb[30].mxu0 %v452_v28  ;;  %v13012_v28 = vld [vmem:[#allocation37_spill] sm:$0xff] }
  0x6c   :  { %628 = vmatprep.mubr.f32.mxu0 %v8149_v32 }
  0x6f   :  { %630 = vmatmul.mubr.f32.vlgmr.msra.gmra.mrb[0].mxu0 %v8212_v62  ;;  %v13067_v62 = vand.u32 4294901760, %v8156_v35 }
  0x70   :  { %635 = vmatprep.mubr.f32.mxu0 %v8221_v4  ;;  %7010 = vmatpush1.bf16.msra.mxu0 %v13003_v2  ;;  %v13013_v2 = vpack.c.bf16 %v8207_v60, %v8205_v59  ;;  %v13066_v4 = vand.u32 4294901760, %v8154_v34 }
  0x71   :  { %7011 = vmatprep.subr.bf16.mxu0 %v12919_v53 }
  0x72   :  { %v7072_v32 = vpack.c.bf16 %v13067_v62, %v13066_v4  ;;  %v13074_v62 = vand.u32 4294901760, %v8174_v44  ;;  %v13075_v4 = vand.u32 4294901760, %v8176_v45 }
  0x73   :  { %637 = vmatmul.mubr.f32.gmra.mrb[2].mxu0 %v8224_v7 }
  0x74   :  { %642 = vmatprep.mubr.f32.mxu0 %v8250_v26  ;;  %7013 = vmatpush1.bf16.msra.mxu0 %v13004_v47  ;;  %v13014_v47 = vld [vmem:[#allocation38_spill] sm:$0xff] }
  0x75   :  { %7014 = vmatprep.subr.bf16.mxu0 %v12919_v53 }
  0x77   :  { %644 = vmatmul.mubr.f32.gmra.mrb[4].mxu0 %v8272_v46  ;;  %v13060_v46 = vld [vmem:[#allocation66_spill] sm:$0xff] }
  0x78   :  { %649 = vmatprep.mubr.f32.mxu0 %v8302_v14  ;;  %7016 = vmatpush1.bf16.msra.mxu0 %v13005_v63  ;;  %v13015_v63 = vld [vmem:[#allocation42_spill] sm:$0xff] }
  0x79   :  { %7017 = vmatprep.subr.bf16.mxu0 %v12919_v53  ;;  %v13058_v14 = vld [vmem:[#allocation58_spill] sm:$0xff] }
  0x7b   :  { %651 = vmatmul.mubr.f32.gmra.mrb[6].mxu0 %v8304_v21  ;;  %v13055_v21 = vld [vmem:[#allocation21_spill] sm:$0xff] }
  0x7c   :  { %656 = vmatprep.mubr.f32.mxu0 %v13006_v50  ;;  %7019 = vmatpush1.bf16.msra.mxu0 %v13007_v55  ;;  %v13016_v55 = vpack.c.bf16 %v8231_v15, %v8229_v10  ;;  %v13053_v50 = vld [vmem:[#allocation53_spill] sm:$0xff] }
  0x7d   :  { %7020 = vmatprep.subr.bf16.mxu0 %v12919_v53 }
  0x7f   :  { %658 = vmatmul.mubr.f32.gmra.mrb[8].mxu0 %v13008_v8  ;;  %v13050_v8 = vld [vmem:[#allocation51_spill] sm:$0xff] }
  0x80   :  { %663 = vmatprep.mubr.f32.mxu0 %v13009_v24  ;;  %7022 = vmatpush1.bf16.msra.mxu0 %v13010_v54  ;;  %v13017_v54 = vld [vmem:[#allocation39_spill] sm:$0xff]  ;;  %v13049_v24 = vld [vmem:[#allocation17_spill] sm:$0xff] }
  0x81   :  { %7023 = vmatprep.subr.bf16.mxu0 %v12919_v53 }
  0x83   :  { %665 = vmatmul.mubr.f32.gmra.mrb[10].mxu0 %v13011_v49  ;;  %v13047_v49 = vld [vmem:[#allocation43_spill] sm:$0xff] }
  0x84   :  { %670 = vmatprep.mubr.f32.mxu0 %v13012_v28  ;;  %7025 = vmatpush1.bf16.msra.mxu0 %v13013_v2  ;;  %v13019_v2 = vld [vmem:[#allocation47_spill] sm:$0xff]  ;;  %v13046_v28 = vld [vmem:[#allocation13_spill] sm:$0xff] }
  0x85   :  { %7026 = vmatprep.subr.bf16.mxu0 %v12919_v53 }
  0x87   :  { %672 = vmatmul.mubr.f32.gmra.mrb[12].mxu0 %v13014_v47  ;;  %v13045_v47 = vld [vmem:[#allocation44_spill] sm:$0xff] }
  0x88   :  { %677 = vmatprep.mubr.f32.mxu0 %v13015_v63  ;;  %7028 = vmatpush1.bf16.msra.mxu0 %v13016_v55  ;;  %v13021_v55 = vld [vmem:[#allocation48_spill] sm:$0xff]  ;;  %v13044_v63 = vld [vmem:[#allocation41_spill] sm:$0xff] }
  0x89   :  { %7029 = vmatprep.subr.bf16.mxu0 %v12919_v53 }
  0x8b   :  { %679 = vmatmul.mubr.f32.gmra.mrb[14].mxu0 %v13017_v54  ;;  %v13043_v54 = vld [vmem:[#allocation9_spill] sm:$0xff] }
  0x8c   :  { %684 = vmatprep.mubr.f32.mxu0 %v8516_v58  ;;  %7031 = vmatpush1.bf16.msra.mxu0 %v13018_v56  ;;  %v13024_v56 = vld [vmem:[#allocation55_spill] sm:$0xff]  ;;  %v13042_v58 = vld [vmem:[#allocation40_spill] sm:$0xff] }
  0x8d   :  { %7032 = vmatprep.subr.bf16.mxu0 %v12919_v53 }
  0x8f   :  { %686 = vmatmul.mubr.f32.gmra.mrb[16].mxu0 %v8518_v18  ;;  %v13041_v18 = vld [vmem:[#allocation36_spill] sm:$0xff] }
  0x90   :  { %691 = vmatprep.mubr.f32.mxu0 %v13019_v2  ;;  %7034 = vmatpush1.bf16.msra.mxu0 %v13020_v41  ;;  %v13026_v41 = vld [vmem:[#allocation14_spill] sm:$0xff]  ;;  %v13040_v2 = vld [vmem:[#allocation7_spill] sm:$0xff] }
  0x91   :  { %7035 = vmatprep.subr.bf16.mxu0 %v12919_v53  ;;  %v13064_v7 = vand.u32 4294901760, %v13026_v41 }
  0x93   :  { %693 = vmatmul.mubr.f32.gmra.mrb[18].mxu0 %v13021_v55  ;;  %v13039_v55 = vld [vmem:[#allocation35_spill] sm:$0xff] }
  0x94   :  { %698 = vmatprep.mubr.f32.mxu0 %v13022_v16  ;;  %7037 = vmatpush1.bf16.msra.mxu0 %v13023_v17  ;;  %v13025_v17 = vld [vmem:[#allocation8_spill] sm:$0xff]  ;;  %v13038_v16 = vld [vmem:[#allocation34_spill] sm:$0xff]  ;;  %v13081_v45 = vand.u32 4294901760, %v13039_v55 }
  0x95   :  { %820 = vmatprep.subr.mxu0 %v13000_v33  ;;  %v13080_v44 = vand.u32 4294901760, %v13038_v16 }
  0x97   :  { %700 = vmatmul.mubr.f32.gmra.mrb[20].mxu0 %v13024_v56  ;;  %v13037_v56 = vld [vmem:[#allocation5_spill] sm:$0xff] }
  0x98   :  { %705 = vmatprep.mubr.f32.mxu0 %v8629_v57  ;;  %823 = vmatpush1.msra.mxu0 %v8309_v25  ;;  %v13036_v57 = vld [vmem:[#allocation31_spill] sm:$0xff] }
  0x99   :  { %7038 = vmatprep.subr.bf16.mxu0 %v12919_v53 }
  0x9b   :  { %707 = vmatmul.mubr.f32.gmra.mrb[22].mxu0 %v8616_v11  ;;  %v13027_v11 = vld [vmem:[#allocation15_spill] sm:$0xff] }
  0x9c   :  { %712 = vmatprep.mubr.f32.mxu0 %v8670_v36  ;;  %v13028_v36 = vld [vmem:[#allocation2_spill] sm:$0xff] }
  0x9f   :  { %714 = vmatmul.mubr.f32.gmra.mrb[24].mxu0 %v8673_v12  ;;  %v13035_v12 = vld [vmem:[#allocation29_spill] sm:$0xff] }
  0xa0   :  { %719 = vmatprep.mubr.f32.mxu0 %v8701_v1  ;;  %v13029_v1 = vld [vmem:[#allocation19_spill] sm:$0xff] }
  0xa3   :  { %721 = vmatmul.mubr.f32.gmra.mrb[26].mxu0 %v8730_v19  ;;  %v13030_v19 = vld [vmem:[#allocation23_spill] sm:$0xff] }
  0xa4   :  { %726 = vmatprep.mubr.f32.mxu0 %v8741_v37  ;;  %v13031_v37 = vld [vmem:[#allocation3_spill] sm:$0xff] }
  0xa7   :  { %728 = vmatmul.mubr.f32.gmra.mrb[28].mxu0 %v8761_v42  ;;  %v13034_v42 = vld [vmem:[#allocation4_spill] sm:$0xff] }
  0xa8   :  { %733 = vmatprep.mubr.f32.mxu0 %v8767_v6  ;;  %v13032_v6 = vld [vmem:[#allocation26_spill] sm:$0xff] }
  0xa9   :  { %v13072_v34 = vand.u32 4294901760, %v13032_v6 }
  0xab   :  { %735 = vmatmul.mubr.f32.gmra.mrb[30].mxu0 %v8780_v23  ;;  %v13033_v23 = vld [vmem:[#allocation28_spill] sm:$0xff] }
  0xac   :  { %848 = vmatprep.mubr.f32.mxu0 %v13025_v17  ;;  %v13073_v35 = vand.u32 4294901760, %v13033_v23 }
  0xaf   :  { %851 = vmatmul.mubr.f32.vlgmr.msra.gmra.mrb[0].mxu0 %v13026_v41  ;;  %v13115_v41 = vld [vmem:[#allocation10_spill] sm:$0xff] }
  0xb0   :  { %857 = vmatprep.mubr.f32.mxu0 %v13027_v11  ;;  %7040 = vmatpush1.bf16.msra.mxu0 %v13028_v36  ;;  %v13065_v36 = vand.u32 4294901760, %v13027_v11 }
  0xb1   :  { %7041 = vmatprep.subr.bf16.mxu0 %v12919_v53 }
  0xb3   :  { %860 = vmatmul.mubr.f32.gmra.mrb[2].mxu0 %v13029_v1 }
  0xb4   :  { %866 = vmatprep.mubr.f32.mxu0 %v13030_v19  ;;  %7043 = vmatpush1.bf16.msra.mxu0 %v13031_v37  ;;  %v13063_v37 = vand.u32 4294901760, %v8144_v30  ;;  %v13070_v30 = vand.u32 4294901760, %v8161_v39  ;;  %v13077_v39 = vand.u32 4294901760, %v13036_v57 }
  0xb5   :  { %7044 = vmatprep.subr.bf16.mxu0 %v12919_v53 }
  0xb7   :  { %869 = vmatmul.mubr.f32.gmra.mrb[4].mxu0 %v13032_v6 }
  0xb8   :  { %875 = vmatprep.mubr.f32.mxu0 %v13033_v23  ;;  %7046 = vmatpush1.bf16.msra.mxu0 %v13034_v42  ;;  %v13057_v42 = vld [vmem:[#allocation22_spill] sm:$0xff] }
  0xb9   :  { %7047 = vmatprep.subr.bf16.mxu0 %v12919_v53 }
  0xbb   :  { %878 = vmatmul.mubr.f32.gmra.mrb[6].mxu0 %v13035_v12 }
  0xbc   :  { %884 = vmatprep.mubr.f32.mxu0 %v13036_v57  ;;  %7049 = vmatpush1.bf16.msra.mxu0 %v13037_v56  ;;  %v13052_v56 = vld [vmem:[#allocation18_spill] sm:$0xff]  ;;  %v13083_v57 = vand.u32 4294901760, %v8207_v60  ;;  %v13089_v60 = vand.u32 4294901760, %v13045_v47 }
  0xbd   :  { %7050 = vmatprep.subr.bf16.mxu0 %v12919_v53 }
  0xbf   :  { %887 = vmatmul.mubr.f32.gmra.mrb[8].mxu0 %v13038_v16  ;;  %v13094_v16 = vand.u32 4294901760, %v8268_v38  ;;  %v13100_v38 = vand.u32 4294901760, %v13053_v50 }
  0xc0   :  { %893 = vmatprep.mubr.f32.mxu0 %v13039_v55  ;;  %7052 = vmatpush1.bf16.msra.mxu0 %v13040_v2  ;;  %v13048_v2 = vld [vmem:[#allocation50_spill] sm:$0xff] }
  0xc1   :  { %7053 = vmatprep.subr.bf16.mxu0 %v12919_v53 }
  0xc3   :  { %896 = vmatmul.mubr.f32.gmra.mrb[10].mxu0 %v13041_v18 }
  0xc4   :  { %902 = vmatprep.mubr.f32.mxu0 %v13042_v58  ;;  %7055 = vmatpush1.bf16.msra.mxu0 %v13043_v54  ;;  %v13051_v54 = vld [vmem:[#allocation52_spill] sm:$0xff] }
  0xc5   :  { %7056 = vmatprep.subr.bf16.mxu0 %v12919_v53 }
  0xc7   :  { %905 = vmatmul.mubr.f32.gmra.mrb[12].mxu0 %v13044_v63 }
  0xc8   :  { %911 = vmatprep.mubr.f32.mxu0 %v13045_v47  ;;  %7058 = vmatpush1.bf16.msra.mxu0 %v13046_v28  ;;  %v13054_v28 = vld [vmem:[#allocation54_spill] sm:$0xff]  ;;  %v13095_v47 = vand.u32 4294901760, %v8270_v43 }
  0xc9   :  { %7059 = vmatprep.subr.bf16.mxu0 %v12919_v53  ;;  %v13101_v43 = vand.u32 4294901760, %v13054_v28 }
  0xcb   :  { %914 = vmatmul.mubr.f32.gmra.mrb[14].mxu0 %v13047_v49 }
  0xcc   :  { %920 = vmatprep.mubr.f32.mxu0 %v13048_v2  ;;  %7061 = vmatpush1.bf16.msra.mxu0 %v13049_v24  ;;  %v13056_v24 = vld [vmem:[#allocation59_spill] sm:$0xff] }
  0xcd   :  { %7062 = vmatprep.subr.bf16.mxu0 %v12919_v53 }
  0xcf   :  { %923 = vmatmul.mubr.f32.gmra.mrb[16].mxu0 %v13050_v8 }
  0xd0   :  { %929 = vmatprep.mubr.f32.mxu0 %v13051_v54  ;;  %7064 = vmatpush1.bf16.msra.mxu0 %v13052_v56  ;;  %v13059_v56 = vld [vmem:[#allocation62_spill] sm:$0xff] }
  0xd1   :  { %7065 = vmatprep.subr.bf16.mxu0 %v12919_v53 }
  0xd3   :  { %932 = vmatmul.mubr.f32.gmra.mrb[18].mxu0 %v13053_v50  ;;  %v13106_v50 = vand.u32 4294901760, %v13059_v56 }
  0xd4   :  { %938 = vmatprep.mubr.f32.mxu0 %v13054_v28  ;;  %7067 = vmatpush1.bf16.msra.mxu0 %v13055_v21  ;;  %v13062_v21 = vand.u32 4294901760, %v8142_v29  ;;  %v13069_v29 = vand.u32 4294901760, %v13030_v19  ;;  %v13086_v19 = vand.u32 4294901760, %v8229_v10  ;;  %v13092_v10 = vand.u32 4294901760, %v13047_v49 }
  0xd5   :  { %1051 = vmatprep.subr.mxu0 %v13000_v33  ;;  %v13098_v49 = vand.u32 4294901760, %v8299_v5  ;;  %v13104_v5 = vand.u32 4294901760, %v8309_v25  ;;  %v13107_v28 = vand.u32 4294901760, %v8699_v3  ;;  %v13110_v25 = vand.u32 4294901760, %v8765_v0 }
  0xd6   :  { %v7069_v26 = vpack.c.bf16 %v13063_v37, %v13062_v21  ;;  %v13087_v37 = vand.u32 4294901760, %v8231_v15  ;;  %v13093_v15 = vand.u32 4294901760, %v13048_v2  ;;  %v13099_v2 = vand.u32 4294901760, %v8306_v27 }
  0xd7   :  { %941 = vmatmul.mubr.f32.gmra.mrb[20].mxu0 %v8627_v61  ;;  %v13105_v27 = vand.u32 4294901760, %v13058_v14 }
  0xd8   :  { %947 = vmatprep.mubr.f32.mxu0 %v13056_v24  ;;  %1053 = vmatpush1.msra.mxu0 %v13057_v42  ;;  %v13061_v42 = vand.u32 4294901760, %v13025_v17  ;;  %v7087_v6 = vpack.c.bf16 %v13087_v37, %v13086_v19  ;;  %v7096_v55 = vpack.c.bf16 %v13099_v2, %v13098_v49  ;;  %v13111_v17 = vand.u32 4294901760, %v8778_v13  ;;  %v13144_v19 = vld [vmem:[#allocation21_spill] sm:$0xff]  ;;  %v13145_v37 = vld [vmem:[#allocation55_spill] sm:$0xff] }
  0xd9   :  { %7068 = vmatprep.subr.bf16.mxu0 %v12919_v53  ;;  %v50_v2 = vld [vmem:[%s12439_s1 + $0x138] sm:$0xff] }
  0xdb   :  { %950 = vmatmul.mubr.f32.gmra.mrb[22].mxu0 %v13058_v14  ;;  %v13112_v14 = vand.u32 4294901760, %v8787_v48 }
  0xdc   :  { %956 = vmatprep.mubr.f32.mxu0 %v13059_v56  ;;  %v13113_v56 = vand.u32 4294901760, %v8795_v9 }
  0xdf   :  { %959 = vmatmul.mubr.f32.gmra.mrb[24].mxu0 %v8699_v3  ;;  %v13114_v3 = vld [vmem:[#allocation6_spill] sm:$0xff] }
  0xe0   :  { %965 = vmatprep.mubr.f32.mxu0 %v8739_v20 }
  0xe3   :  { %968 = vmatmul.mubr.f32.gmra.mrb[26].mxu0 %v13060_v46 }
  0xe4   :  { %974 = vmatprep.mubr.f32.mxu0 %v8765_v0  ;;  %v13118_v0 = vld [vmem:[#allocation12_spill] sm:$0xff] }
  0xe7   :  { %977 = vmatmul.mubr.f32.gmra.mrb[28].mxu0 %v8778_v13  ;;  %v13119_v13 = vld [vmem:[#allocation16_spill] sm:$0xff] }
  0xe8   :  { %983 = vmatprep.mubr.f32.mxu0 %v8787_v48  ;;  %v13121_v48 = vld [vmem:[#allocation20_spill] sm:$0xff] }
  0xeb   :  { %986 = vmatmul.mubr.f32.gmra.mrb[30].mxu0 %v8795_v9  ;;  %v13122_v9 = vld [vmem:[#allocation24_spill] sm:$0xff] }
  0xec   :  { %1079 = vmatprep.mubr.f32.mxu0 %v13061_v42  ;;  %v13068_v42 = vand.u32 4294901760, %v13029_v1 }
  0xef   :  { %1083 = vmatmul.mubr.f32.vlgmr.msra.gmra.mrb[0].mxu0 %v13064_v7  ;;  %v13071_v7 = vand.u32 4294901760, %v8163_v40  ;;  %v13078_v40 = vand.u32 4294901760, %v8189_v51  ;;  %v13084_v51 = vand.u32 4294901760, %v13041_v18  ;;  %v13090_v18 = vand.u32 4294901760, %v8244_v22 }
  0xf0   :  { %1090 = vmatprep.mubr.f32.mxu0 %v13065_v36  ;;  %7070 = vmatpush1.bf16.msra.mxu0 %v7069_v26  ;;  %v7078_v26 = vpack.c.bf16 %v13075_v4, %v13074_v62  ;;  %v13079_v36 = vand.u32 4294901760, %v8191_v52  ;;  %v13085_v52 = vand.u32 4294901760, %v13042_v58  ;;  %v13091_v58 = vand.u32 4294901760, %v8258_v31  ;;  %v13129_v62 = vld [vmem:[#allocation7_spill] sm:$0xff]  ;;  %v13130_v4 = vld [vmem:[#allocation33_spill] sm:$0xff] }
  0xf1   :  { %7071 = vmatprep.subr.bf16.mxu0 %v12919_v53  ;;  %v7075_v21 = vpack.c.bf16 %v13071_v7, %v13070_v30  ;;  %v13096_v22 = vand.u32 4294901760, %v13050_v8  ;;  %v13097_v31 = vand.u32 4294901760, %v13051_v54  ;;  %v13102_v8 = vand.u32 4294901760, %v8627_v61  ;;  %v13124_v30 = vld [vmem:[#allocation25_spill] sm:$0xff]  ;;  %v13125_v7 = vld [vmem:[#allocation27_spill] sm:$0xff] }
  0xf2   :  { %v7081_v11 = vpack.c.bf16 %v13079_v36, %v13078_v40  ;;  %v7090_v23 = vpack.c.bf16 %v13091_v58, %v13090_v18  ;;  %v13103_v54 = vand.u32 4294901760, %v13056_v24  ;;  %v13108_v61 = vand.u32 4294901760, %v8739_v20  ;;  %v13116_v20 = vld [vmem:[#allocation11_spill] sm:$0xff]  ;;  %v13134_v40 = vld [vmem:[#allocation42_spill] sm:$0xff]  ;;  %v13135_v36 = vld [vmem:[#allocation13_spill] sm:$0xff] }
  0xf3   :  { %1094 = vmatmul.mubr.f32.gmra.mrb[2].mxu0 %v13068_v42  ;;  %v13109_v24 = vand.u32 4294901760, %v13060_v46  ;;  %v13117_v46 = vld [vmem:[#allocation2_spill] sm:$0xff]  ;;  %v13120_v42 = vld [vmem:[#allocation3_spill] sm:$0xff]  ;;  %v13149_v18 = vld [vmem:[#allocation60_spill] sm:$0xff] }
  0xf4   :  { %1101 = vmatprep.mubr.f32.mxu0 %v13069_v29  ;;  %7073 = vmatpush1.bf16.msra.mxu0 %v7072_v32  ;;  %v13076_v32 = vand.u32 4294901760, %v13035_v12  ;;  %v13082_v12 = vand.u32 4294901760, %v8205_v59  ;;  %v13088_v59 = vand.u32 4294901760, %v13044_v63  ;;  %v7093_v63 = vpack.c.bf16 %v13095_v47, %v13094_v16  ;;  %v13123_v29 = vld [vmem:[#allocation4_spill] sm:$0xff]  ;;  %v13150_v58 = vld [vmem:[#allocation61_spill] sm:$0xff]  ;;  %v13154_v16 = vld [vmem:[#allocation67_spill] sm:$0xff] }
  0xf5   :  { %7074 = vmatprep.subr.bf16.mxu0 %v12919_v53  ;;  %v13155_v47 = vld [vmem:[#allocation68_spill] sm:$0xff] }
  0xf6   :  { %v7084_v1 = vpack.c.bf16 %v13083_v57, %v13082_v12  ;;  %v13139_v12 = vld [vmem:[#allocation46_spill] sm:$0xff]  ;;  %v13140_v57 = vld [vmem:[#allocation47_spill] sm:$0xff] }
  0xf7   :  { %1105 = vmatmul.mubr.f32.gmra.mrb[4].mxu0 %v13072_v34  ;;  %v13127_v34 = vld [vmem:[#allocation30_spill] sm:$0xff] }
  0xf8   :  { %1112 = vmatprep.mubr.f32.mxu0 %v13073_v35  ;;  %7076 = vmatpush1.bf16.msra.mxu0 %v7075_v21  ;;  %v13126_v21 = vld [vmem:[#allocation5_spill] sm:$0xff]  ;;  %v13128_v35 = vld [vmem:[#allocation32_spill] sm:$0xff] }
  0xf9   :  { %7077 = vmatprep.subr.bf16.mxu0 %v12919_v53 }
  0xfb   :  { %1116 = vmatmul.mubr.f32.gmra.mrb[6].mxu0 %v13076_v32  ;;  %v13132_v32 = vld [vmem:[#allocation9_spill] sm:$0xff] }
  0xfc   :  { %1123 = vmatprep.mubr.f32.mxu0 %v13077_v39  ;;  %7079 = vmatpush1.bf16.msra.mxu0 %v7078_v26  ;;  %v13131_v26 = vld [vmem:[#allocation37_spill] sm:$0xff]  ;;  %v13133_v39 = vld [vmem:[#allocation38_spill] sm:$0xff] }
  0xfd   :  { %7080 = vmatprep.subr.bf16.mxu0 %v12919_v53 }
  0xff   :  { %1127 = vmatmul.mubr.f32.gmra.mrb[8].mxu0 %v13080_v44  ;;  %v13137_v44 = vld [vmem:[#allocation45_spill] sm:$0xff] }
 0x100   :  { %1134 = vmatprep.mubr.f32.mxu0 %v13081_v45  ;;  %7082 = vmatpush1.bf16.msra.mxu0 %v7081_v11  ;;  %v13136_v11 = vld [vmem:[#allocation39_spill] sm:$0xff]  ;;  %v13138_v45 = vld [vmem:[#allocation17_spill] sm:$0xff] }
 0x101   :  { %7083 = vmatprep.subr.bf16.mxu0 %v12919_v53 }
 0x103   :  { %1138 = vmatmul.mubr.f32.gmra.mrb[10].mxu0 %v13084_v51  ;;  %v13142_v51 = vld [vmem:[#allocation48_spill] sm:$0xff] }
 0x104   :  { %1145 = vmatprep.mubr.f32.mxu0 %v13085_v52  ;;  %7085 = vmatpush1.bf16.msra.mxu0 %v7084_v1  ;;  %v13141_v1 = vld [vmem:[#allocation18_spill] sm:$0xff]  ;;  %v13143_v52 = vld [vmem:[#allocation49_spill] sm:$0xff] }
 0x105   :  { %7086 = vmatprep.subr.bf16.mxu0 %v12919_v53 }
 0x107   :  { %1149 = vmatmul.mubr.f32.gmra.mrb[12].mxu0 %v13088_v59  ;;  %v13147_v59 = vld [vmem:[#allocation22_spill] sm:$0xff] }
 0x108   :  { %1156 = vmatprep.mubr.f32.mxu0 %v13089_v60  ;;  %7088 = vmatpush1.bf16.msra.mxu0 %v7087_v6  ;;  %v13146_v6 = vld [vmem:[#allocation57_spill] sm:$0xff]  ;;  %v13148_v60 = vld [vmem:[#allocation56_spill] sm:$0xff] }
 0x109   :  { %7089 = vmatprep.subr.bf16.mxu0 %v12919_v53 }
 0x10b   :  { %1160 = vmatmul.mubr.f32.gmra.mrb[14].mxu0 %v13092_v10  ;;  %v13152_v10 = vld [vmem:[#allocation64_spill] sm:$0xff] }
 0x10c   :  { %1167 = vmatprep.mubr.f32.mxu0 %v13093_v15  ;;  %7091 = vmatpush1.bf16.msra.mxu0 %v7090_v23  ;;  %v13151_v23 = vld [vmem:[#allocation63_spill] sm:$0xff]  ;;  %v13153_v15 = vld [vmem:[#allocation65_spill] sm:$0xff] }
 0x10d   :  { %7092 = vmatprep.subr.bf16.mxu0 %v12919_v53 }
 0x10f   :  { %1171 = vmatmul.mubr.f32.gmra.mrb[16].mxu0 %v13096_v22  ;;  %v1691_v22 = vlaneseq }
 0x110   :  { %1178 = vmatprep.mubr.f32.mxu0 %v13097_v31  ;;  %7094 = vmatpush1.bf16.msra.mxu0 %v7093_v63  ;;  %v13156_v63 = vld [vmem:[#allocation69_spill] sm:$0xff] }
 0x111   :  { %7095 = vmatprep.subr.bf16.mxu0 %v12919_v53  ;;  %v9142_v31 = vshrl.u32 %v1691_v22, 7 }
 0x113   :  { %1182 = vmatmul.mubr.f32.gmra.mrb[18].mxu0 %v13100_v38  ;;  %13157 = vst [vmem:[#allocation8_spill] sm:$0xff] %v9142_v31  ;;  %v1693_v49 = vsub.s32 0, %v9142_v31  ;;  %vm2988_vm3 = vcmp.lt.s32.totalorder %v9142_v31, 7  ;;  %vm2555_vm4 = vcmp.lt.s32.totalorder %v9142_v31, 1 }
 0x114   :  { %1189 = vmatprep.mubr.f32.mxu0 %v13101_v43  ;;  %7097 = vmatpush1.bf16.msra.mxu0 %v7096_v55 }
 0x115   :  { %1353 = vmatprep.subr.mxu0 %v13000_v33  ;;  %v9148_v55 = vrot.slane %v50_v2, %v1693_v49 }
 0x117   :  { %1193 = vmatmul.mubr.f32.gmra.mrb[20].mxu0 %v13102_v8 }
 0x118   :  { %1200 = vmatprep.mubr.f32.mxu0 %v13103_v54  ;;  %1357 = vmatpush1.msra.mxu0 %v13104_v5 }
 0x119   :  { %7098 = vmatprep.subr.bf16.mxu0 %v12919_v53 }
 0x11b   :  { %1204 = vmatmul.mubr.f32.gmra.mrb[22].mxu0 %v13105_v27 }
 0x11c   :  { %1211 = vmatprep.mubr.f32.mxu0 %v13106_v50 }
 0x11f   :  { %1215 = vmatmul.mubr.f32.gmra.mrb[24].mxu0 %v13107_v28 }
 0x120   :  { %1222 = vmatprep.mubr.f32.mxu0 %v13108_v61 }
 0x123   :  { %1226 = vmatmul.mubr.f32.gmra.mrb[26].mxu0 %v13109_v24 }
 0x124   :  { %1233 = vmatprep.mubr.f32.mxu0 %v13110_v25 }
 0x127   :  { %1237 = vmatmul.mubr.f32.gmra.mrb[28].mxu0 %v13111_v17 }
 0x128   :  { %1244 = vmatprep.mubr.f32.mxu0 %v13112_v14 }
 0x12b   :  { %1248 = vmatmul.mubr.f32.gmra.mrb[30].mxu0 %v13113_v56 }
 0x12c   :  { %1381 = vmatprep.mubr.f32.mxu0 %v13114_v3 }
 0x12f   :  { %1383 = vmatmul.mubr.f32.vlgmr.msra.gmra.mrb[0].mxu0 %v13115_v41 }
 0x130   :  { %1388 = vmatprep.mubr.f32.mxu0 %v13116_v20  ;;  %7100 = vmatpush1.bf16.msra.mxu0 %v13117_v46 }
 0x131   :  { %7101 = vmatprep.subr.bf16.mxu0 %v12919_v53 }
 0x133   :  { %1390 = vmatmul.mubr.f32.gmra.mrb[2].mxu0 %v13118_v0 }
 0x134   :  { %1395 = vmatprep.mubr.f32.mxu0 %v13119_v13  ;;  %7103 = vmatpush1.bf16.msra.mxu0 %v13120_v42 }
 0x135   :  { %7104 = vmatprep.subr.bf16.mxu0 %v12919_v53 }
 0x137   :  { %1397 = vmatmul.mubr.f32.gmra.mrb[4].mxu0 %v13121_v48 }
 0x138   :  { %1402 = vmatprep.mubr.f32.mxu0 %v13122_v9  ;;  %7106 = vmatpush1.bf16.msra.mxu0 %v13123_v29 }
 0x139   :  { %7107 = vmatprep.subr.bf16.mxu0 %v12919_v53 }
 0x13b   :  { %1404 = vmatmul.mubr.f32.gmra.mrb[6].mxu0 %v13124_v30 }
 0x13c   :  { %1409 = vmatprep.mubr.f32.mxu0 %v13125_v7  ;;  %7109 = vmatpush1.bf16.msra.mxu0 %v13126_v21 }
 0x13d   :  { %7110 = vmatprep.subr.bf16.mxu0 %v12919_v53 }
 0x13f   :  { %1411 = vmatmul.mubr.f32.gmra.mrb[8].mxu0 %v13127_v34 }
 0x140   :  { %1416 = vmatprep.mubr.f32.mxu0 %v13128_v35  ;;  %7112 = vmatpush1.bf16.msra.mxu0 %v13129_v62 }
 0x141   :  { %7113 = vmatprep.subr.bf16.mxu0 %v12919_v53 }
 0x143   :  { %1418 = vmatmul.mubr.f32.gmra.mrb[10].mxu0 %v13130_v4 }
 0x144   :  { %1423 = vmatprep.mubr.f32.mxu0 %v13131_v26  ;;  %7115 = vmatpush1.bf16.msra.mxu0 %v13132_v32 }
 0x145   :  { %7116 = vmatprep.subr.bf16.mxu0 %v12919_v53 }
 0x147   :  { %1425 = vmatmul.mubr.f32.gmra.mrb[12].mxu0 %v13133_v39 }
 0x148   :  { %1430 = vmatprep.mubr.f32.mxu0 %v13134_v40  ;;  %7118 = vmatpush1.bf16.msra.mxu0 %v13135_v36 }
 0x149   :  { %7119 = vmatprep.subr.bf16.mxu0 %v12919_v53 }
 0x14b   :  { %1432 = vmatmul.mubr.f32.gmra.mrb[14].mxu0 %v13136_v11 }
 0x14c   :  { %1437 = vmatprep.mubr.f32.mxu0 %v13137_v44  ;;  %7121 = vmatpush1.bf16.msra.mxu0 %v13138_v45 }
 0x14d   :  { %7122 = vmatprep.subr.bf16.mxu0 %v12919_v53 }
 0x14f   :  { %1439 = vmatmul.mubr.f32.gmra.mrb[16].mxu0 %v13139_v12 }
 0x150   :  { %1444 = vmatprep.mubr.f32.mxu0 %v13140_v57  ;;  %7124 = vmatpush1.bf16.msra.mxu0 %v13141_v1 }
 0x151   :  { %7125 = vmatprep.subr.bf16.mxu0 %v12919_v53 }
 0x153   :  { %1446 = vmatmul.mubr.f32.gmra.mrb[18].mxu0 %v13142_v51 }
 0x154   :  { %1451 = vmatprep.mubr.f32.mxu0 %v13143_v52  ;;  %7127 = vmatpush1.bf16.msra.mxu0 %v13144_v19 }
 0x155   :  { %1553 = vmatprep.subr.mxu0 %v13000_v33 }
 0x157   :  { %1453 = vmatmul.mubr.f32.gmra.mrb[20].mxu0 %v13145_v37 }
 0x158   :  { %1458 = vmatprep.mubr.f32.mxu0 %v13146_v6  ;;  %1555 = vmatpush1.msra.mxu0 %v13147_v59 }
 0x159   :  { %7434 = vmatprep.subr.bf16.mxu0 %v12919_v53 }
 0x15b   :  { %1460 = vmatmul.mubr.f32.gmra.mrb[22].mxu0 %v13148_v60 }
 0x15c   :  { %1465 = vmatprep.mubr.f32.mxu0 %v13149_v18 }
 0x15f   :  { %1467 = vmatmul.mubr.f32.gmra.mrb[24].mxu0 %v13150_v58 }
 0x160   :  { %1472 = vmatprep.mubr.f32.mxu0 %v13151_v23 }
 0x163   :  { %1474 = vmatmul.mubr.f32.gmra.mrb[26].mxu0 %v13152_v10 }
 0x164   :  { %1479 = vmatprep.mubr.f32.mxu0 %v13153_v15 }
 0x167   :  { %1481 = vmatmul.mubr.f32.gmra.mrb[28].mxu0 %v13154_v16 }
 0x168   :  { %1486 = vmatprep.mubr.f32.mxu0 %v13155_v47 }
 0x16b   :  { %1488 = vmatmul.mubr.f32.gmra.mrb[30].mxu0 %v13156_v63 }
 0x16c   :  { %1579 = vmatprep.mubr.f32.mxu0 %v13114_v3 }
 0x16f   :  { %1581 = vmatmul.mubr.f32.vlgmr.msra.gmra.mrb[0].mxu0 %v13115_v41 }
 0x170   :  { %1586 = vmatprep.mubr.f32.mxu0 %v13116_v20 }
 0x173   :  { %1588 = vmatmul.mubr.f32.gmra.mrb[2].mxu0 %v13118_v0 }
 0x174   :  { %1593 = vmatprep.mubr.f32.mxu0 %v13119_v13 }
 0x177   :  { %1595 = vmatmul.mubr.f32.gmra.mrb[4].mxu0 %v13121_v48 }
 0x178   :  { %1600 = vmatprep.mubr.f32.mxu0 %v13122_v9 }
 0x17b   :  { %1602 = vmatmul.mubr.f32.gmra.mrb[6].mxu0 %v13124_v30 }
 0x17c   :  { %1607 = vmatprep.mubr.f32.mxu0 %v13125_v7 }
 0x17f   :  { %1609 = vmatmul.mubr.f32.gmra.mrb[8].mxu0 %v13127_v34 }
 0x180   :  { %1614 = vmatprep.mubr.f32.mxu0 %v13128_v35 }
 0x183   :  { %1616 = vmatmul.mubr.f32.gmra.mrb[10].mxu0 %v13130_v4 }
 0x184   :  { %1621 = vmatprep.mubr.f32.mxu0 %v13131_v26 }
 0x187   :  { %1623 = vmatmul.mubr.f32.gmra.mrb[12].mxu0 %v13133_v39 }
 0x188   :  { %1628 = vmatprep.mubr.f32.mxu0 %v13134_v40 }
 0x18b   :  { %1630 = vmatmul.mubr.f32.gmra.mrb[14].mxu0 %v13136_v11 }
 0x18c   :  { %1635 = vmatprep.mubr.f32.mxu0 %v13137_v44 }
 0x18f   :  { %1637 = vmatmul.mubr.f32.gmra.mrb[16].mxu0 %v13139_v12 }
 0x190   :  { %1642 = vmatprep.mubr.f32.mxu0 %v13140_v57 }
 0x193   :  { %1644 = vmatmul.mubr.f32.gmra.mrb[18].mxu0 %v13142_v51 }
 0x194   :  { %1649 = vmatprep.mubr.f32.mxu0 %v13143_v52 }
 0x197   :  { %1651 = vmatmul.mubr.f32.gmra.mrb[20].mxu0 %v13145_v37 }
 0x198   :  { %1656 = vmatprep.mubr.f32.mxu0 %v13146_v6 }
 0x19b   :  { %1658 = vmatmul.mubr.f32.gmra.mrb[22].mxu0 %v13148_v60 }
 0x19c   :  { %1663 = vmatprep.mubr.f32.mxu0 %v13149_v18 }
 0x19f   :  { %1665 = vmatmul.mubr.f32.gmra.mrb[24].mxu0 %v13150_v58 }
 0x1a0   :  { %1670 = vmatprep.mubr.f32.mxu0 %v13151_v23 }
 0x1a3   :  { %1672 = vmatmul.mubr.f32.gmra.mrb[26].mxu0 %v13152_v10 }
 0x1a4   :  { %1677 = vmatprep.mubr.f32.mxu0 %v13153_v15 }
 0x1a7   :  { %1679 = vmatmul.mubr.f32.gmra.mrb[28].mxu0 %v13154_v16 }
 0x1a8   :  { %1684 = vmatprep.mubr.f32.mxu0 %v13155_v47 }
 0x1ab   :  { %1686 = vmatmul.mubr.f32.gmra.mrb[30].mxu0 %v13156_v63 }
 0x1ac   :  { %6770 = vmatprep.mubr.msk.f32.mxu0 %vm8055_vm1, %v13000_v33 }
 0x242   :  { %v9150_v38 = vpop.f32.mrb[0].mxu0 }
 0x243   :  { %13158 = vst [vmem:[#allocation14_spill] sm:$0xff] %v9150_v38  ;;  %v9154_v43 = vadd.f32 %v9148_v55, %v9150_v38  ;;  %v1584_v8 = vpop.f32.mrb[1].mxu0 }
 0x245   :  { %v1735_v54 = vmul.f32 %v9154_v43, %v9154_v43 }
 0x246   :  { %v9158_v5 = vpop.f32.mrb[2].mxu0 }
 0x247   :  { %13159 = vst [vmem:[#allocation15_spill] sm:$0xff] %v9158_v5  ;;  %v9162_v27 = vadd.f32 %v9148_v55, %v9158_v5  ;;  %1767 = vrot.lane.b32.xlu0 %v1735_v54, %s8054_s5  ;;  %v1591_v50 = vpop.f32.mrb[3].mxu0 }
 0x249   :  { %v1736_v28 = vmul.f32 %v9162_v27, %v9162_v27 }
 0x24a   :  { %v9167_v61 = vpop.f32.mrb[4].mxu0 }
 0x24b   :  { %13160 = vst [vmem:[#allocation19_spill] sm:$0xff] %v9167_v61  ;;  %v9171_v24 = vadd.f32 %v9148_v55, %v9167_v61  ;;  %1769 = vrot.lane.b32.xlu0 %v1736_v28, %s8054_s5  ;;  %v1598_v25 = vpop.f32.mrb[5].mxu0 }
 0x24d   :  { %v1737_v17 = vmul.f32 %v9171_v24, %v9171_v24 }
 0x24e   :  { %v9176_v14 = vpop.f32.mrb[6].mxu0 }
 0x24f   :  { %13161 = vst [vmem:[#allocation23_spill] sm:$0xff] %v9176_v14  ;;  %v9180_v56 = vadd.f32 %v9148_v55, %v9176_v14  ;;  %1771 = vrot.lane.b32.xlu1 %v1737_v17, %s8054_s5  ;;  %v1605_v3 = vpop.f32.mrb[7].mxu0  ;;  %v12610_v14 = vmov 36  }
 0x251   :  { %v1738_v41 = vmul.f32 %v9180_v56, %v9180_v56 }
 0x252   :  { %v9185_v20 = vpop.f32.mrb[8].mxu0 }
 0x253   :  { %13162 = vst [vmem:[#allocation26_spill] sm:$0xff] %v9185_v20  ;;  %v9189_v46 = vadd.f32 %v9148_v55, %v9185_v20  ;;  %1773 = vrot.lane.b32.xlu1 %v1738_v41, %s8054_s5  ;;  %v1612_v0 = vpop.f32.mrb[9].mxu0 }
 0x255   :  { %13163 = vst [vmem:[#allocation28_spill] sm:$0xff] %v9189_v46  ;;  %v1739_v13 = vmul.f32 %v9189_v46, %v9189_v46 }
 0x256   :  { %v9194_v42 = vpop.f32.mrb[10].mxu0 }
 0x257   :  { %13164 = vst [vmem:[#allocation29_spill] sm:$0xff] %v9194_v42  ;;  %v9198_v48 = vadd.f32 %v9148_v55, %v9194_v42  ;;  %1775 = vrot.lane.b32.xlu0 %v1739_v13, %s8054_s5  ;;  %v1619_v9 = vpop.f32.mrb[11].mxu0 }
 0x259   :  { %13165 = vst [vmem:[#allocation31_spill] sm:$0xff] %v9198_v48  ;;  %v1740_v29 = vmul.f32 %v9198_v48, %v9198_v48 }
 0x25a   :  { %v9203_v30 = vpop.f32.mrb[12].mxu0 }
 0x25b   :  { %13166 = vst [vmem:[#allocation34_spill] sm:$0xff] %v9203_v30  ;;  %v9207_v7 = vadd.f32 %v9148_v55, %v9203_v30  ;;  %1777 = vrot.lane.b32.xlu1 %v1740_v29, %s8054_s5  ;;  %v1626_v21 = vpop.f32.mrb[13].mxu0  ;;  %v13185_v30 = vmov 36  }
 0x25d   :  { %13167 = vst [vmem:[#allocation35_spill] sm:$0xff] %v9207_v7  ;;  %v1741_v34 = vmul.f32 %v9207_v7, %v9207_v7 }
 0x25e   :  { %v9212_v35 = vpop.f32.mrb[14].mxu0 }
 0x25f   :  { %13168 = vst [vmem:[#allocation36_spill] sm:$0xff] %v9212_v35  ;;  %v9216_v62 = vadd.f32 %v9148_v55, %v9212_v35  ;;  %1779 = vrot.lane.b32.xlu0 %v1741_v34, %s8054_s5  ;;  %v1633_v4 = vpop.f32.mrb[15].mxu0 }
 0x261   :  { %13169 = vst [vmem:[#allocation40_spill] sm:$0xff] %v9216_v62  ;;  %v1742_v26 = vmul.f32 %v9216_v62, %v9216_v62 }
 0x262   :  { %v9221_v32 = vpop.f32.mrb[16].mxu0 }
 0x263   :  { %13170 = vst [vmem:[#allocation41_spill] sm:$0xff] %v9221_v32  ;;  %v9225_v39 = vadd.f32 %v9148_v55, %v9221_v32  ;;  %1781 = vrot.lane.b32.xlu1 %v1742_v26, %s8054_s5  ;;  %v1640_v40 = vpop.f32.mrb[17].mxu0 }
 0x265   :  { %13171 = vst [vmem:[#allocation44_spill] sm:$0xff] %v9225_v39  ;;  %v1743_v36 = vmul.f32 %v9225_v39, %v9225_v39 }
 0x266   :  { %v9230_v11 = vpop.f32.mrb[18].mxu0 }
 0x267   :  { %13172 = vst [vmem:[#allocation43_spill] sm:$0xff] %v9230_v11  ;;  %v9234_v44 = vadd.f32 %v9148_v55, %v9230_v11  ;;  %1783 = vrot.lane.b32.xlu0 %v1743_v36, %s8054_s5  ;;  %v1647_v45 = vpop.f32.mrb[19].mxu0 }
 0x269   :  { %13173 = vst [vmem:[#allocation50_spill] sm:$0xff] %v9234_v44  ;;  %v1744_v12 = vmul.f32 %v9234_v44, %v9234_v44 }
 0x26a   :  { %v9239_v57 = vpop.f32.mrb[20].mxu0 }
 0x26b   :  { %13174 = vst [vmem:[#allocation51_spill] sm:$0xff] %v9239_v57  ;;  %v9243_v1 = vadd.f32 %v9148_v55, %v9239_v57  ;;  %1785 = vrot.lane.b32.xlu1 %v1744_v12, %s8054_s5  ;;  %v1654_v51 = vpop.f32.mrb[21].mxu0 }
 0x26d   :  { %13175 = vst [vmem:[#allocation52_spill] sm:$0xff] %v9243_v1  ;;  %v1745_v52 = vmul.f32 %v9243_v1, %v9243_v1 }
 0x26e   :  { %v9248_v19 = vpop.f32.mrb[22].mxu0 }
 0x26f   :  { %13176 = vst [vmem:[#allocation53_spill] sm:$0xff] %v9248_v19  ;;  %v9252_v37 = vadd.f32 %v9148_v55, %v9248_v19  ;;  %1787 = vrot.lane.b32.xlu0 %v1745_v52, %s8054_s5  ;;  %v1661_v6 = vpop.f32.mrb[23].mxu0  ;;  %v12627_v19 = vmov 33  }
 0x270   :  { %7953 = vset.pattern.permute.xlu0 %v12627_v19 }
 0x271   :  { %13177 = vst [vmem:[#allocation54_spill] sm:$0xff] %v9252_v37  ;;  %v1746_v59 = vmul.f32 %v9252_v37, %v9252_v37 }
 0x272   :  { %v9257_v60 = vpop.f32.mrb[24].mxu0 }
 0x273   :  { %13178 = vst [vmem:[#allocation59_spill] sm:$0xff] %v9257_v60  ;;  %v9261_v18 = vadd.f32 %v9148_v55, %v9257_v60  ;;  %1789 = vrot.lane.b32.xlu1 %v1746_v59, %s8054_s5  ;;  %v1668_v58 = vpop.f32.mrb[25].mxu0 }
 0x275   :  { %13179 = vst [vmem:[#allocation58_spill] sm:$0xff] %v9261_v18  ;;  %v1747_v23 = vmul.f32 %v9261_v18, %v9261_v18 }
 0x276   :  { %v9266_v10 = vpop.f32.mrb[26].mxu0 }
 0x277   :  { %13180 = vst [vmem:[#allocation62_spill] sm:$0xff] %v9266_v10  ;;  %v9270_v15 = vadd.f32 %v9148_v55, %v9266_v10  ;;  %1791 = vrot.lane.b32.xlu0 %v1747_v23, %s8054_s5  ;;  %v1675_v16 = vpop.f32.mrb[27].mxu0 }
 0x279   :  { %v1748_v47 = vmul.f32 %v9270_v15, %v9270_v15 }
 0x27a   :  { %v9275_v63 = vpop.f32.mrb[28].mxu0 }
 0x27b   :  { %13181 = vst [vmem:[#allocation66_spill] sm:$0xff] %v9275_v63  ;;  %v9279_v22 = vadd.f32 %v9148_v55, %v9275_v63  ;;  %1793 = vrot.lane.b32.xlu1 %v1748_v47, %s8054_s5  ;;  %v1682_v49 = vpop.f32.mrb[29].mxu0 }
 0x27d   :  { %v1749_v2 = vmul.f32 %v9279_v22, %v9279_v22 }
 0x27e   :  { %v9284_v8 = vpop.f32.mrb[30].mxu0 }
 0x27f   :  { %13182 = vst [vmem:[#allocation6_spill] sm:$0xff] %v9284_v8  ;;  %v9292_v54 = vadd.f32 %v9148_v55, %v9284_v8  ;;  %1795 = vrot.lane.b32.xlu0 %v1749_v2, %s8054_s5  ;;  %v1689_v50 = vpop.f32.mrb[31].mxu0 }
 0x281   :  { %v1750_v28 = vmul.f32 %v9292_v54, %v9292_v54 }
 0x283   :  { %1797 = vrot.lane.b32.xlu1 %v1750_v28, %s8054_s5 }
 0x2b9   :  { %v1768_v25 = vpop.permute.xlu0 %1767 }
 0x2ba   :  { %v1816_v17 = vsel %vm1815_vm2, %v9154_v43, %v1768_v25 }
 0x2bb   :  { %v1833_v3 = vand.u32 4294901760, %v1816_v17 }
 0x2bd   :  { %v1770_v41 = vpop.permute.xlu0 %1769  ;;  %v9302_v55 = vsub.f32 %v1816_v17, %v1833_v3 }
 0x2be   :  { %v1817_v0 = vsel %vm1815_vm2, %v9162_v27, %v1770_v41 }
 0x2bf   :  { %v1836_v13 = vand.u32 4294901760, %v1817_v0  ;;  %v12603_v4 = vand.u32 4294901760, %v9302_v55  ;;  %v13186_v42 = vand.u32 4294901760, %v9302_v55 }
 0x2c1   :  { %v9304_v9 = vsub.f32 %v1817_v0, %v1836_v13  ;;  %v1772_v29 = vpop.permute.xlu1 %1771  ;;  %v9306_v21 = vpack.c.bf16 %v1836_v13, %v1833_v3  ;;  %v1922_v20 = vsub.f32 %v9302_v55, %v13186_v42 }
 0x2c2   :  { %v1818_v34 = vsel %vm1815_vm2, %v9171_v24, %v1772_v29 }
 0x2c3   :  { %v12604_v26 = vand.u32 4294901760, %v9304_v9  ;;  %v1839_v40 = vand.u32 4294901760, %v1818_v34  ;;  %7130 = vmatpush3.bf16.msra.mxu1 %v9306_v21 }
 0x2c4   :  { %7131 = vmatprep.subr.bf16.mxu1 %v12919_v53 }
 0x2c5   :  { %v1774_v36 = vpop.permute.xlu1 %1773  ;;  %v9318_v45 = vpack.c.bf16 %v12604_v26, %v12603_v4  ;;  %v9322_v51 = vsub.f32 %v1818_v34, %v1839_v40 }
 0x2c6   :  { %v1819_v12 = vsel %vm1815_vm2, %v9180_v56, %v1774_v36 }
 0x2c7   :  { %v1842_v52 = vand.u32 4294901760, %v1819_v12  ;;  %v12601_v16 = vand.u32 4294901760, %v9322_v51 }
 0x2c9   :  { %v9324_v6 = vsub.f32 %v1819_v12, %v1842_v52  ;;  %v1776_v59 = vpop.permute.xlu0 %1775  ;;  %v9326_v58 = vpack.c.bf16 %v1842_v52, %v1839_v40 }
 0x2ca   :  { %v1820_v23 = vsel %vm1815_vm2, %v9189_v46, %v1776_v59 }
 0x2cb   :  { %v12602_v47 = vand.u32 4294901760, %v9324_v6  ;;  %v1845_v49 = vand.u32 4294901760, %v1820_v23  ;;  %7133 = vmatpush3.bf16.msra.mxu1 %v9326_v58 }
 0x2cc   :  { %7134 = vmatprep.subr.bf16.mxu1 %v12919_v53 }
 0x2cd   :  { %v1778_v2 = vpop.permute.xlu1 %1777  ;;  %v9338_v50 = vpack.c.bf16 %v12602_v47, %v12601_v16  ;;  %v9342_v25 = vsub.f32 %v1820_v23, %v1845_v49 }
 0x2ce   :  { %v1821_v28 = vsel %vm1815_vm2, %v9198_v48, %v1778_v2 }
 0x2cf   :  { %v1848_v17 = vand.u32 4294901760, %v1821_v28  ;;  %v12597_v29 = vand.u32 4294901760, %v9342_v25 }
 0x2d1   :  { %v9344_v3 = vsub.f32 %v1821_v28, %v1848_v17  ;;  %v1780_v41 = vpop.permute.xlu0 %1779  ;;  %v9346_v0 = vpack.c.bf16 %v1848_v17, %v1845_v49  ;;  %v12598_v49 = vmov 34  }
 0x2d2   :  { %v1822_v13 = vsel %vm1815_vm2, %v9207_v7, %v1780_v41  ;;  %7954 = vset.pattern.permute.xlu1 %v12598_v49  ;;  %v9372_v41 = vld [vmem:[%s12440_s0 + $0x8] sm:$0xff] }
 0x2d3   :  { %v12600_v34 = vand.u32 4294901760, %v9344_v3  ;;  %v1851_v40 = vand.u32 4294901760, %v1822_v13  ;;  %7136 = vmatpush3.bf16.msra.mxu1 %v9346_v0  ;;  %2733 = vperm.xlu1 %7954, %v9372_v41  }
 0x2d4   :  { %7137 = vmatprep.subr.bf16.mxu1 %v12919_v53  ;;  %2653 = vperm.xlu0 %7953, %v9372_v41  }
 0x2d5   :  { %v1782_v36 = vpop.permute.xlu1 %1781  ;;  %v9358_v12 = vpack.c.bf16 %v12600_v34, %v12597_v29  ;;  %v9362_v59 = vsub.f32 %v1822_v13, %v1851_v40 }
 0x2d6   :  { %v1823_v52 = vsel %vm1815_vm2, %v9216_v62, %v1782_v36 }
 0x2d7   :  { %v1854_v23 = vand.u32 4294901760, %v1823_v52  ;;  %v12608_v36 = vand.u32 4294901760, %v9362_v59 }
 0x2d9   :  { %v9365_v2 = vsub.f32 %v1823_v52, %v1854_v23  ;;  %v1784_v28 = vpop.permute.xlu0 %1783  ;;  %v9367_v17 = vpack.c.bf16 %v1854_v23, %v1851_v40  ;;  %v12605_v52 = vmov 35  }
 0x2da   :  { %v1824_v13 = vsel %vm1815_vm2, %v9225_v39, %v1784_v28  ;;  %7955 = vset.pattern.permute.xlu1 %v12605_v52  ;;  %v13191_v39 = vand.u32 4294901760, %v9342_v25 }
 0x2db   :  { %v12609_v29 = vand.u32 4294901760, %v9365_v2  ;;  %v1857_v49 = vand.u32 4294901760, %v1824_v13  ;;  %7139 = vmatpush3.bf16.msra.mxu1 %v9367_v17  ;;  %2813 = vperm.xlu1 %7955, %v9372_v41  }
 0x2dc   :  { %7140 = vmatprep.subr.bf16.mxu1 %v12919_v53  ;;  %v1950_v62 = vsub.f32 %v9342_v25, %v13191_v39 }
 0x2dd   :  { %v1786_v40 = vpop.permute.xlu1 %1785  ;;  %v9386_v23 = vpack.c.bf16 %v12609_v29, %v12608_v36  ;;  %v9391_v34 = vsub.f32 %v1824_v13, %v1857_v49 }
 0x2de   :  { %v1825_v28 = vsel %vm1815_vm2, %v9234_v44, %v1786_v40  ;;  %v1951_v39 = vand.u32 4294901760, %v1950_v62  ;;  %v9531_v62 = vld [vmem:[%s12440_s0 + $0x38] sm:$0xff] }
 0x2df   :  { %v1860_v16 = vand.u32 4294901760, %v1825_v28  ;;  %7956 = vset.pattern.permute.xlu1 %v12610_v14  ;;  %v12615_v36 = vand.u32 4294901760, %v9391_v34  ;;  %v12617_v14 = vmov 37  }
 0x2e0   :  { %2893 = vperm.xlu1 %7956, %v9372_v41  }
 0x2e1   :  { %v9393_v47 = vsub.f32 %v1825_v28, %v1860_v16  ;;  %v1788_v4 = vpop.permute.xlu0 %1787  ;;  %v9395_v26 = vpack.c.bf16 %v1860_v16, %v1857_v49 }
 0x2e2   :  { %v1826_v52 = vsel %vm1815_vm2, %v9243_v1, %v1788_v4  ;;  %v13188_v1 = vand.u32 4294901760, %v9322_v51 }
 0x2e3   :  { %v12616_v40 = vand.u32 4294901760, %v9393_v47  ;;  %v1863_v29 = vand.u32 4294901760, %v1826_v52  ;;  %7142 = vmatpush3.bf16.msra.mxu1 %v9395_v26  ;;  %v13194_v7 = vand.u32 4294901760, %v9393_v47 }
 0x2e4   :  { %7143 = vmatprep.subr.bf16.mxu1 %v12919_v53  ;;  %7957 = vset.pattern.permute.xlu1 %v12617_v14  ;;  %v13183_v14 = vmov 35   ;;  %v1936_v44 = vsub.f32 %v9322_v51, %v13188_v1 }
 0x2e5   :  { %v1790_v13 = vpop.permute.xlu1 %1789  ;;  %v9409_v4 = vpack.c.bf16 %v12616_v40, %v12615_v36  ;;  %v9413_v49 = vsub.f32 %v1826_v52, %v1863_v29  ;;  %3006 = vperm.xlu1 %7957, %v9372_v41  }
 0x2e6   :  { %v1827_v16 = vsel %vm1815_vm2, %v9252_v37, %v1790_v13  ;;  %v1923_v37 = vand.u32 4294901760, %v1922_v20 }
 0x2e7   :  { %v1866_v28 = vand.u32 4294901760, %v1827_v16  ;;  %v12625_v40 = vand.u32 4294901760, %v9413_v49 }
 0x2e9   :  { %v9417_v61 = vsub.f32 %v1827_v16, %v1866_v28  ;;  %v1792_v8 = vpop.permute.xlu0 %1791  ;;  %v9419_v63 = vpack.c.bf16 %v1866_v28, %v1863_v29  ;;  %7958 = vset.pattern.permute.xlu1 %v13183_v14  ;;  %v9431_v29 = vld [vmem:[%s12440_s0 + $0x18] sm:$0xff] }
 0x2ea   :  { %v1828_v36 = vsel %vm1815_vm2, %v9261_v18, %v1792_v8  ;;  %2817 = vperm.xlu1 %7958, %v9431_v29   ;;  %2657 = vperm.xlu0 %7953, %v9431_v29  }
 0x2eb   :  { %v12626_v13 = vand.u32 4294901760, %v9417_v61  ;;  %v1869_v52 = vand.u32 4294901760, %v1828_v36  ;;  %7145 = vmatpush3.bf16.msra.mxu1 %v9419_v63 }
 0x2ec   :  { %7146 = vmatprep.subr.bf16.mxu1 %v12919_v53 }
 0x2ed   :  { %v1794_v10 = vpop.permute.xlu1 %1793  ;;  %v9438_v8 = vpack.c.bf16 %v12626_v13, %v12625_v40  ;;  %v9442_v28 = vsub.f32 %v1828_v36, %v1869_v52 }
 0x2ee   :  { %v1829_v16 = vsel %vm1815_vm2, %v9270_v15, %v1794_v10  ;;  %7960 = vset.pattern.permute.xlu1 %v12627_v19  ;;  %v9455_v10 = vld [vmem:[%s12440_s0 + $0x28] sm:$0xff] }
 0x2ef   :  { %v1872_v60 = vand.u32 4294901760, %v1829_v16  ;;  %2661 = vperm.xlu1 %7960, %v9455_v10   ;;  %v12635_v36 = vand.u32 4294901760, %v9442_v28 }
 0x2f1   :  { %v9445_v57 = vsub.f32 %v1829_v16, %v1872_v60  ;;  %v1796_v11 = vpop.permute.xlu0 %1795  ;;  %v9447_v32 = vpack.c.bf16 %v1872_v60, %v1869_v52 }
 0x2f2   :  { %v1830_v40 = vsel %vm1815_vm2, %v9279_v22, %v1796_v11  ;;  %v13184_v11 = vand.u32 4294901760, %v9304_v9 }
 0x2f3   :  { %v12636_v16 = vand.u32 4294901760, %v9445_v57  ;;  %v1875_v60 = vand.u32 4294901760, %v1830_v40  ;;  %7148 = vmatpush3.bf16.msra.mxu1 %v9447_v32  ;;  %7961 = vset.pattern.permute.xlu1 %v13185_v30 }
 0x2f4   :  { %7149 = vmatprep.subr.bf16.mxu1 %v12919_v53  ;;  %v1929_v52 = vsub.f32 %v9304_v9, %v13184_v11  ;;  %2897 = vperm.xlu1 %7961, %v9431_v29  }
 0x2f5   :  { %v1798_v13 = vpop.permute.xlu1 %1797  ;;  %v9470_v19 = vpack.c.bf16 %v12636_v16, %v12635_v36  ;;  %v9479_v5 = vsub.f32 %v1830_v40, %v1875_v60  ;;  %v13187_v36 = vand.u32 4294901760, %v9324_v6 }
 0x2f6   :  { %v1831_v35 = vsel %vm1815_vm2, %v9292_v54, %v1798_v13  ;;  %v1930_v38 = vand.u32 4294901760, %v1929_v52  ;;  %v13189_v52 = vmov 37  }
 0x2f7   :  { %v1878_v11 = vand.u32 4294901760, %v1831_v35  ;;  %v1943_v16 = vsub.f32 %v9324_v6, %v13187_v36  ;;  %v12643_v42 = vand.u32 4294901760, %v9479_v5  ;;  %v13190_v36 = vand.u32 4294901760, %v9344_v3 }
 0x2f8   :  { %7962 = vset.pattern.permute.xlu1 %v13189_v52 }
 0x2f9   :  { %v9485_v18 = vsub.f32 %v1831_v35, %v1878_v11  ;;  %v9487_v13 = vpack.c.bf16 %v1878_v11, %v1875_v60  ;;  %3010 = vperm.xlu1 %7962, %v9431_v29   ;;  %v1944_v35 = vand.u32 4294901760, %v1943_v16  ;;  %v1957_v20 = vsub.f32 %v9344_v3, %v13190_v36 }
 0x2fa   :  { %v7153_v60 = vpack.c.bf16 %v1930_v38, %v1923_v37  ;;  %v1937_v11 = vand.u32 4294901760, %v1936_v44  ;;  %v13192_v37 = vand.u32 4294901760, %v9365_v2  ;;  %v13193_v44 = vand.u32 4294901760, %v9362_v59 }
 0x2fb   :  { %v2026_v40 = vand.u32 4294901760, %v9485_v18  ;;  %7151 = vmatpush3.bf16.msra.mxu1 %v9487_v13  ;;  %v1958_v38 = vand.u32 4294901760, %v1957_v20 }
 0x2fc   :  { %7152 = vmatprep.subr.bf16.mxu1 %v12919_v53  ;;  %v1971_v16 = vsub.f32 %v9365_v2, %v13192_v37  ;;  %v7156_v36 = vpack.c.bf16 %v1944_v35, %v1937_v11  ;;  %v1985_v35 = vsub.f32 %v9393_v47, %v13194_v7  ;;  %v13195_v37 = vmov 33  }
 0x2fd   :  { %v9503_v1 = vpack.c.bf16 %v2026_v40, %v12643_v42  ;;  %7963 = vset.pattern.permute.xlu1 %v13183_v14  ;;  %v12645_v42 = vmov 38   ;;  %v7159_v11 = vpack.c.bf16 %v1958_v38, %v1951_v39  ;;  %v13197_v38 = vand.u32 4294901760, %v9417_v61 }
 0x2fe   :  { %6561 = vmatmul.mubr.f32.vlgmr.msra.gmra.mrb[0].mxu1 %v13000_v33  ;;  %7959 = vset.pattern.permute.xlu0 %v12645_v42  ;;  %v1972_v20 = vand.u32 4294901760, %v1971_v16  ;;  %v1986_v7 = vand.u32 4294901760, %v1985_v35 }
 0x2ff   :  { %7154 = vmatpush3.bf16.msra.mxu1 %v7153_v60  ;;  %6595 = vmatprep.mubr.msk.f32.mxu1 %vm8055_vm1, %v13000_v33  ;;  %v1964_v60 = vsub.f32 %v9362_v59, %v13193_v44  ;;  %v13196_v44 = vand.u32 4294901760, %v9391_v34  ;;  %v1999_v39 = vsub.f32 %v9417_v61, %v13197_v38 }
 0x300   :  { %7155 = vmatprep.subr.bf16.mxu1 %v12919_v53  ;;  %2821 = vperm.xlu1 %7963, %v9455_v10  }
 0x301   :  { %3086 = vperm.xlu0 %7959, %v9372_v41   ;;  %v1978_v16 = vsub.f32 %v9391_v34, %v13196_v44  ;;  %v2000_v35 = vand.u32 4294901760, %v1999_v39  ;;  %v2027_v39 = vsub.f32 %v9485_v18, %v2026_v40 }
 0x303   :  { %7157 = vmatpush3.bf16.msra.mxu1 %v7156_v36  ;;  %v1965_v36 = vand.u32 4294901760, %v1964_v60  ;;  %v1979_v48 = vand.u32 4294901760, %v1978_v16  ;;  %v13198_v60 = vand.u32 4294901760, %v9413_v49  ;;  %v13200_v16 = vand.u32 4294901760, %v9442_v28 }
 0x304   :  { %7158 = vmatprep.subr.bf16.mxu1 %v12919_v53  ;;  %7964 = vset.pattern.permute.xlu1 %v13195_v37 }
 0x305   :  { %3090 = vperm.xlu0 %7959, %v9431_v29   ;;  %2665 = vperm.xlu1 %7964, %v9531_v62   ;;  %v7162_v42 = vpack.c.bf16 %v1972_v20, %v1965_v36  ;;  %v1992_v46 = vsub.f32 %v9413_v49, %v13198_v60  ;;  %v7165_v20 = vpack.c.bf16 %v1986_v7, %v1979_v48  ;;  %v9562_v48 = vld [vmem:[%s12440_s0 + $0x48] sm:$0xff]  ;;  %v13201_v7 = vand.u32 4294901760, %v9479_v5 }
 0x306   :  { %v2006_v38 = vsub.f32 %v9442_v28, %v13200_v16  ;;  %v9582_v16 = vld [vmem:[%s12440_s0 + $0x68] sm:$0xff] }
 0x307   :  { %7160 = vmatpush3.bf16.msra.mxu1 %v7159_v11  ;;  %v13199_v11 = vand.u32 4294901760, %v9445_v57  ;;  %v1993_v36 = vand.u32 4294901760, %v1992_v46 }
 0x308   :  { %7161 = vmatprep.subr.bf16.mxu1 %v12919_v53  ;;  %v2007_v46 = vand.u32 4294901760, %v2006_v38  ;;  %v7177_v38 = vpack.c.bf16 %v9304_v9, %v9302_v55  ;;  %v7180_v55 = vpack.c.bf16 %v9324_v6, %v9322_v51  ;;  %v9606_v9 = vld [vmem:[%s12440_s0 + $0x88] sm:$0xff]  ;;  %v9617_v51 = vld [vmem:[%s12440_s0 + $0x98] sm:$0xff]  ;;  %v7186_v6 = vpack.c.bf16 %v9365_v2, %v9362_v59 }
 0x309   :  { %3094 = vperm.xlu0 %7959, %v9455_v10   ;;  %7965 = vset.pattern.permute.xlu1 %v13185_v30  ;;  %v2013_v44 = vsub.f32 %v9445_v57, %v13199_v11  ;;  %v7168_v60 = vpack.c.bf16 %v2000_v35, %v1993_v36  ;;  %v2020_v11 = vsub.f32 %v9479_v5, %v13201_v7  ;;  %v9574_v35 = vld [vmem:[%s12440_s0 + $0x58] sm:$0xff] }
 0x30a   :  { %2901 = vperm.xlu1 %7965, %v9455_v10   ;;  %v9637_v59 = vld [vmem:[%s12440_s0 + $0xb8] sm:$0xff]  ;;  %v7192_v2 = vpack.c.bf16 %v9417_v61, %v9413_v49  ;;  %v7198_v61 = vpack.c.bf16 %v9485_v18, %v9479_v5  ;;  %v12652_v18 = vmov 39  }
 0x30b   :  { %7163 = vmatpush3.bf16.msra.mxu1 %v7162_v42  ;;  %v2014_v42 = vand.u32 4294901760, %v2013_v44  ;;  %v2028_v44 = vand.u32 4294901760, %v2027_v39  ;;  %v9593_v39 = vld [vmem:[%s12440_s0 + $0x78] sm:$0xff] }
 0x30c   :  { %7164 = vmatprep.subr.bf16.mxu1 %v12919_v53  ;;  %v9724_v5 = vld [vmem:[%s12440_s0 + $0xd8] sm:$0xff] }
 0x30d   :  { %3098 = vperm.xlu0 %7959, %v9531_v62   ;;  %v7171_v40 = vpack.c.bf16 %v2014_v42, %v2007_v46  ;;  %v12649_v42 = vmov 0.0078125   ;;  %v13202_v46 = vmov 34  }
 0x30e   :  { %7966 = vset.pattern.permute.xlu1 %v13189_v52 }
 0x30f   :  { %7166 = vmatpush3.bf16.msra.mxu1 %v7165_v20  ;;  %3014 = vperm.xlu1 %7966, %v9455_v10   ;;  %v2021_v20 = vand.u32 4294901760, %v2020_v11 }
 0x310   :  { %7167 = vmatprep.subr.bf16.mxu1 %v12919_v53 }
 0x311   :  { %3102 = vperm.xlu0 %7959, %v9562_v48   ;;  %v7174_v36 = vpack.c.bf16 %v2028_v44, %v2021_v20 }
 0x313   :  { %7169 = vmatpush3.bf16.msra.mxu1 %v7168_v60  ;;  %7967 = vset.pattern.permute.xlu1 %v13183_v14  ;;  %v7183_v60 = vpack.c.bf16 %v9344_v3, %v9342_v25  ;;  %v9627_v25 = vld [vmem:[%s12440_s0 + $0xa8] sm:$0xff]  ;;  %v7189_v3 = vpack.c.bf16 %v9393_v47, %v9391_v34  ;;  %v7195_v34 = vpack.c.bf16 %v9445_v57, %v9442_v28 }
 0x314   :  { %7170 = vmatprep.subr.bf16.mxu1 %v12919_v53  ;;  %2825 = vperm.xlu1 %7967, %v9531_v62   ;;  %v9648_v47 = vld [vmem:[%s12440_s0 + $0xc8] sm:$0xff] }
 0x315   :  { %3106 = vperm.xlu0 %7959, %v9574_v35   ;;  %v9734_v57 = vld [vmem:[%s12440_s0 + $0xe8] sm:$0xff] }
 0x317   :  { %7172 = vmatpush3.bf16.msra.mxu1 %v7171_v40  ;;  %v13213_v40 = vmov 38  }
 0x318   :  { %7173 = vmatprep.subr.bf16.mxu1 %v12919_v53  ;;  %7968 = vset.pattern.permute.xlu1 %v13195_v37 }
 0x319   :  { %3110 = vperm.xlu0 %7959, %v9582_v16   ;;  %2669 = vperm.xlu1 %7968, %v9562_v48  }
 0x31b   :  { %7175 = vmatpush3.bf16.msra.mxu1 %v7174_v36  ;;  %v9889_v36 = vld [vmem:[%s12440_s0 + $0xf8] sm:$0xff]  ;;  %s8065_s0 = smov 112  }
 0x31c   :  { %7176 = vmatprep.subr.bf16.mxu1 %v12919_v53 }
 0x31d   :  { %3114 = vperm.xlu0 %7959, %v9593_v39   ;;  %7969 = vset.pattern.permute.xlu1 %v13185_v30 }
 0x31e   :  { %6596 = vmatmul.mubr.f32.vlgmr.msra.gmra.mrb[0].mxu1 %v12649_v42  ;;  %2905 = vperm.xlu1 %7969, %v9531_v62  }
 0x31f   :  { %7178 = vmatpush3.bf16.msra.mxu1 %v7177_v38  ;;  %6630 = vmatprep.mubr.msk.f32.mxu1 %vm8055_vm1, %v13000_v33 }
 0x320   :  { %7179 = vmatprep.subr.bf16.mxu1 %v12919_v53 }
 0x321   :  { %3118 = vperm.xlu0 %7959, %v9606_v9  }
 0x322   :  { %7970 = vset.pattern.permute.xlu1 %v13189_v52 }
 0x323   :  { %7181 = vmatpush3.bf16.msra.mxu1 %v7180_v55  ;;  %3018 = vperm.xlu1 %7970, %v9531_v62  }
 0x324   :  { %7182 = vmatprep.subr.bf16.mxu1 %v12919_v53 }
 0x325   :  { %3122 = vperm.xlu0 %7959, %v9617_v51  }
 0x327   :  { %7184 = vmatpush3.bf16.msra.mxu1 %v7183_v60  ;;  %7971 = vset.pattern.permute.xlu1 %v13183_v14 }
 0x328   :  { %7185 = vmatprep.subr.bf16.mxu1 %v12919_v53  ;;  %2829 = vperm.xlu1 %7971, %v9562_v48  }
 0x329   :  { %3126 = vperm.xlu0 %7959, %v9627_v25  }
 0x32b   :  { %7187 = vmatpush3.bf16.msra.mxu1 %v7186_v6 }
 0x32c   :  { %7188 = vmatprep.subr.bf16.mxu1 %v12919_v53  ;;  %7972 = vset.pattern.permute.xlu1 %v13195_v37 }
 0x32d   :  { %3130 = vperm.xlu0 %7959, %v9637_v59   ;;  %2673 = vperm.xlu1 %7972, %v9574_v35  }
 0x32f   :  { %7190 = vmatpush3.bf16.msra.mxu1 %v7189_v3 }
 0x330   :  { %7191 = vmatprep.subr.bf16.mxu1 %v12919_v53 }
 0x331   :  { %3134 = vperm.xlu0 %7959, %v9648_v47   ;;  %7973 = vset.pattern.permute.xlu1 %v13185_v30 }
 0x332   :  { %2909 = vperm.xlu1 %7973, %v9562_v48  }
 0x333   :  { %7193 = vmatpush3.bf16.msra.mxu1 %v7192_v2 }
 0x334   :  { %7194 = vmatprep.subr.bf16.mxu1 %v12919_v53 }
 0x335   :  { %8008 = vset.pattern.permute.xlu0 %v13202_v46 }
 0x336   :  { %2737 = vperm.xlu0 %8008, %v9431_v29   ;;  %7974 = vset.pattern.permute.xlu1 %v13189_v52 }
 0x337   :  { %7196 = vmatpush3.bf16.msra.mxu1 %v7195_v34  ;;  %3022 = vperm.xlu1 %7974, %v9562_v48  }
 0x338   :  { %7197 = vmatprep.subr.bf16.mxu1 %v12919_v53 }
 0x33a   :  { %2741 = vperm.xlu0 %8008, %v9455_v10  }
 0x33b   :  { %7199 = vmatpush3.bf16.msra.mxu1 %v7198_v61  ;;  %7975 = vset.pattern.permute.xlu1 %v13183_v14 }
 0x33c   :  { %7200 = vmatprep.subr.bf16.mxu1 %v12919_v53  ;;  %2833 = vperm.xlu1 %7975, %v9574_v35  }
 0x33e   :  { %6631 = vmatmul.mubr.f32.vlgmr.msra.gmra.mrb[0].mxu1 %v13000_v33  ;;  %2745 = vperm.xlu0 %8008, %v9531_v62  }
 0x33f   :  { %7202 = vmatpush3.bf16.msra.mxu1 %v9306_v21  ;;  %6665 = vmatprep.mubr.msk.f32.mxu1 %vm8055_vm1, %v13000_v33 }
 0x340   :  { %7203 = vmatprep.subr.bf16.mxu1 %v12919_v53  ;;  %7976 = vset.pattern.permute.xlu1 %v13195_v37 }
 0x341   :  { %2677 = vperm.xlu1 %7976, %v9582_v16  }
 0x342   :  { %2749 = vperm.xlu0 %8008, %v9562_v48  }
 0x343   :  { %7205 = vmatpush3.bf16.msra.mxu1 %v9326_v58 }
 0x344   :  { %7206 = vmatprep.subr.bf16.mxu1 %v12919_v53 }
 0x345   :  { %7977 = vset.pattern.permute.xlu1 %v13185_v30 }
 0x346   :  { %2753 = vperm.xlu0 %8008, %v9574_v35   ;;  %2913 = vperm.xlu1 %7977, %v9574_v35  }
 0x347   :  { %7208 = vmatpush3.bf16.msra.mxu1 %v9346_v0 }
 0x348   :  { %7209 = vmatprep.subr.bf16.mxu1 %v12919_v53 }
 0x34a   :  { %2757 = vperm.xlu0 %8008, %v9582_v16   ;;  %7978 = vset.pattern.permute.xlu1 %v13189_v52 }
 0x34b   :  { %7211 = vmatpush3.bf16.msra.mxu1 %v9367_v17  ;;  %3026 = vperm.xlu1 %7978, %v9574_v35  }
 0x34c   :  { %7212 = vmatprep.subr.bf16.mxu1 %v12919_v53 }
 0x34e   :  { %2761 = vperm.xlu0 %8008, %v9593_v39  }
 0x34f   :  { %7214 = vmatpush3.bf16.msra.mxu1 %v9395_v26  ;;  %7979 = vset.pattern.permute.xlu1 %v13183_v14 }
 0x350   :  { %7215 = vmatprep.subr.bf16.mxu1 %v12919_v53  ;;  %2837 = vperm.xlu1 %7979, %v9582_v16  }
 0x352   :  { %2765 = vperm.xlu0 %8008, %v9606_v9  }
 0x353   :  { %7217 = vmatpush3.bf16.msra.mxu1 %v9419_v63 }
 0x354   :  { %7218 = vmatprep.subr.bf16.mxu1 %v12919_v53  ;;  %7980 = vset.pattern.permute.xlu1 %v13195_v37 }
 0x355   :  { %2681 = vperm.xlu1 %7980, %v9593_v39  }
 0x356   :  { %2769 = vperm.xlu0 %8008, %v9617_v51  }
 0x357   :  { %7220 = vmatpush3.bf16.msra.mxu1 %v9447_v32 }
 0x358   :  { %7221 = vmatprep.subr.bf16.mxu1 %v12919_v53 }
 0x359   :  { %7981 = vset.pattern.permute.xlu1 %v13185_v30 }
 0x35a   :  { %2773 = vperm.xlu0 %8008, %v9627_v25   ;;  %2917 = vperm.xlu1 %7981, %v9582_v16  }
 0x35b   :  { %7223 = vmatpush3.bf16.msra.mxu1 %v9487_v13 }
 0x35c   :  { %7224 = vmatprep.subr.bf16.mxu1 %v12919_v53 }
 0x35e   :  { %6666 = vmatmul.mubr.f32.vlgmr.msra.gmra.mrb[0].mxu1 %v13000_v33  ;;  %2777 = vperm.xlu0 %8008, %v9637_v59  }
 0x35f   :  { %7226 = vmatpush3.bf16.msra.mxu1 %v9318_v45  ;;  %6700 = vmatprep.mubr.msk.f32.mxu1 %vm8055_vm1, %v13000_v33 }
 0x360   :  { %7227 = vmatprep.subr.bf16.mxu1 %v12919_v53  ;;  %7982 = vset.pattern.permute.xlu1 %v13189_v52 }
 0x361   :  { %3030 = vperm.xlu1 %7982, %v9582_v16  }
 0x362   :  { %2781 = vperm.xlu0 %8008, %v9648_v47  }
 0x363   :  { %7229 = vmatpush3.bf16.msra.mxu1 %v9338_v50 }
 0x364   :  { %7230 = vmatprep.subr.bf16.mxu1 %v12919_v53 }
 0x365   :  { %7983 = vset.pattern.permute.xlu1 %v13183_v14 }
 0x366   :  { %2841 = vperm.xlu1 %7983, %v9593_v39   ;;  %2785 = vperm.xlu0 %8008, %v9724_v5  }
 0x367   :  { %7232 = vmatpush3.bf16.msra.mxu1 %v9358_v12 }
 0x368   :  { %7233 = vmatprep.subr.bf16.mxu1 %v12919_v53 }
 0x36a   :  { %7984 = vset.pattern.permute.xlu1 %v13195_v37  ;;  %2789 = vperm.xlu0 %8008, %v9734_v57  }
 0x36b   :  { %7235 = vmatpush3.bf16.msra.mxu1 %v9386_v23  ;;  %2685 = vperm.xlu1 %7984, %v9606_v9   ;;  %v9849_v23 = vpop.permute.xlu0 %2653 }
 0x36c   :  { %7236 = vmatprep.subr.bf16.mxu1 %v12919_v53 }
 0x36e   :  { %8013 = vset.pattern.permute.xlu0 %v13183_v14 }
 0x36f   :  { %7238 = vmatpush3.bf16.msra.mxu1 %v9409_v4  ;;  %7985 = vset.pattern.permute.xlu1 %v13185_v30  ;;  %v9855_v49 = vpop.permute.xlu0 %2657 }
 0x370   :  { %7239 = vmatprep.subr.bf16.mxu1 %v12919_v53  ;;  %2921 = vperm.xlu1 %7985, %v9593_v39  }
 0x371   :  { %2869 = vperm.xlu0 %8013, %v9734_v57  }
 0x373   :  { %7241 = vmatpush3.bf16.msra.mxu1 %v9438_v8 }
 0x374   :  { %7242 = vmatprep.subr.bf16.mxu1 %v12919_v53  ;;  %7986 = vset.pattern.permute.xlu1 %v13189_v52 }
 0x375   :  { %8016 = vset.pattern.permute.xlu0 %v13185_v30  ;;  %3034 = vperm.xlu1 %7986, %v9593_v39  }
 0x376   :  { %2949 = vperm.xlu0 %8016, %v9734_v57  }
 0x377   :  { %7244 = vmatpush3.bf16.msra.mxu1 %v9470_v19  ;;  %v8064_v19 = vmov 32  }
 0x378   :  { %7245 = vmatprep.subr.bf16.mxu1 %v12919_v53 }
 0x379   :  { %7987 = vset.pattern.permute.xlu1 %v13183_v14 }
 0x37a   :  { %2845 = vperm.xlu1 %7987, %v9606_v9   ;;  %8021 = vset.pattern.permute.xlu0 %v12652_v18 }
 0x37b   :  { %7247 = vmatpush3.bf16.msra.mxu1 %v9503_v1  ;;  %3166 = vperm.xlu0 %8021, %v9372_v41  }
 0x37c   :  { %7248 = vmatprep.subr.bf16.mxu1 %v12919_v53 }
 0x37e   :  { %6701 = vmatmul.mubr.f32.vlgmr.msra.gmra.mrb[0].mxu1 %v12649_v42  ;;  %7988 = vset.pattern.permute.xlu1 %v13195_v37 }
 0x37f   :  { %7250 = vmatpush3.bf16.msra.mxu1 %v9306_v21  ;;  %6735 = vmatprep.mubr.msk.f32.mxu1 %vm8055_vm1, %v13000_v33 }
 0x380   :  { %7251 = vmatprep.subr.bf16.mxu1 %v12919_v53  ;;  %2689 = vperm.xlu1 %7988, %v9617_v51   ;;  %v9861_v28 = vpop.permute.xlu0 %3086 }
 0x381   :  { %3178 = vperm.xlu0 %8021, %v9531_v62   ;;  %13209 = vst [vmem:[#allocation20_spill] sm:$0xff] %v9861_v28 }
 0x383   :  { %7253 = vmatpush3.bf16.msra.mxu1 %v9326_v58 }
 0x384   :  { %7254 = vmatprep.subr.bf16.mxu1 %v12919_v53  ;;  %7989 = vset.pattern.permute.xlu1 %v13185_v30  ;;  %v9867_v1 = vpop.permute.xlu0 %3090 }
 0x385   :  { %2925 = vperm.xlu1 %7989, %v9606_v9   ;;  %3186 = vperm.xlu0 %8021, %v9574_v35   ;;  %13210 = vst [vmem:[#allocation24_spill] sm:$0xff] %v9867_v1 }
 0x387   :  { %7256 = vmatpush3.bf16.msra.mxu1 %v9346_v0 }
 0x388   :  { %7257 = vmatprep.subr.bf16.mxu1 %v12919_v53  ;;  %v9874_v11 = vpop.permute.xlu0 %3094 }
 0x389   :  { %7990 = vset.pattern.permute.xlu1 %v13189_v52  ;;  %3194 = vperm.xlu0 %8021, %v9593_v39   ;;  %13212 = vst [vmem:[#allocation25_spill] sm:$0xff] %v9874_v11 }
 0x38a   :  { %3038 = vperm.xlu1 %7990, %v9606_v9  }
 0x38b   :  { %7259 = vmatpush3.bf16.msra.mxu1 %v9367_v17 }
 0x38c   :  { %7260 = vmatprep.subr.bf16.mxu1 %v12919_v53 }
 0x38d   :  { %3202 = vperm.xlu0 %8021, %v9617_v51  }
 0x38e   :  { %7991 = vset.pattern.permute.xlu1 %v13183_v14 }
 0x38f   :  { %7262 = vmatpush3.bf16.msra.mxu1 %v9395_v26  ;;  %2849 = vperm.xlu1 %7991, %v9617_v51  }
 0x390   :  { %7263 = vmatprep.subr.bf16.mxu1 %v12919_v53 }
 0x391   :  { %3210 = vperm.xlu0 %8021, %v9637_v59  }
 0x393   :  { %7265 = vmatpush3.bf16.msra.mxu1 %v9419_v63  ;;  %7992 = vset.pattern.permute.xlu1 %v13195_v37 }
 0x394   :  { %7266 = vmatprep.subr.bf16.mxu1 %v12919_v53  ;;  %2693 = vperm.xlu1 %7992, %v9627_v25  }
 0x395   :  { %3218 = vperm.xlu0 %8021, %v9724_v5  }
 0x397   :  { %7268 = vmatpush3.bf16.msra.mxu1 %v9447_v32  ;;  %v9800_v32 = vpop.permute.xlu1 %2733 }
 0x398   :  { %7269 = vmatprep.subr.bf16.mxu1 %v12919_v53  ;;  %7993 = vset.pattern.permute.xlu1 %v13185_v30  ;;  %13203 = vst [vmem:[#allocation10_spill] sm:$0xff] %v9800_v32 }
 0x399   :  { %2929 = vperm.xlu1 %7993, %v9617_v51   ;;  %8028 = vset.pattern.permute.xlu0 %v8064_v19 }
 0x39a   :  { %2577 = vperm.xlu0 %8028, %v9431_v29  }
 0x39b   :  { %7271 = vmatpush3.bf16.msra.mxu1 %v9487_v13  ;;  %v9806_v63 = vpop.permute.xlu1 %2813 }
 0x39c   :  { %7272 = vmatprep.subr.bf16.mxu1 %v12919_v53 }
 0x39d   :  { %7994 = vset.pattern.permute.xlu1 %v13189_v52 }
 0x39e   :  { %6736 = vmatmul.mubr.f32.vlgmr.msra.gmra.mrb[0].mxu1 %v12649_v42  ;;  %3042 = vperm.xlu1 %7994, %v9617_v51  }
 0x39f   :  { %2581 = vperm.xlu0 %8028, %v9455_v10   ;;  %v9812_v21 = vpop.permute.xlu1 %2893 }
 0x3a2   :  { %7995 = vset.pattern.permute.xlu1 %v13183_v14 }
 0x3a3   :  { %2589 = vperm.xlu0 %8028, %v9562_v48   ;;  %2853 = vperm.xlu1 %7995, %v9627_v25   ;;  %v9819_v26 = vpop.permute.xlu1 %3006 }
 0x3a4   :  { %13204 = vst [vmem:[#allocation11_spill] sm:$0xff] %v9819_v26 }
 0x3a7   :  { %2593 = vperm.xlu0 %8028, %v9574_v35   ;;  %7996 = vset.pattern.permute.xlu1 %v13195_v37  ;;  %v9823_v45 = vpop.permute.xlu1 %2817  ;;  %v9881_v35 = vpop.permute.xlu0 %3098 }
 0x3a8   :  { %2697 = vperm.xlu1 %7996, %v9637_v59   ;;  %13214 = vst [vmem:[#allocation27_spill] sm:$0xff] %v9881_v35 }
 0x3ab   :  { %2597 = vperm.xlu0 %8028, %v9582_v16   ;;  %v9827_v58 = vpop.permute.xlu1 %2661 }
 0x3ac   :  { %7997 = vset.pattern.permute.xlu1 %v13185_v30  ;;  %13205 = vst [vmem:[#allocation2_spill] sm:$0xff] %v9827_v58 }
 0x3ad   :  { %2933 = vperm.xlu1 %7997, %v9627_v25  }
 0x3af   :  { %2601 = vperm.xlu0 %8028, %v9593_v39   ;;  %v9831_v50 = vpop.permute.xlu1 %2897 }
 0x3b1   :  { %7998 = vset.pattern.permute.xlu1 %v13189_v52 }
 0x3b2   :  { %3046 = vperm.xlu1 %7998, %v9627_v25  }
 0x3b3   :  { %2605 = vperm.xlu0 %8028, %v9606_v9   ;;  %v9836_v0 = vpop.permute.xlu1 %3010 }
 0x3b4   :  { %13206 = vst [vmem:[#allocation12_spill] sm:$0xff] %v9836_v0 }
 0x3b6   :  { %7999 = vset.pattern.permute.xlu1 %v13183_v14 }
 0x3b7   :  { %2857 = vperm.xlu1 %7999, %v9637_v59   ;;  %v9841_v12 = vpop.permute.xlu1 %2821 }
 0x3bb   :  { %8000 = vset.pattern.permute.xlu1 %v13195_v37  ;;  %v9845_v17 = vpop.permute.xlu1 %2665 }
 0x3bc   :  { %2701 = vperm.xlu1 %8000, %v9648_v47   ;;  %13207 = vst [vmem:[#allocation16_spill] sm:$0xff] %v9845_v17  ;;  %v13307_v17 = vld [vmem:[#allocation58_spill] sm:$0xff] }
 0x3bf   :  { %v9851_v4 = vpop.permute.xlu1 %2901 }
 0x3c0   :  { %8001 = vset.pattern.permute.xlu1 %v13185_v30 }
 0x3c1   :  { %2937 = vperm.xlu1 %8001, %v9637_v59  }
 0x3c3   :  { %v9857_v8 = vpop.permute.xlu1 %3014 }
 0x3c4   :  { %13208 = vst [vmem:[#allocation3_spill] sm:$0xff] %v9857_v8 }
 0x3c5   :  { %8002 = vset.pattern.permute.xlu1 %v13189_v52 }
 0x3c6   :  { %3050 = vperm.xlu1 %8002, %v9637_v59  }
 0x3c7   :  { %v9864_v13 = vpop.permute.xlu1 %2825 }
 0x3ca   :  { %8003 = vset.pattern.permute.xlu1 %v13183_v14 }
 0x3cb   :  { %2861 = vperm.xlu1 %8003, %v9648_v47   ;;  %v9871_v7 = vpop.permute.xlu1 %2669 }
 0x3cc   :  { %13211 = vst [vmem:[#allocation4_spill] sm:$0xff] %v9871_v7 }
 0x3cf   :  { %8004 = vset.pattern.permute.xlu1 %v13195_v37  ;;  %v9877_v44 = vpop.permute.xlu1 %2905 }
 0x3d0   :  { %2705 = vperm.xlu1 %8004, %v9724_v5  }
 0x3d3   :  { %v9883_v20 = vpop.permute.xlu1 %3018 }
 0x3d4   :  { %8005 = vset.pattern.permute.xlu1 %v13185_v30  ;;  %13215 = vst [vmem:[#allocation5_spill] sm:$0xff] %v9883_v20 }
 0x3d5   :  { %2941 = vperm.xlu1 %8005, %v9648_v47  }
 0x3d7   :  { %v9894_v38 = vpop.permute.xlu1 %2829 }
 0x3d9   :  { %8006 = vset.pattern.permute.xlu1 %v13189_v52 }
 0x3da   :  { %3054 = vperm.xlu1 %8006, %v9648_v47  }
 0x3de   :  { %8007 = vset.pattern.permute.xlu1 %v13183_v14 }
 0x3df   :  { %2865 = vperm.xlu1 %8007, %v9724_v5  }
 0x3e3   :  { %8009 = vset.pattern.permute.xlu1 %v13195_v37 }
 0x3e4   :  { %2709 = vperm.xlu1 %8009, %v9734_v57  }
 0x3e8   :  { %8010 = vset.pattern.permute.xlu1 %v13185_v30 }
 0x3e9   :  { %2945 = vperm.xlu1 %8010, %v9724_v5  }
 0x3ed   :  { %8011 = vset.pattern.permute.xlu1 %v13189_v52 }
 0x3ee   :  { %3058 = vperm.xlu1 %8011, %v9724_v5  }
 0x3f2   :  { %8012 = vset.pattern.permute.xlu1 %v8064_v19 }
 0x3f3   :  { %2573 = vperm.xlu1 %8012, %v9372_v41   ;;  %v9892_v41 = vpop.permute.xlu0 %3102 }
 0x3f4   :  { %13216 = vst [vmem:[#allocation30_spill] sm:$0xff] %v9892_v41 }
 0x3f7   :  { %8014 = vset.pattern.permute.xlu1 %v13213_v40  ;;  %v9898_v39 = vpop.permute.xlu0 %3106 }
 0x3f8   :  { %3138 = vperm.xlu1 %8014, %v9724_v5   ;;  %13217 = vst [vmem:[#allocation32_spill] sm:$0xff] %v9898_v39 }
 0x3fb   :  { %v9904_v55 = vpop.permute.xlu0 %3110 }
 0x3fc   :  { %8015 = vset.pattern.permute.xlu1 %v13195_v37  ;;  %v9901_v37 = vpop.permute.xlu1 %2673  ;;  %13219 = vst [vmem:[#allocation33_spill] sm:$0xff] %v9904_v55 }
 0x3fd   :  { %2713 = vperm.xlu1 %8015, %v9889_v36   ;;  %13218 = vst [vmem:[#allocation7_spill] sm:$0xff] %v9901_v37 }
 0x3ff   :  { %v9911_v6 = vpop.permute.xlu0 %3114 }
 0x400   :  { %v9908_v60 = vpop.permute.xlu1 %2909  ;;  %13220 = vst [vmem:[#allocation37_spill] sm:$0xff] %v9911_v6 }
 0x401   :  { %8017 = vset.pattern.permute.xlu1 %v13202_v46 }
 0x402   :  { %2793 = vperm.xlu1 %8017, %v9889_v36  }
 0x403   :  { %v9918_v2 = vpop.permute.xlu0 %3118 }
 0x404   :  { %v9914_v3 = vpop.permute.xlu1 %3022  ;;  %13222 = vst [vmem:[#allocation38_spill] sm:$0xff] %v9918_v2 }
 0x405   :  { %13221 = vst [vmem:[#allocation9_spill] sm:$0xff] %v9914_v3 }
 0x406   :  { %8018 = vset.pattern.permute.xlu1 %v13189_v52 }
 0x407   :  { %3062 = vperm.xlu1 %8018, %v9734_v57  }
 0x408   :  { %v9920_v34 = vpop.permute.xlu1 %2833 }
 0x40b   :  { %8019 = vset.pattern.permute.xlu1 %v13183_v14  ;;  %v9924_v14 = vpop.permute.xlu0 %3122 }
 0x40c   :  { %2873 = vperm.xlu1 %8019, %v9889_v36   ;;  %13223 = vst [vmem:[#allocation42_spill] sm:$0xff] %v9924_v14  ;;  %v9926_v46 = vpop.permute.xlu1 %2677 }
 0x40d   :  { %13224 = vst [vmem:[#allocation13_spill] sm:$0xff] %v9926_v46 }
 0x40f   :  { %v9930_v61 = vpop.permute.xlu0 %3126 }
 0x410   :  { %8020 = vset.pattern.permute.xlu1 %v13213_v40  ;;  %13225 = vst [vmem:[#allocation39_spill] sm:$0xff] %v9930_v61 }
 0x411   :  { %3142 = vperm.xlu1 %8020, %v9734_v57  }
 0x413   :  { %v9936_v42 = vpop.permute.xlu0 %3130 }
 0x414   :  { %13226 = vst [vmem:[#allocation45_spill] sm:$0xff] %v9936_v42 }
 0x415   :  { %8022 = vset.pattern.permute.xlu1 %v13185_v30  ;;  %v9933_v30 = vpop.permute.xlu1 %2913 }
 0x416   :  { %2953 = vperm.xlu1 %8022, %v9889_v36  }
 0x41a   :  { %8023 = vset.pattern.permute.xlu1 %v13189_v52  ;;  %v9940_v52 = vpop.permute.xlu1 %3026 }
 0x41b   :  { %3066 = vperm.xlu1 %8023, %v9889_v36   ;;  %13227 = vst [vmem:[#allocation17_spill] sm:$0xff] %v9940_v52 }
 0x41e   :  { %v9946_v33 = vpop.permute.xlu1 %2837 }
 0x41f   :  { %8024 = vset.pattern.permute.xlu1 %v13213_v40  ;;  %v9943_v40 = vpop.permute.xlu0 %3134 }
 0x420   :  { %3146 = vperm.xlu1 %8024, %v9889_v36   ;;  %13228 = vst [vmem:[#allocation46_spill] sm:$0xff] %v9943_v40 }
 0x423   :  { %v9949_v61 = vpop.permute.xlu0 %2737 }
 0x424   :  { %8025 = vset.pattern.permute.xlu1 %v12652_v18 }
 0x425   :  { %3170 = vperm.xlu1 %8025, %v9431_v29   ;;  %v9951_v29 = vpop.permute.xlu1 %2681 }
 0x426   :  { %13229 = vst [vmem:[#allocation47_spill] sm:$0xff] %v9951_v29 }
 0x429   :  { %8026 = vset.pattern.permute.xlu1 %v8064_v19  ;;  %v9954_v19 = vpop.permute.xlu0 %2741 }
 0x42a   :  { %2585 = vperm.xlu1 %8026, %v9531_v62   ;;  %13230 = vst [vmem:[#allocation18_spill] sm:$0xff] %v9954_v19  ;;  %v9957_v62 = vpop.permute.xlu1 %2917 }
 0x42e   :  { %8027 = vset.pattern.permute.xlu1 %v12652_v18  ;;  %v9960_v18 = vpop.permute.xlu0 %2745 }
 0x42f   :  { %3174 = vperm.xlu1 %8027, %v9455_v10   ;;  %13231 = vst [vmem:[#allocation48_spill] sm:$0xff] %v9960_v18  ;;  %v9962_v10 = vpop.permute.xlu1 %3030 }
 0x430   :  { %13232 = vst [vmem:[#allocation49_spill] sm:$0xff] %v9962_v10 }
 0x433   :  { %3182 = vperm.xlu1 %8027, %v9562_v48   ;;  %v9965_v48 = vpop.permute.xlu0 %2749  ;;  %v9968_v40 = vpop.permute.xlu1 %2841 }
 0x434   :  { %13233 = vst [vmem:[#allocation21_spill] sm:$0xff] %v9965_v48 }
 0x437   :  { %3190 = vperm.xlu1 %8027, %v9582_v16   ;;  %v9971_v16 = vpop.permute.xlu0 %2753 }
 0x438   :  { %13234 = vst [vmem:[#allocation55_spill] sm:$0xff] %v9971_v16 }
 0x43b   :  { %3198 = vperm.xlu1 %8027, %v9606_v9   ;;  %v9973_v9 = vpop.permute.xlu1 %2685  ;;  %v9975_v42 = vpop.permute.xlu0 %2757 }
 0x43c   :  { %13235 = vst [vmem:[#allocation57_spill] sm:$0xff] %v9973_v9  ;;  %13236 = vst [vmem:[#allocation22_spill] sm:$0xff] %v9975_v42 }
 0x43f   :  { %3206 = vperm.xlu1 %8027, %v9627_v25   ;;  %v9977_v14 = vpop.permute.xlu1 %2921  ;;  %v9979_v2 = vpop.permute.xlu0 %2761 }
 0x440   :  { %13237 = vst [vmem:[#allocation56_spill] sm:$0xff] %v9979_v2 }
 0x443   :  { %3214 = vperm.xlu1 %8027, %v9648_v47   ;;  %v9981_v6 = vpop.permute.xlu1 %3034  ;;  %v9983_v55 = vpop.permute.xlu0 %2765 }
 0x444   :  { %13238 = vst [vmem:[#allocation60_spill] sm:$0xff] %v9981_v6  ;;  %13239 = vst [vmem:[#allocation61_spill] sm:$0xff] %v9983_v55 }
 0x447   :  { %3222 = vperm.xlu1 %8027, %v9734_v57   ;;  %v9985_v10 = vpop.permute.xlu1 %2845  ;;  %v9987_v39 = vpop.permute.xlu0 %2769 }
 0x448   :  { %13240 = vst [vmem:[#allocation63_spill] sm:$0xff] %v9987_v39 }
 0x44b   :  { %3226 = vperm.xlu1 %8027, %v9889_v36   ;;  %v9989_v52 = vpop.permute.xlu1 %2689  ;;  %v9991_v46 = vpop.permute.xlu0 %2773 }
 0x44c   :  { %13241 = vst [vmem:[#allocation64_spill] sm:$0xff] %v9989_v52  ;;  %13242 = vst [vmem:[#allocation65_spill] sm:$0xff] %v9991_v46 }
 0x44f   :  { %v9993_v41 = vpop.permute.xlu1 %2925  ;;  %v9997_v3 = vpop.permute.xlu0 %2777 }
 0x450   :  { %13243 = vst [vmem:[#allocation67_spill] sm:$0xff] %v9997_v3 }
 0x453   :  { %v10002_v20 = vpop.permute.xlu1 %3038  ;;  %v10004_v7 = vpop.permute.xlu0 %2781 }
 0x454   :  { %13244 = vst [vmem:[#allocation68_spill] sm:$0xff] %v10002_v20  ;;  %13245 = vst [vmem:[#allocation69_spill] sm:$0xff] %v10004_v7  ;;  %v13250_v20 = vmov 39  }
 0x457   :  { %v10007_v11 = vpop.permute.xlu1 %2849  ;;  %v10010_v46 = vpop.permute.xlu0 %2785 }
 0x458   :  { %13246 = vst [vmem:[#allocation70_spill] sm:$0xff] %v10010_v46 }
 0x45b   :  { %v10013_v3 = vpop.permute.xlu1 %2693  ;;  %v10015_v39 = vpop.permute.xlu0 %2789 }
 0x45c   :  { %13247 = vst [vmem:[#allocation71_spill] sm:$0xff] %v10013_v3  ;;  %13248 = vst [vmem:[#allocation72_spill] sm:$0xff] %v10015_v39 }
 0x471   :  { %v9995_v9 = vpop.f32.mrb[0].mxu1 }
 0x472   :  { %v2460_v35 = vmul.f32 %v9995_v9, %v9995_v9  ;;  %v6737_v6 = vpop.f32.mrb[1].mxu1 }
 0x473   :  { %v10021_v6 = vpop.permute.xlu0 %2869 }
 0x474   :  { %2462 = vrot.lane.b32.xlu0 %v2460_v35, %s8054_s5  ;;  %v10018_v35 = vpop.permute.xlu1 %2929 }
 0x478   :  { %2609 = vperm.xlu0 %8028, %v9617_v51   ;;  %v10024_v51 = vpop.permute.xlu1 %3042 }
 0x479   :  { %13249 = vst [vmem:[#allocation73_spill] sm:$0xff] %v10024_v51 }
 0x47c   :  { %2613 = vperm.xlu0 %8028, %v9627_v25   ;;  %v10026_v25 = vpop.permute.xlu0 %2949 }
 0x480   :  { %2617 = vperm.xlu0 %8028, %v9637_v59   ;;  %v10029_v59 = vpop.permute.xlu1 %2853  ;;  %v10031_v3 = vpop.permute.xlu0 %3166 }
 0x484   :  { %2621 = vperm.xlu0 %8028, %v9648_v47   ;;  %v10034_v47 = vpop.permute.xlu1 %2697  ;;  %v10036_v39 = vpop.permute.xlu0 %3178 }
 0x485   :  { %13251 = vst [vmem:[#allocation74_spill] sm:$0xff] %v10034_v47  ;;  %13252 = vst [vmem:[#allocation75_spill] sm:$0xff] %v10036_v39 }
 0x488   :  { %2625 = vperm.xlu0 %8028, %v9724_v5   ;;  %v10038_v5 = vpop.permute.xlu1 %2933  ;;  %v10040_v46 = vpop.permute.xlu0 %3186 }
 0x489   :  { %13253 = vst [vmem:[#allocation76_spill] sm:$0xff] %v10040_v46 }
 0x48c   :  { %2629 = vperm.xlu0 %8028, %v9734_v57   ;;  %v10042_v57 = vpop.permute.xlu1 %3046  ;;  %v10044_v51 = vpop.permute.xlu0 %3194 }
 0x48d   :  { %13254 = vst [vmem:[#allocation77_spill] sm:$0xff] %v10042_v57  ;;  %13255 = vst [vmem:[#allocation78_spill] sm:$0xff] %v10044_v51 }
 0x490   :  { %2633 = vperm.xlu0 %8028, %v9889_v36   ;;  %v10046_v7 = vpop.permute.xlu1 %2857  ;;  %v10048_v36 = vpop.permute.xlu0 %3202 }
 0x491   :  { %13256 = vst [vmem:[#allocation79_spill] sm:$0xff] %v10048_v36 }
 0x494   :  { %8029 = vset.pattern.permute.xlu0 %v13250_v20  ;;  %v10050_v8 = vpop.permute.xlu1 %2701  ;;  %v10052_v52 = vpop.permute.xlu0 %3210 }
 0x495   :  { %13257 = vst [vmem:[#allocation80_spill] sm:$0xff] %v10050_v8  ;;  %13258 = vst [vmem:[#allocation81_spill] sm:$0xff] %v10052_v52 }
 0x498   :  { %v10054_v20 = vpop.permute.xlu1 %2937  ;;  %v10056_v47 = vpop.permute.xlu0 %3218 }
 0x499   :  { %13259 = vst [vmem:[#allocation82_spill] sm:$0xff] %v10054_v20  ;;  %13260 = vst [vmem:[#allocation83_spill] sm:$0xff] %v10056_v47 }
 0x49c   :  { %v10058_v39 = vpop.permute.xlu1 %3050  ;;  %v10060_v1 = vpop.permute.xlu0 %2577 }
 0x49d   :  { %13261 = vst [vmem:[#allocation84_spill] sm:$0xff] %v10058_v39  ;;  %13262 = vst [vmem:[#allocation85_spill] sm:$0xff] %v10060_v1 }
 0x4a0   :  { %v10062_v46 = vpop.permute.xlu1 %2861  ;;  %v10064_v57 = vpop.permute.xlu0 %2581 }
 0x4a1   :  { %13263 = vst [vmem:[#allocation86_spill] sm:$0xff] %v10064_v57 }
 0x4a4   :  { %v10066_v51 = vpop.permute.xlu1 %2705  ;;  %v10068_v55 = vpop.permute.xlu0 %2589 }
 0x4a5   :  { %13264 = vst [vmem:[#allocation87_spill] sm:$0xff] %v10066_v51  ;;  %13265 = vst [vmem:[#allocation88_spill] sm:$0xff] %v10068_v55 }
 0x4a8   :  { %v10070_v36 = vpop.permute.xlu1 %2941  ;;  %v10072_v8 = vpop.permute.xlu0 %2593 }
 0x4a9   :  { %13266 = vst [vmem:[#allocation89_spill] sm:$0xff] %v10070_v36  ;;  %13267 = vst [vmem:[#allocation90_spill] sm:$0xff] %v10072_v8 }
 0x4ac   :  { %v10074_v52 = vpop.permute.xlu1 %3054  ;;  %v10076_v0 = vpop.permute.xlu0 %2597 }
 0x4ad   :  { %13268 = vst [vmem:[#allocation91_spill] sm:$0xff] %v10074_v52  ;;  %13269 = vst [vmem:[#allocation92_spill] sm:$0xff] %v10076_v0 }
 0x4b0   :  { %v10078_v47 = vpop.permute.xlu1 %2865  ;;  %v10080_v39 = vpop.permute.xlu0 %2601 }
 0x4b1   :  { %13270 = vst [vmem:[#allocation93_spill] sm:$0xff] %v10080_v39 }
 0x4b4   :  { %v10082_v1 = vpop.permute.xlu1 %2709  ;;  %v10084_v2 = vpop.permute.xlu0 %2605 }
 0x4b5   :  { %13271 = vst [vmem:[#allocation94_spill] sm:$0xff] %v10082_v1  ;;  %13272 = vst [vmem:[#allocation95_spill] sm:$0xff] %v10084_v2 }
 0x4b8   :  { %v10086_v51 = vpop.permute.xlu1 %2945 }
 0x4b9   :  { %13273 = vst [vmem:[#allocation96_spill] sm:$0xff] %v10086_v51 }
 0x4bc   :  { %v10089_v58 = vpop.permute.xlu1 %3058 }
 0x4bd   :  { %13274 = vst [vmem:[#allocation97_spill] sm:$0xff] %v10089_v58 }
 0x4c0   :  { %v10091_v8 = vpop.permute.xlu1 %2573 }
 0x4c1   :  { %13275 = vst [vmem:[#allocation98_spill] sm:$0xff] %v10091_v8 }
 0x4c4   :  { %v10094_v39 = vpop.permute.xlu1 %3138 }
 0x4c5   :  { %13276 = vst [vmem:[#allocation99_spill] sm:$0xff] %v10094_v39 }
 0x4c8   :  { %v10096_v1 = vpop.permute.xlu1 %2713 }
 0x4c9   :  { %13277 = vst [vmem:[#allocation100_spill] sm:$0xff] %v10096_v1 }
 0x4cc   :  { %v10098_v2 = vpop.permute.xlu1 %2793 }
 0x4cd   :  { %13278 = vst [vmem:[#allocation101_spill] sm:$0xff] %v10098_v2 }
 0x4d0   :  { %v10100_v29 = vpop.permute.xlu1 %3062 }
 0x4d1   :  { %13279 = vst [vmem:[#allocation102_spill] sm:$0xff] %v10100_v29 }
 0x4d4   :  { %v10102_v28 = vpop.permute.xlu1 %2873 }
 0x4d5   :  { %13280 = vst [vmem:[#allocation103_spill] sm:$0xff] %v10102_v28 }
 0x4e6   :  { %v2463_v57 = vpop.permute.xlu0 %2462 }
 0x4e7   :  { %v2465_v55 = vsub.f32 %v9995_v9, %v2463_v57 }
 0x4e9   :  { %8030 = vrsqrt.f32 %v2465_v55  ;;  %v10104_v55 = vpop.permute.xlu1 %3142 }
 0x4ea   :  { %13281 = vst [vmem:[#allocation104_spill] sm:$0xff] %v10104_v55 }
 0x4ed   :  { %v10106_v57 = vpop.permute.xlu1 %2953 }
 0x4f1   :  { %v10108_v58 = vpop.permute.xlu1 %3066 }
 0x4f2   :  { %13282 = vst [vmem:[#allocation105_spill] sm:$0xff] %v10108_v58 }
 0x4f3   :  { %v8031_v52 = vpop.eup %8030 }
 0x4f4   :  { %v2468_v0 = vrot.slane %v8031_v52, 7 }
 0x4f5   :  { %v10110_v52 = vpop.permute.xlu1 %3146 }
 0x4f6   :  { %2469 = vrot.lane.b32.xlu1 %v2468_v0, %s8065_s0  ;;  %13283 = vst [vmem:[#allocation106_spill] sm:$0xff] %v10110_v52 }
 0x4f9   :  { %v10112_v8 = vpop.permute.xlu1 %3170 }
 0x4fa   :  { %13284 = vst [vmem:[#allocation107_spill] sm:$0xff] %v10112_v8  ;;  %v2494_v8 = vrot.slane %v9995_v9, 7 }
 0x4fd   :  { %v10114_v0 = vpop.permute.xlu1 %2585 }
 0x4fe   :  { %13285 = vst [vmem:[#allocation108_spill] sm:$0xff] %v10114_v0  ;;  %v2475_v0 = vsub.s32 1, %v9142_v31 }
 0x501   :  { %v10116_v39 = vpop.permute.xlu1 %3174 }
 0x502   :  { %13286 = vst [vmem:[#allocation109_spill] sm:$0xff] %v10116_v39 }
 0x505   :  { %v10118_v1 = vpop.permute.xlu1 %3182 }
 0x506   :  { %13287 = vst [vmem:[#allocation110_spill] sm:$0xff] %v10118_v1  ;;  %v8050_v1 = vld [vmem:[%s12439_s1 + $0x138] sm:$0xff] }
 0x509   :  { %v10120_v2 = vpop.permute.xlu1 %3190 }
 0x50a   :  { %13288 = vst [vmem:[#allocation111_spill] sm:$0xff] %v10120_v2 }
 0x50d   :  { %v10122_v29 = vpop.permute.xlu1 %3198 }
 0x50e   :  { %13289 = vst [vmem:[#allocation112_spill] sm:$0xff] %v10122_v29  ;;  %v2503_v29 = vsub.s32 2, %v9142_v31 }
 0x511   :  { %v10124_v42 = vpop.permute.xlu1 %3206 }
 0x512   :  { %13290 = vst [vmem:[#allocation113_spill] sm:$0xff] %v10124_v42 }
 0x515   :  { %v10126_v55 = vpop.permute.xlu1 %3214 }
 0x516   :  { %13291 = vst [vmem:[#allocation114_spill] sm:$0xff] %v10126_v55 }
 0x519   :  { %v10128_v26 = vpop.permute.xlu1 %3222 }
 0x51a   :  { %13292 = vst [vmem:[#allocation115_spill] sm:$0xff] %v10128_v26 }
 0x51d   :  { %v10130_v58 = vpop.permute.xlu1 %3226 }
 0x51e   :  { %13293 = vst [vmem:[#allocation116_spill] sm:$0xff] %v10130_v58 }
 0x568   :  { %v2470_v52 = vpop.permute.xlu1 %2469 }
 0x569   :  { %v2472_v2 = vmul.f32 %v8050_v1, %v2470_v52 }
 0x56b   :  { %v2496_v39 = vmul.f32 %v2494_v8, %v2472_v2  ;;  %v10138_v42 = vrot.slane %v2472_v2, %v2475_v0 }
 0x56d   :  { %v2498_v55 = vrot.slane %v2496_v39, 7  ;;  %v2478_v58 = vmul.f32 %v10138_v42, %v9162_v27  ;;  %v2477_v9 = vmul.f32 %v10138_v42, %v9154_v43  ;;  %v2479_v32 = vmul.f32 %v10138_v42, %v9171_v24 }
 0x56e   :  { %v2480_v8 = vmul.f32 %v10138_v42, %v9180_v56  ;;  %v2490_v39 = vmul.f32 %v10138_v42, %v9270_v15  ;;  %v2491_v15 = vmul.f32 %v10138_v42, %v9279_v22  ;;  %v2489_v20 = vmul.f32 %v10138_v42, %v13307_v17 }
 0x56f   :  { %v2500_v16 = vsub.f32 %v8050_v1, %v2498_v55 }
 0x571   :  { %v10140_v26 = vrot.slane %v2500_v16, %v2503_v29 }
 0x573   :  { %v2506_v52 = vadd.f32 %v10140_v26, %v2478_v58  ;;  %v2505_v2 = vadd.f32 %v10140_v26, %v2477_v9  ;;  %v2507_v1 = vadd.f32 %v10140_v26, %v2479_v32  ;;  %v2508_v27 = vadd.f32 %v10140_v26, %v2480_v8  ;;  %v13295_v8 = vld [vmem:[#allocation28_spill] sm:$0xff] }
 0x574   :  { %v2518_v24 = vadd.f32 %v10140_v26, %v2490_v39  ;;  %v2519_v0 = vadd.f32 %v10140_v26, %v2491_v15  ;;  %v2492_v9 = vmul.f32 %v10138_v42, %v9292_v54 }
 0x575   :  { %v10156_v29 = vmax.f32 %v2506_v52, 0.0  ;;  %v10158_v43 = vmax.f32 %v2505_v2, 0.0  ;;  %v10160_v16 = vmax.f32 %v2507_v1, 0.0  ;;  %v10163_v56 = vmax.f32 %v2508_v27, 0.0  ;;  %v13296_v1 = vld [vmem:[#allocation31_spill] sm:$0xff] }
 0x576   :  { %v10174_v55 = vmax.f32 %v2518_v24, 0.0  ;;  %v2481_v52 = vmul.f32 %v10138_v42, %v13295_v8  ;;  %v2520_v2 = vadd.f32 %v10140_v26, %v2492_v9  ;;  %v2482_v39 = vmul.f32 %v10138_v42, %v13296_v1 }
 0x577   :  { %3455 = vrot.lane.b32.xlu1 %v10156_v29, %s8066_s13  ;;  %3453 = vrot.lane.b32.xlu0 %v10158_v43, %s8066_s13  ;;  %v12654_v32 = vrot.slane %v10160_v16, 1  ;;  %v12653_v58 = vrot.slane %v10163_v56, 1  ;;  %v10198_v27 = vmax.f32 %v2519_v0, 0.0  ;;  %v2539_v51 = vrot.slane %v10160_v16, 7 }
 0x578   :  { %v2509_v24 = vadd.f32 %v10140_v26, %v2481_v52  ;;  %v2510_v8 = vadd.f32 %v10140_v26, %v2482_v39  ;;  %v13300_v52 = vld [vmem:[#allocation40_spill] sm:$0xff] }
 0x579   :  { %v10185_v22 = vsel %vm2988_vm3, %v12654_v32, %v12653_v58  ;;  %v13297_v58 = vld [vmem:[#allocation35_spill] sm:$0xff]  ;;  %v2876_v1 = vmul.f32 %v9806_v63, %v10198_v27  ;;  %v13301_v39 = vld [vmem:[#allocation44_spill] sm:$0xff]  ;;  %v12664_v17 = vrot.slane %v10198_v27, 1 }
 0x57a   :  { %13294 = vst [vmem:[#allocation117_spill] sm:$0xff] %v10185_v22  ;;  %v3229_v54 = vmul.f32 %v10031_v3, %v10185_v22  ;;  %v2483_v32 = vmul.f32 %v10138_v42, %v13297_v58  ;;  %v10211_v3 = vmax.f32 %v2520_v2, 0.0  ;;  %v2484_v58 = vmul.f32 %v10138_v42, %v13300_v52  ;;  %v13302_v2 = vld [vmem:[#allocation50_spill] sm:$0xff]  ;;  %v13303_v52 = vld [vmem:[#allocation52_spill] sm:$0xff] }
 0x57b   :  { %3457 = vrot.lane.b32.xlu1 %v10160_v16, %s8066_s13  ;;  %3479 = vrot.lane.b32.xlu0 %v10174_v55, %s8066_s13  ;;  %v2485_v22 = vmul.f32 %v10138_v42, %v13301_v39  ;;  %v2486_v28 = vmul.f32 %v10138_v42, %v13302_v2  ;;  %v2487_v48 = vmul.f32 %v10138_v42, %v13303_v52  ;;  %v2537_v39 = vrot.slane %v10158_v43, 7 }
 0x57c   :  { %v3816_v15 = vsel %vm1815_vm2, %v3229_v54, 0  ;;  %v2511_v0 = vadd.f32 %v10140_v26, %v2483_v32  ;;  %v10220_v54 = vmax.f32 %v2509_v24, 0.0  ;;  %v2538_v52 = vrot.slane %v10156_v29, 7 }
 0x57d   :  { %v10204_v37 = vand.u32 4294901760, %v3816_v15  ;;  %v2513_v24 = vadd.f32 %v10140_v26, %v2485_v22  ;;  %v2514_v2 = vadd.f32 %v10140_v26, %v2486_v28  ;;  %v2515_v28 = vadd.f32 %v10140_v26, %v2487_v48 }
 0x57e   :  { %v10237_v63 = vmax.f32 %v2511_v0, 0.0  ;;  %v2877_v0 = vmul.f32 %v9823_v45, %v10211_v3  ;;  %v2541_v18 = vrot.slane %v10220_v54, 7  ;;  %v10263_v36 = vsel %vm2555_vm4, %v2537_v39, %v2538_v52 }
 0x57f   :  { %13298 = vst [vmem:[#allocation28_spill] sm:$0xff] %v10204_v37  ;;  %3459 = vrot.lane.b32.xlu1 %v10163_v56, %s8066_s13  ;;  %3481 = vrot.lane.b32.xlu0 %v10198_v27, %s8066_s13  ;;  %v10215_v9 = vsub.f32 %v3816_v15, %v10204_v37  ;;  %v10229_v15 = vmax.f32 %v2510_v8, 0.0  ;;  %v2512_v37 = vadd.f32 %v10140_v26, %v2484_v58  ;;  %v12662_v8 = vrot.slane %v10211_v3, 7 }
 0x580   :  { %v10277_v48 = vmax.f32 %v2513_v24, 0.0  ;;  %v10285_v53 = vmax.f32 %v2514_v2, 0.0  ;;  %v2543_v19 = vrot.slane %v10237_v63, 7 }
 0x581   :  { %13299 = vst [vmem:[#allocation31_spill] sm:$0xff] %v10215_v9  ;;  %v12659_v32 = vand.u32 4294901760, %v10215_v9  ;;  %v10254_v22 = vsel %vm2555_vm4, %v12662_v8, %v2537_v39  ;;  %v13306_v39 = vld [vmem:[#allocation54_spill] sm:$0xff] }
 0x582   :  { %v2488_v8 = vmul.f32 %v10138_v42, %v13306_v39  ;;  %v10297_v39 = vsel %vm2555_vm4, %v2538_v52, %v2539_v51  ;;  %v2545_v2 = vrot.slane %v10277_v48, 7  ;;  %v2972_v52 = vrot.slane %v10158_v43, 1 }
 0x583   :  { %3461 = vrot.lane.b32.xlu1 %v10220_v54, %s8066_s13  ;;  %3389 = vrot.lane.b32.xlu0 %v2876_v1, %s8067_s14  ;;  %v3948_v58 = vsub.f32 %v10215_v9, %v12659_v32  ;;  %v2540_v1 = vrot.slane %v10163_v56, 7  ;;  %v10258_v9 = vmax.f32 %v2512_v37, 0.0  ;;  %v2542_v37 = vrot.slane %v10229_v15, 7 }
 0x584   :  { %v2516_v24 = vadd.f32 %v10140_v26, %v2488_v8  ;;  %v2987_v8 = vrot.slane %v10211_v3, 1 }
 0x585   :  { %v3949_v32 = vand.u32 4294901760, %v3948_v58  ;;  %v10270_v45 = vsel %vm2555_vm4, %v2539_v51, %v2540_v1  ;;  %v10274_v58 = vsel %vm2555_vm4, %v2540_v1, %v2541_v18  ;;  %v10289_v1 = vsel %vm2555_vm4, %v2541_v18, %v2542_v37 }
 0x586   :  { %13304 = vst [vmem:[#allocation35_spill] sm:$0xff] %v10270_v45  ;;  %13305 = vst [vmem:[#allocation40_spill] sm:$0xff] %v10274_v58  ;;  %v2544_v42 = vrot.slane %v10258_v9, 7  ;;  %v2517_v18 = vadd.f32 %v10140_v26, %v2489_v20  ;;  %v10322_v26 = vsel %vm2988_vm3, %v12664_v17, %v2987_v8  ;;  %v2973_v20 = vrot.slane %v10156_v29, 1 }
 0x587   :  { %3463 = vrot.lane.b32.xlu1 %v10229_v15, %s8066_s13  ;;  %3391 = vrot.lane.b32.xlu0 %v2877_v0, %s8067_s14  ;;  %v2878_v0 = vmul.f32 %v9841_v12, %v10158_v43  ;;  %13308 = vst [vmem:[#allocation44_spill] sm:$0xff] %v10289_v1  ;;  %v10306_v12 = vsel %vm2555_vm4, %v2542_v37, %v2543_v19  ;;  %13311 = vst [vmem:[#allocation54_spill] sm:$0xff] %v10322_v26  ;;  %v10325_v37 = vmax.f32 %v2516_v24, 0.0 }
 0x588   :  { %3950 = vmatprep.mubr.f32.mxu1 %v3949_v32  ;;  %v10292_v32 = vmax.f32 %v2515_v28, 0.0  ;;  %13309 = vst [vmem:[#allocation50_spill] sm:$0xff] %v10306_v12  ;;  %v10312_v51 = vsel %vm2555_vm4, %v2543_v19, %v2544_v42  ;;  %v2879_v28 = vmul.f32 %v9864_v13, %v10156_v29  ;;  %v10329_v19 = vsel %vm2555_vm4, %v2544_v42, %v2545_v2 }
 0x589   :  { %13310 = vst [vmem:[#allocation52_spill] sm:$0xff] %v10312_v51  ;;  %13312 = vst [vmem:[#allocation58_spill] sm:$0xff] %v10329_v19  ;;  %v10335_v13 = vmax.f32 %v2517_v18, 0.0  ;;  %v10339_v17 = vsel %vm2988_vm3, %v2972_v52, %v2973_v20  ;;  %v10343_v24 = vsel %vm2988_vm3, %v2987_v8, %v2972_v52  ;;  %v13316_v26 = vrot.slane %v10160_v16, 1 }
 0x58a   :  { %13313 = vst [vmem:[#allocation118_spill] sm:$0xff] %v10339_v17  ;;  %13314 = vst [vmem:[#allocation119_spill] sm:$0xff] %v10343_v24  ;;  %v2547_v42 = vrot.slane %v10292_v32, 7  ;;  %v2548_v8 = vrot.slane %v10325_v37, 7  ;;  %v2550_v52 = vrot.slane %v10174_v55, 7 }
 0x58b   :  { %3465 = vrot.lane.b32.xlu1 %v10237_v63, %s8066_s13  ;;  %3393 = vrot.lane.b32.xlu0 %v2878_v0, %s8067_s14  ;;  %v2546_v0 = vrot.slane %v10285_v53, 7  ;;  %v10354_v18 = vsel %vm2988_vm3, %v2973_v20, %v13316_v26  ;;  %v2551_v20 = vrot.slane %v10198_v27, 7 }
 0x58c   :  { %13317 = vst [vmem:[#allocation121_spill] sm:$0xff] %v10354_v18  ;;  %v10370_v26 = vsel %vm2555_vm4, %v2547_v42, %v2548_v8 }
 0x58d   :  { %v10348_v19 = vsel %vm2555_vm4, %v2545_v2, %v2546_v0  ;;  %v10360_v17 = vsel %vm2555_vm4, %v2546_v0, %v2547_v42  ;;  %v2549_v2 = vrot.slane %v10335_v13, 7  ;;  %13319 = vst [vmem:[#allocation123_spill] sm:$0xff] %v10370_v26  ;;  %v2881_v0 = vmul.f32 %v9920_v34, %v10163_v56 }
 0x58e   :  { %13315 = vst [vmem:[#allocation120_spill] sm:$0xff] %v10348_v19  ;;  %13318 = vst [vmem:[#allocation122_spill] sm:$0xff] %v10360_v17  ;;  %v13322_v17 = vrot.slane %v10163_v56, 1  ;;  %v10392_v26 = vsel %vm2555_vm4, %v2550_v52, %v2551_v20  ;;  %v2977_v34 = vrot.slane %v10229_v15, 1 }
 0x58f   :  { %3467 = vrot.lane.b32.xlu1 %v10258_v9, %s8066_s13  ;;  %3395 = vrot.lane.b32.xlu0 %v2879_v28, %s8067_s14  ;;  %v2880_v28 = vmul.f32 %v9894_v38, %v10160_v16  ;;  %v2976_v38 = vrot.slane %v10220_v54, 1  ;;  %v10378_v18 = vsel %vm2555_vm4, %v2548_v8, %v2549_v2  ;;  %13324 = vst [vmem:[#allocation127_spill] sm:$0xff] %v10392_v26  ;;  %v13325_v8 = vrot.slane %v10211_v3, 7 }
 0x590   :  { %13320 = vst [vmem:[#allocation124_spill] sm:$0xff] %v10378_v18  ;;  %v2978_v26 = vrot.slane %v10237_v63, 1 }
 0x591   :  { %v10388_v42 = vsel %vm2988_vm3, %v13322_v17, %v2976_v38  ;;  %v2882_v17 = vmul.f32 %v9946_v33, %v10220_v54  ;;  %v2979_v33 = vrot.slane %v10258_v9, 1 }
 0x592   :  { %13323 = vst [vmem:[#allocation126_spill] sm:$0xff] %v10388_v42  ;;  %v2984_v42 = vrot.slane %v10335_v13, 1 }
 0x593   :  { %3469 = vrot.lane.b32.xlu1 %v10277_v48, %s8066_s13  ;;  %3397 = vrot.lane.b32.xlu0 %v2880_v28, %s8067_s14  ;;  %v10382_v28 = vsel %vm2555_vm4, %v2549_v2, %v2550_v52  ;;  %v10402_v2 = vsel %vm2555_vm4, %v2551_v20, %v13325_v8  ;;  %v10408_v52 = vsel %vm2988_vm3, %v2976_v38, %v2977_v34 }
 0x594   :  { %13321 = vst [vmem:[#allocation125_spill] sm:$0xff] %v10382_v28  ;;  %13326 = vst [vmem:[#allocation128_spill] sm:$0xff] %v10402_v2  ;;  %v10418_v20 = vsel %vm2988_vm3, %v2977_v34, %v2978_v26  ;;  %v2883_v8 = vmul.f32 %v9968_v40, %v10229_v15  ;;  %v10429_v2 = vsel %vm2988_vm3, %v2978_v26, %v2979_v33  ;;  %v2983_v26 = vrot.slane %v10325_v37, 1 }
 0x595   :  { %13327 = vst [vmem:[#allocation129_spill] sm:$0xff] %v10408_v52  ;;  %13328 = vst [vmem:[#allocation130_spill] sm:$0xff] %v10418_v20  ;;  %v2980_v52 = vrot.slane %v10277_v48, 1 }
 0x596   :  { %13330 = vst [vmem:[#allocation132_spill] sm:$0xff] %v10429_v2  ;;  %v2884_v2 = vmul.f32 %v9985_v10, %v10237_v63  ;;  %v2885_v10 = vmul.f32 %v10007_v11, %v10258_v9  ;;  %v2957_v11 = vmul.f32 %v9831_v50, %v10163_v56  ;;  %v2959_v50 = vmul.f32 %v9877_v44, %v10229_v15 }
 0x597   :  { %3471 = vrot.lane.b32.xlu1 %v10285_v53, %s8066_s13  ;;  %3399 = vrot.lane.b32.xlu0 %v2881_v0, %s8067_s14  ;;  %v2985_v0 = vrot.slane %v10174_v55, 1  ;;  %v10438_v34 = vsel %vm2988_vm3, %v2979_v33, %v2980_v52  ;;  %v13332_v33 = vrot.slane %v10198_v27, 1  ;;  %v2961_v44 = vmul.f32 %v9933_v30, %v10258_v9 }
 0x598   :  { %v2963_v30 = vmul.f32 %v9977_v14, %v10285_v53 }
 0x599   :  { %v10423_v38 = vsel %vm2988_vm3, %v2984_v42, %v2985_v0 }
 0x59a   :  { %13329 = vst [vmem:[#allocation131_spill] sm:$0xff] %v10423_v38  ;;  %v2982_v38 = vrot.slane %v10292_v32, 1 }
 0x59b   :  { %3473 = vrot.lane.b32.xlu1 %v10292_v32, %s8066_s13  ;;  %3401 = vrot.lane.b32.xlu0 %v2882_v17, %s8067_s14  ;;  %v2981_v17 = vrot.slane %v10285_v53, 1 }
 0x59d   :  { %v10443_v40 = vsel %vm2988_vm3, %v2980_v52, %v2981_v17  ;;  %v10450_v20 = vsel %vm2988_vm3, %v2981_v17, %v2982_v38  ;;  %v10461_v52 = vsel %vm2988_vm3, %v2983_v26, %v2984_v42  ;;  %v10469_v17 = vsel %vm2988_vm3, %v2985_v0, %v13332_v33  ;;  %v37_v33 = vld [vmem:[%s12439_s1 + $0xd0] sm:$0xff] }
 0x59e   :  { %13331 = vst [vmem:[#allocation133_spill] sm:$0xff] %v10443_v40  ;;  %v2886_v42 = vmul.f32 %v10029_v59, %v10277_v48  ;;  %v2887_v0 = vmul.f32 %v10046_v7, %v10285_v53  ;;  %v2888_v59 = vmul.f32 %v10062_v46, %v10292_v32  ;;  %v2889_v7 = vmul.f32 %v10078_v47, %v10325_v37  ;;  %v33_v53 = vld [vmem:[%s12439_s1 + $0xb0] sm:$0xff] }
 0x59f   :  { %3475 = vrot.lane.b32.xlu1 %v10325_v37, %s8066_s13  ;;  %3403 = vrot.lane.b32.xlu0 %v2883_v8, %s8067_s14  ;;  %v10454_v8 = vsel %vm2988_vm3, %v2982_v38, %v2983_v26  ;;  %v2890_v46 = vmul.f32 %v10021_v6, %v10335_v13  ;;  %v2970_v47 = vmul.f32 %v10026_v25, %v10158_v43  ;;  %v3867_v14 = vand.u32 4294901760, %v33_v53 }
 0x5a0   :  { %v2971_v6 = vmul.f32 %v10106_v57, %v10156_v29  ;;  %v2716_v25 = vmul.f32 %v9849_v23, %v10254_v22  ;;  %v2717_v57 = vmul.f32 %v9855_v49, %v10263_v36  ;;  %v32_v29 = vld [vmem:[%s12439_s1 + $0xa8] sm:$0xff]  ;;  %v2797_v49 = vmul.f32 %v9949_v61, %v10270_v45 }
 0x5a1   :  { %v3864_v23 = vand.u32 4294901760, %v32_v29  ;;  %v10548_v15 = vsub.f32 %v33_v53, %v3867_v14  ;;  %v13338_v26 = vmov 0.0|0.0  }
 0x5a3   :  { %3477 = vrot.lane.b32.xlu1 %v10335_v13, %s8066_s13  ;;  %3405 = vrot.lane.b32.xlu0 %v2884_v2, %s8067_s14  ;;  %v2956_v2 = vmul.f32 %v9812_v21, %v10160_v16  ;;  %v2958_v21 = vmul.f32 %v9851_v4, %v10220_v54  ;;  %v2960_v4 = vmul.f32 %v9908_v60, %v10237_v63  ;;  %v10510_v16 = vpop.permute.xlu0 %2609  ;;  %v35_v63 = vld [vmem:[%s12439_s1 + $0xc0] sm:$0xff] }
 0x5a4   :  { %13333 = vst [vmem:[#allocation134_spill] sm:$0xff] %v10510_v16  ;;  %v2962_v60 = vmul.f32 %v9957_v62, %v10277_v48  ;;  %v2964_v62 = vmul.f32 %v9993_v41, %v10292_v32  ;;  %v2965_v41 = vmul.f32 %v10018_v35, %v10325_v37  ;;  %v10544_v9 = vpack.c.bf16 %v3867_v14, %v3864_v23  ;;  %v34_v35 = vld [vmem:[%s12439_s1 + $0xb8] sm:$0xff]  ;;  %v13337_v37 = vld [vmem:[#allocation18_spill] sm:$0xff] }
 0x5a5   :  { %v10546_v54 = vsub.f32 %v32_v29, %v3864_v23  ;;  %v3870_v61 = vand.u32 4294901760, %v34_v35  ;;  %v3873_v48 = vand.u32 4294901760, %v35_v63  ;;  %v2966_v32 = vmul.f32 %v10038_v5, %v10335_v13  ;;  %v13347_v29 = vld [vmem:[#allocation48_spill] sm:$0xff] }
 0x5a6   :  { %13336 = vst [vmem:[#allocation137_spill] sm:$0xff] %v10544_v9  ;;  %7274 = vmatpush1.bf16.msra.mxu1 %v10544_v9  ;;  %v2798_v38 = vmul.f32 %v13337_v37, %v10274_v58  ;;  %v2799_v53 = vmul.f32 %v13347_v29, %v10289_v1  ;;  %v13366_v9 = vld [vmem:[#allocation20_spill] sm:$0xff] }
 0x5a7   :  { %3483 = vrot.lane.b32.xlu1 %v10211_v3, %s8066_s13  ;;  %3407 = vrot.lane.b32.xlu0 %v2885_v10, %s8067_s14  ;;  %v10522_v43 = vpop.permute.xlu0 %2613  ;;  %v36_v10 = vld [vmem:[%s12439_s1 + $0xc8] sm:$0xff] }
 0x5a8   :  { %13334 = vst [vmem:[#allocation135_spill] sm:$0xff] %v10522_v43  ;;  %7275 = vmatprep.subr.bf16.mxu1 %v13338_v26  ;;  %v3876_v5 = vand.u32 4294901760, %v36_v10 }
 0x5ab   :  { %3517 = vrot.lane.b32.xlu1 %v2956_v2, %s8068_s15  ;;  %3409 = vrot.lane.b32.xlu0 %v2886_v42, %s8067_s14  ;;  %v10540_v56 = vpop.permute.xlu0 %2617  ;;  %v10570_v2 = vpack.c.bf16 %v3873_v48, %v3870_v61  ;;  %v10572_v42 = vsub.f32 %v34_v35, %v3870_v61  ;;  %v13349_v61 = vld [vmem:[#allocation96_spill] sm:$0xff] }
 0x5ac   :  { %13335 = vst [vmem:[#allocation136_spill] sm:$0xff] %v10540_v56 }
 0x5ad   :  { %13339 = vst [vmem:[#allocation18_spill] sm:$0xff] %v10570_v2  ;;  %13340 = vst [vmem:[#allocation138_spill] sm:$0xff] %v10572_v42  ;;  %7277 = vmatpush1.bf16.msra.mxu1 %v10570_v2  ;;  %v13365_v2 = vld [vmem:[#allocation118_spill] sm:$0xff] }
 0x5ae   :  { %7278 = vmatprep.subr.bf16.mxu1 %v13338_v26 }
 0x5af   :  { %3519 = vrot.lane.b32.xlu1 %v2957_v11, %s8068_s15  ;;  %3411 = vrot.lane.b32.xlu0 %v2887_v0, %s8067_s14  ;;  %v10574_v11 = vsub.f32 %v35_v63, %v3873_v48  ;;  %v10576_v13 = vpop.permute.xlu0 %2621  ;;  %v3879_v0 = vand.u32 4294901760, %v37_v33  ;;  %v2969_v48 = vmul.f32 %v13349_v61, %v10211_v3  ;;  %v13360_v61 = vld [vmem:[#allocation11_spill] sm:$0xff] }
 0x5b0   :  { %13341 = vst [vmem:[#allocation139_spill] sm:$0xff] %v10576_v13 }
 0x5b3   :  { %3521 = vrot.lane.b32.xlu1 %v2958_v21, %s8068_s15  ;;  %3413 = vrot.lane.b32.xlu0 %v2888_v59, %s8067_s14  ;;  %v10581_v21 = vsub.f32 %v36_v10, %v3876_v5  ;;  %v13342_v59 = vld [vmem:[#allocation82_spill] sm:$0xff] }
 0x5b7   :  { %3523 = vrot.lane.b32.xlu1 %v2959_v50, %s8068_s15  ;;  %3415 = vrot.lane.b32.xlu0 %v2889_v7, %s8067_s14  ;;  %v2967_v50 = vmul.f32 %v13342_v59, %v10174_v55  ;;  %v13343_v7 = vld [vmem:[#allocation16_spill] sm:$0xff] }
 0x5bb   :  { %3525 = vrot.lane.b32.xlu1 %v2960_v4, %s8068_s15  ;;  %3417 = vrot.lane.b32.xlu0 %v2890_v46, %s8067_s14  ;;  %v2719_v4 = vmul.f32 %v13343_v7, %v10270_v45  ;;  %v10588_v46 = vpack.c.bf16 %v3879_v0, %v3876_v5  ;;  %v42_v5 = vld [vmem:[%s12439_s1 + $0xf8] sm:$0xff]  ;;  %v13353_v7 = vld [vmem:[#allocation103_spill] sm:$0xff] }
 0x5bc   :  { %v3894_v59 = vand.u32 4294901760, %v42_v5 }
 0x5bd   :  { %13344 = vst [vmem:[#allocation82_spill] sm:$0xff] %v10588_v46  ;;  %7280 = vmatpush1.bf16.msra.mxu1 %v10588_v46 }
 0x5be   :  { %7281 = vmatprep.subr.bf16.mxu1 %v13338_v26 }
 0x5bf   :  { %3527 = vrot.lane.b32.xlu1 %v2961_v44, %s8068_s15  ;;  %3545 = vrot.lane.b32.xlu0 %v2970_v47, %s8068_s15  ;;  %v10590_v44 = vsub.f32 %v37_v33, %v3879_v0  ;;  %v38_v47 = vld [vmem:[%s12439_s1 + $0xd8] sm:$0xff]  ;;  %v43_v0 = vld [vmem:[%s12439_s1 + $0x100] sm:$0xff] }
 0x5c3   :  { %3529 = vrot.lane.b32.xlu1 %v2962_v60, %s8068_s15  ;;  %3547 = vrot.lane.b32.xlu0 %v2971_v6, %s8068_s15  ;;  %v39_v60 = vld [vmem:[%s12439_s1 + $0xe0] sm:$0xff]  ;;  %v3882_v6 = vand.u32 4294901760, %v38_v47 }
 0x5c5   :  { %v10610_v14 = vsub.f32 %v38_v47, %v3882_v6  ;;  %v13354_v47 = vld [vmem:[#allocation7_spill] sm:$0xff] }
 0x5c7   :  { %3531 = vrot.lane.b32.xlu1 %v2963_v30, %s8068_s15  ;;  %3261 = vrot.lane.b32.xlu0 %v2716_v25, %s8054_s5  ;;  %v3885_v30 = vand.u32 4294901760, %v39_v60  ;;  %v13345_v25 = vld [vmem:[#allocation89_spill] sm:$0xff] }
 0x5c9   :  { %v10608_v23 = vpack.c.bf16 %v3885_v30, %v3882_v6 }
 0x5cb   :  { %3533 = vrot.lane.b32.xlu1 %v2964_v62, %s8068_s15  ;;  %3263 = vrot.lane.b32.xlu0 %v2717_v57, %s8054_s5  ;;  %v2968_v62 = vmul.f32 %v13345_v25, %v10198_v27  ;;  %v10603_v57 = vpop.permute.xlu0 %2625  ;;  %13348 = vst [vmem:[#allocation89_spill] sm:$0xff] %v10608_v23  ;;  %v40_v27 = vld [vmem:[%s12439_s1 + $0xe8] sm:$0xff] }
 0x5cc   :  { %13346 = vst [vmem:[#allocation16_spill] sm:$0xff] %v10603_v57  ;;  %7283 = vmatpush1.bf16.msra.mxu1 %v10608_v23  ;;  %v3888_v35 = vand.u32 4294901760, %v40_v27 }
 0x5cd   :  { %7284 = vmatprep.subr.bf16.mxu1 %v13338_v26 }
 0x5ce   :  { %v10630_v10 = vsub.f32 %v40_v27, %v3888_v35 }
 0x5cf   :  { %3535 = vrot.lane.b32.xlu1 %v2965_v41, %s8068_s15  ;;  %3327 = vrot.lane.b32.xlu0 %v2797_v49, %s8069_s20  ;;  %v10612_v41 = vsub.f32 %v39_v60, %v3885_v30  ;;  %v41_v49 = vld [vmem:[%s12439_s1 + $0xf0] sm:$0xff]  ;;  %v10640_v3 = vpop.permute.xlu0 %2629  ;;  %v2721_v60 = vmul.f32 %v13354_v47, %v10289_v1  ;;  %v10652_v30 = vsub.f32 %v42_v5, %v3894_v59  ;;  %v47_v47 = vld [vmem:[%s12439_s1 + $0x120] sm:$0xff] }
 0x5d0   :  { %v3891_v63 = vand.u32 4294901760, %v41_v49  ;;  %13352 = vst [vmem:[#allocation96_spill] sm:$0xff] %v10640_v3 }
 0x5d2   :  { %v10632_v33 = vsub.f32 %v41_v49, %v3891_v63 }
 0x5d3   :  { %3537 = vrot.lane.b32.xlu1 %v2966_v32, %s8068_s15  ;;  %3329 = vrot.lane.b32.xlu0 %v2798_v38, %s8069_s20  ;;  %v13350_v32 = vld [vmem:[#allocation21_spill] sm:$0xff]  ;;  %v10628_v38 = vpack.c.bf16 %v3891_v63, %v3888_v35  ;;  %v13359_v63 = vld [vmem:[#allocation54_spill] sm:$0xff] }
 0x5d4   :  { %v2800_v37 = vmul.f32 %v13350_v32, %v10306_v12  ;;  %v13361_v32 = vld [vmem:[#allocation58_spill] sm:$0xff] }
 0x5d5   :  { %13351 = vst [vmem:[#allocation48_spill] sm:$0xff] %v10628_v38  ;;  %7286 = vmatpush1.bf16.msra.mxu1 %v10628_v38 }
 0x5d6   :  { %7287 = vmatprep.subr.bf16.mxu1 %v13338_v26 }
 0x5d7   :  { %3539 = vrot.lane.b32.xlu1 %v2967_v50, %s8068_s15  ;;  %3267 = vrot.lane.b32.xlu0 %v2719_v4, %s8054_s5  ;;  %v3897_v50 = vand.u32 4294901760, %v43_v0  ;;  %v2891_v4 = vmul.f32 %v13353_v7, %v10174_v55  ;;  %v10659_v55 = vpop.permute.xlu0 %2633 }
 0x5d8   :  { %13356 = vst [vmem:[#allocation103_spill] sm:$0xff] %v10659_v55 }
 0x5d9   :  { %v10650_v6 = vpack.c.bf16 %v3897_v50, %v3894_v59  ;;  %v10654_v25 = vsub.f32 %v43_v0, %v3897_v50  ;;  %v44_v0 = vld [vmem:[%s12439_s1 + $0x108] sm:$0xff]  ;;  %v45_v59 = vld [vmem:[%s12439_s1 + $0x110] sm:$0xff]  ;;  %v46_v50 = vld [vmem:[%s12439_s1 + $0x118] sm:$0xff] }
 0x5da   :  { %v3900_v7 = vand.u32 4294901760, %v44_v0 }
 0x5db   :  { %3541 = vrot.lane.b32.xlu1 %v2968_v62, %s8068_s15  ;;  %3331 = vrot.lane.b32.xlu0 %v2799_v53, %s8069_s20  ;;  %13355 = vst [vmem:[#allocation21_spill] sm:$0xff] %v10650_v6  ;;  %v13357_v62 = vld [vmem:[#allocation10_spill] sm:$0xff]  ;;  %v13358_v53 = vld [vmem:[#allocation55_spill] sm:$0xff] }
 0x5dc   :  { %7289 = vmatpush1.bf16.msra.mxu1 %v10650_v6  ;;  %v2796_v29 = vmul.f32 %v13357_v62, %v10297_v39  ;;  %v2801_v27 = vmul.f32 %v13358_v53, %v10312_v51  ;;  %v48_v62 = vld [vmem:[%s12439_s1 + $0x128] sm:$0xff]  ;;  %v3909_v53 = vand.u32 4294901760, %v47_v47  ;;  %v10698_v31 = vsub.f32 %v44_v0, %v3900_v7 }
 0x5dd   :  { %7290 = vmatprep.subr.bf16.mxu1 %v13338_v26 }
 0x5de   :  { %v10712_v57 = vsub.f32 %v47_v47, %v3909_v53  ;;  %v13371_v47 = vld [vmem:[#allocation56_spill] sm:$0xff] }
 0x5df   :  { %3543 = vrot.lane.b32.xlu1 %v2969_v48, %s8068_s15  ;;  %3333 = vrot.lane.b32.xlu0 %v2800_v37, %s8069_s20  ;;  %v3069_v48 = vmul.f32 %v13360_v61, %v13359_v63  ;;  %v13362_v37 = vld [vmem:[#allocation22_spill] sm:$0xff] }
 0x5e0   :  { %v2802_v5 = vmul.f32 %v13362_v37, %v13361_v32 }
 0x5e3   :  { %3419 = vrot.lane.b32.xlu1 %v2891_v4, %s8067_s14  ;;  %3271 = vrot.lane.b32.xlu0 %v2721_v60, %s8054_s5  ;;  %v3903_v4 = vand.u32 4294901760, %v45_v59  ;;  %v3906_v60 = vand.u32 4294901760, %v46_v50 }
 0x5e5   :  { %v10696_v37 = vpack.c.bf16 %v3903_v4, %v3900_v7  ;;  %v10700_v6 = vsub.f32 %v45_v59, %v3903_v4  ;;  %v10702_v38 = vsub.f32 %v46_v50, %v3906_v60  ;;  %v10717_v0 = vpack.c.bf16 %v3909_v53, %v3906_v60  ;;  %v13370_v7 = vld [vmem:[#allocation2_spill] sm:$0xff]  ;;  %v13374_v53 = vld [vmem:[#allocation12_spill] sm:$0xff] }
 0x5e6   :  { %v2718_v4 = vmul.f32 %v13370_v7, %v10297_v39  ;;  %v13376_v7 = vld [vmem:[#allocation61_spill] sm:$0xff] }
 0x5e7   :  { %3325 = vrot.lane.b32.xlu1 %v2796_v29, %s8069_s20  ;;  %3335 = vrot.lane.b32.xlu0 %v2801_v27, %s8069_s20  ;;  %v49_v29 = vld [vmem:[%s12439_s1 + $0x130] sm:$0xff]  ;;  %v3912_v27 = vand.u32 4294901760, %v48_v62  ;;  %13363 = vst [vmem:[#allocation7_spill] sm:$0xff] %v10696_v37  ;;  %13368 = vst [vmem:[#allocation55_spill] sm:$0xff] %v10717_v0 }
 0x5e8   :  { %v3915_v61 = vand.u32 4294901760, %v49_v29  ;;  %7292 = vmatpush1.bf16.msra.mxu1 %v10696_v37 }
 0x5e9   :  { %v10668_v49 = vpop.permute.xlu1 %3455  ;;  %v10670_v35 = vpop.permute.xlu0 %3453  ;;  %v10714_v3 = vsub.f32 %v48_v62, %v3912_v27  ;;  %7293 = vmatprep.subr.bf16.mxu1 %v13338_v26  ;;  %v2803_v62 = vmul.f32 %v13371_v47, %v10348_v19 }
 0x5ea   :  { %v10719_v59 = vsub.f32 %v49_v29, %v3915_v61  ;;  %v10733_v60 = vpack.c.bf16 %v3915_v61, %v3912_v27 }
 0x5eb   :  { %3581 = vrot.lane.b32.xlu1 %v3069_v48, %s8070_s30  ;;  %3337 = vrot.lane.b32.xlu0 %v2802_v5, %s8069_s20  ;;  %v3149_v48 = vmul.f32 %v13366_v9, %v13365_v2  ;;  %v13367_v5 = vld [vmem:[#allocation47_spill] sm:$0xff] }
 0x5ec   :  { %v2723_v55 = vmul.f32 %v13367_v5, %v10312_v51  ;;  %7295 = vmatpush1.bf16.msra.mxu1 %v10717_v0  ;;  %13372 = vst [vmem:[#allocation22_spill] sm:$0xff] %v10733_v60  ;;  %v13375_v5 = vld [vmem:[#allocation122_spill] sm:$0xff]  ;;  %v13395_v51 = vld [vmem:[#allocation67_spill] sm:$0xff] }
 0x5ed   :  { %v10704_v23 = vpop.permute.xlu1 %3457  ;;  %v10706_v46 = vpop.permute.xlu0 %3479  ;;  %7296 = vmatprep.subr.bf16.mxu1 %v13338_v26  ;;  %v2804_v47 = vmul.f32 %v13376_v7, %v13375_v5 }
 0x5ee   :  { %13364 = vst [vmem:[#allocation10_spill] sm:$0xff] %v10706_v46  ;;  %v13383_v46 = vld [vmem:[#allocation123_spill] sm:$0xff] }
 0x5ef   :  { %3645 = vrot.lane.b32.xlu1 %v3149_v48, %s8065_s0  ;;  %3275 = vrot.lane.b32.xlu0 %v2723_v55, %s8054_s5  ;;  %v3070_v48 = vmul.f32 %v13374_v53, %v10343_v24  ;;  %v13380_v53 = vld [vmem:[#allocation64_spill] sm:$0xff] }
 0x5f0   :  { %7298 = vmatpush1.bf16.msra.mxu1 %v10733_v60  ;;  %v2725_v37 = vmul.f32 %v13380_v53, %v10348_v19  ;;  %v13388_v19 = vld [vmem:[#allocation65_spill] sm:$0xff] }
 0x5f1   :  { %v10724_v9 = vpop.permute.xlu1 %3459  ;;  %v10726_v50 = vpop.permute.xlu0 %3481  ;;  %7299 = vmatprep.subr.bf16.mxu1 %v13338_v26  ;;  %v2806_v43 = vmul.f32 %v13388_v19, %v10378_v18 }
 0x5f2   :  { %13369 = vst [vmem:[#allocation11_spill] sm:$0xff] %v10726_v50  ;;  %v13384_v50 = vld [vmem:[#allocation63_spill] sm:$0xff] }
 0x5f3   :  { %3265 = vrot.lane.b32.xlu1 %v2718_v4, %s8054_s5  ;;  %3339 = vrot.lane.b32.xlu0 %v2803_v62, %s8069_s20  ;;  %v13378_v4 = vld [vmem:[#allocation121_spill] sm:$0xff]  ;;  %v13379_v62 = vld [vmem:[#allocation24_spill] sm:$0xff]  ;;  %v2805_v13 = vmul.f32 %v13384_v50, %v13383_v46 }
 0x5f4   :  { %v3150_v0 = vmul.f32 %v13379_v62, %v13378_v4 }
 0x5f5   :  { %v10738_v55 = vpop.permute.xlu1 %3461  ;;  %v10740_v29 = vpop.permute.xlu0 %3389 }
 0x5f6   :  { %13373 = vst [vmem:[#allocation20_spill] sm:$0xff] %v10738_v55 }
 0x5f7   :  { %3583 = vrot.lane.b32.xlu1 %v3070_v48, %s8070_s30  ;;  %3341 = vrot.lane.b32.xlu0 %v2804_v47, %s8069_s20  ;;  %v13382_v47 = vld [vmem:[#allocation3_spill] sm:$0xff] }
 0x5f8   :  { %v3071_v60 = vmul.f32 %v13382_v47, %v13365_v2  ;;  %v13391_v2 = vld [vmem:[#allocation74_spill] sm:$0xff] }
 0x5f9   :  { %v10750_v27 = vpop.permute.xlu1 %3463  ;;  %v10752_v61 = vpop.permute.xlu0 %3391  ;;  %v2727_v16 = vmul.f32 %v13391_v2, %v13383_v46 }
 0x5fa   :  { %13377 = vst [vmem:[#allocation47_spill] sm:$0xff] %v10750_v27 }
 0x5fb   :  { %3647 = vrot.lane.b32.xlu1 %v3150_v0, %s8065_s0  ;;  %3279 = vrot.lane.b32.xlu0 %v2725_v37, %s8054_s5  ;;  %v13386_v0 = vld [vmem:[#allocation117_spill] sm:$0xff] }
 0x5fc   :  { %v13387_v37 = vld [vmem:[#allocation25_spill] sm:$0xff] }
 0x5fd   :  { %v10760_v7 = vpop.permute.xlu1 %3465  ;;  %v10762_v48 = vpop.permute.xlu0 %3393  ;;  %v3151_v56 = vmul.f32 %v13387_v37, %v13386_v0 }
 0x5fe   :  { %13381 = vst [vmem:[#allocation2_spill] sm:$0xff] %v10760_v7 }
 0x5ff   :  { %3585 = vrot.lane.b32.xlu1 %v3071_v60, %s8070_s30  ;;  %3343 = vrot.lane.b32.xlu0 %v2805_v13, %s8069_s20  ;;  %v13390_v13 = vld [vmem:[#allocation4_spill] sm:$0xff] }
 0x600   :  { %v2720_v60 = vmul.f32 %v13390_v13, %v10274_v58 }
 0x601   :  { %v10770_v62 = vpop.permute.xlu1 %3467  ;;  %v10772_v53 = vpop.permute.xlu0 %3395 }
 0x602   :  { %13385 = vst [vmem:[#allocation56_spill] sm:$0xff] %v10770_v62  ;;  %v13401_v62 = vld [vmem:[#allocation69_spill] sm:$0xff] }
 0x603   :  { %3649 = vrot.lane.b32.xlu1 %v3151_v56, %s8065_s0  ;;  %3345 = vrot.lane.b32.xlu0 %v2806_v43, %s8069_s20  ;;  %v13394_v43 = vld [vmem:[#allocation5_spill] sm:$0xff] }
 0x604   :  { %v3072_v56 = vmul.f32 %v13394_v43, %v13378_v4  ;;  %v13405_v4 = vld [vmem:[#allocation87_spill] sm:$0xff] }
 0x605   :  { %v10780_v47 = vpop.permute.xlu1 %3469  ;;  %v10782_v50 = vpop.permute.xlu0 %3397 }
 0x606   :  { %13389 = vst [vmem:[#allocation12_spill] sm:$0xff] %v10780_v47  ;;  %v2807_v47 = vmul.f32 %v13395_v51, %v10382_v28 }
 0x607   :  { %3269 = vrot.lane.b32.xlu1 %v2720_v60, %s8054_s5  ;;  %3283 = vrot.lane.b32.xlu0 %v2727_v16, %s8054_s5  ;;  %v13398_v60 = vld [vmem:[#allocation126_spill] sm:$0xff]  ;;  %v13399_v16 = vld [vmem:[#allocation27_spill] sm:$0xff] }
 0x608   :  { %v3152_v46 = vmul.f32 %v13399_v16, %v13398_v60 }
 0x609   :  { %v10790_v37 = vpop.permute.xlu1 %3471  ;;  %v10792_v19 = vpop.permute.xlu0 %3399 }
 0x60a   :  { %13392 = vst [vmem:[#allocation61_spill] sm:$0xff] %v10790_v37  ;;  %13393 = vst [vmem:[#allocation24_spill] sm:$0xff] %v10792_v19  ;;  %v13400_v37 = vld [vmem:[#allocation127_spill] sm:$0xff] }
 0x60b   :  { %3587 = vrot.lane.b32.xlu1 %v3072_v56, %s8070_s30  ;;  %3347 = vrot.lane.b32.xlu0 %v2807_v47, %s8069_s20  ;;  %v2808_v1 = vmul.f32 %v13401_v62, %v13400_v37  ;;  %v13404_v47 = vld [vmem:[#allocation9_spill] sm:$0xff] }
 0x60c   :  { %v3073_v56 = vmul.f32 %v13404_v47, %v13386_v0 }
 0x60d   :  { %v10800_v13 = vpop.permute.xlu1 %3473  ;;  %v10802_v2 = vpop.permute.xlu0 %3401 }
 0x60e   :  { %13396 = vst [vmem:[#allocation64_spill] sm:$0xff] %v10800_v13  ;;  %13397 = vst [vmem:[#allocation3_spill] sm:$0xff] %v10802_v2  ;;  %v2729_v13 = vmul.f32 %v13405_v4, %v10382_v28  ;;  %v13411_v2 = vld [vmem:[#allocation70_spill] sm:$0xff] }
 0x60f   :  { %3651 = vrot.lane.b32.xlu1 %v3152_v46, %s8065_s0  ;;  %3349 = vrot.lane.b32.xlu0 %v2808_v1, %s8069_s20  ;;  %v13408_v46 = vld [vmem:[#allocation129_spill] sm:$0xff]  ;;  %v13409_v1 = vld [vmem:[#allocation30_spill] sm:$0xff] }
 0x610   :  { %v3153_v7 = vmul.f32 %v13409_v1, %v13408_v46 }
 0x611   :  { %v10810_v43 = vpop.permute.xlu1 %3475  ;;  %v10812_v51 = vpop.permute.xlu0 %3403 }
 0x612   :  { %13402 = vst [vmem:[#allocation63_spill] sm:$0xff] %v10810_v43  ;;  %13403 = vst [vmem:[#allocation117_spill] sm:$0xff] %v10812_v51  ;;  %v13410_v43 = vld [vmem:[#allocation128_spill] sm:$0xff] }
 0x613   :  { %3589 = vrot.lane.b32.xlu1 %v3073_v56, %s8070_s30  ;;  %3287 = vrot.lane.b32.xlu0 %v2729_v13, %s8054_s5  ;;  %v2809_v51 = vmul.f32 %v13411_v2, %v13410_v43  ;;  %v13414_v13 = vld [vmem:[#allocation13_spill] sm:$0xff]  ;;  %v13415_v56 = vld [vmem:[#allocation94_spill] sm:$0xff] }
 0x614   :  { %v2722_v47 = vmul.f32 %v13414_v13, %v10306_v12  ;;  %v2730_v28 = vmul.f32 %v13415_v56, %v13400_v37  ;;  %v13419_v56 = vld [vmem:[#allocation130_spill] sm:$0xff] }
 0x615   :  { %v10820_v16 = vpop.permute.xlu1 %3477  ;;  %v10822_v62 = vpop.permute.xlu0 %3405 }
 0x616   :  { %13406 = vst [vmem:[#allocation25_spill] sm:$0xff] %v10820_v16  ;;  %13407 = vst [vmem:[#allocation65_spill] sm:$0xff] %v10822_v62  ;;  %v13422_v62 = vld [vmem:[#allocation102_spill] sm:$0xff] }
 0x617   :  { %3653 = vrot.lane.b32.xlu1 %v3153_v7, %s8065_s0  ;;  %3351 = vrot.lane.b32.xlu0 %v2809_v51, %s8069_s20  ;;  %v13416_v7 = vld [vmem:[#allocation17_spill] sm:$0xff]  ;;  %v13417_v51 = vld [vmem:[#allocation72_spill] sm:$0xff] }
 0x618   :  { %v3074_v2 = vmul.f32 %v13416_v7, %v13398_v60 }
 0x619   :  { %v10830_v0 = vpop.permute.xlu1 %3483  ;;  %v10832_v4 = vpop.permute.xlu0 %3407 }
 0x61a   :  { %13412 = vst [vmem:[#allocation4_spill] sm:$0xff] %v10830_v0  ;;  %13413 = vst [vmem:[#allocation74_spill] sm:$0xff] %v10832_v4  ;;  %v2810_v0 = vmul.f32 %v13417_v51, %v10254_v22 }
 0x61b   :  { %3273 = vrot.lane.b32.xlu1 %v2722_v47, %s8054_s5  ;;  %3289 = vrot.lane.b32.xlu0 %v2730_v28, %s8054_s5  ;;  %v13420_v47 = vld [vmem:[#allocation32_spill] sm:$0xff]  ;;  %v13421_v28 = vld [vmem:[#allocation131_spill] sm:$0xff] }
 0x61c   :  { %v3154_v4 = vmul.f32 %v13420_v47, %v13419_v56  ;;  %v3083_v12 = vmul.f32 %v13422_v62, %v13421_v28  ;;  %v13426_v62 = vld [vmem:[#allocation132_spill] sm:$0xff] }
 0x61d   :  { %v10840_v1 = vpop.permute.xlu1 %3517  ;;  %v10846_v16 = vpop.permute.xlu0 %3409 }
 0x61e   :  { %13418 = vst [vmem:[#allocation5_spill] sm:$0xff] %v10846_v16 }
 0x61f   :  { %3591 = vrot.lane.b32.xlu1 %v3074_v2, %s8070_s30  ;;  %3353 = vrot.lane.b32.xlu0 %v2810_v0, %s8069_s20  ;;  %v13424_v2 = vld [vmem:[#allocation49_spill] sm:$0xff]  ;;  %v13425_v0 = vld [vmem:[#allocation104_spill] sm:$0xff] }
 0x620   :  { %v3075_v16 = vmul.f32 %v13424_v2, %v13408_v46  ;;  %v3163_v27 = vmul.f32 %v13425_v0, %v13359_v63 }
 0x621   :  { %v10850_v13 = vpop.permute.xlu1 %3519  ;;  %v10858_v7 = vpop.permute.xlu0 %3411 }
 0x622   :  { %13423 = vst [vmem:[#allocation67_spill] sm:$0xff] %v10858_v7 }
 0x623   :  { %3655 = vrot.lane.b32.xlu1 %v3154_v4, %s8065_s0  ;;  %3609 = vrot.lane.b32.xlu0 %v3083_v12, %s8070_s30  ;;  %v13427_v4 = vld [vmem:[#allocation33_spill] sm:$0xff]  ;;  %v13428_v12 = vld [vmem:[#allocation106_spill] sm:$0xff] }
 0x624   :  { %v3155_v58 = vmul.f32 %v13427_v4, %v13426_v62  ;;  %v3164_v7 = vmul.f32 %v13428_v12, %v10343_v24  ;;  %v13434_v4 = vld [vmem:[#allocation60_spill] sm:$0xff] }
 0x625   :  { %v10860_v51 = vpop.permute.xlu1 %3521  ;;  %v10874_v19 = vpop.permute.xlu0 %3413  ;;  %v3076_v12 = vmul.f32 %v13434_v4, %v13419_v56 }
 0x626   :  { %13429 = vst [vmem:[#allocation126_spill] sm:$0xff] %v10874_v19 }
 0x627   :  { %3593 = vrot.lane.b32.xlu1 %v3075_v16, %s8070_s30  ;;  %3673 = vrot.lane.b32.xlu0 %v3163_v27, %s8065_s0  ;;  %v13431_v16 = vld [vmem:[#allocation57_spill] sm:$0xff] }
 0x628   :  { %v2724_v0 = vmul.f32 %v13431_v16, %v13361_v32 }
 0x629   :  { %v10868_v47 = vpop.permute.xlu1 %3523  ;;  %v10883_v27 = vpop.permute.xlu0 %3415 }
 0x62a   :  { %13432 = vst [vmem:[#allocation127_spill] sm:$0xff] %v10883_v27 }
 0x62b   :  { %3657 = vrot.lane.b32.xlu1 %v3155_v58, %s8065_s0  ;;  %3675 = vrot.lane.b32.xlu0 %v3164_v7, %s8065_s0  ;;  %v13436_v58 = vld [vmem:[#allocation37_spill] sm:$0xff] }
 0x62c   :  { %v3156_v7 = vmul.f32 %v13436_v58, %v10438_v34 }
 0x62d   :  { %v10878_v2 = vpop.permute.xlu1 %3525  ;;  %v10894_v24 = vpop.permute.xlu0 %3417 }
 0x62e   :  { %13430 = vst [vmem:[#allocation27_spill] sm:$0xff] %v10878_v2  ;;  %13437 = vst [vmem:[#allocation87_spill] sm:$0xff] %v10894_v24 }
 0x62f   :  { %3277 = vrot.lane.b32.xlu1 %v2724_v0, %s8054_s5  ;;  %v13439_v0 = vld [vmem:[#allocation68_spill] sm:$0xff] }
 0x630   :  { %v3077_v27 = vmul.f32 %v13439_v0, %v13426_v62  ;;  %v12711_v0 = vand.u32 4294901760, %v10546_v54 }
 0x631   :  { %v10885_v63 = vpop.permute.xlu1 %3527  ;;  %v10902_v32 = vpop.permute.xlu0 %3545 }
 0x632   :  { %13433 = vst [vmem:[#allocation69_spill] sm:$0xff] %v10885_v63  ;;  %13440 = vst [vmem:[#allocation30_spill] sm:$0xff] %v10902_v32  ;;  %v4190_v32 = vsub.f32 %v10546_v54, %v12711_v0  ;;  %v13449_v0 = vld [vmem:[#allocation42_spill] sm:$0xff] }
 0x633   :  { %3595 = vrot.lane.b32.xlu1 %v3076_v12, %s8070_s30  ;;  %v13442_v12 = vld [vmem:[#allocation38_spill] sm:$0xff]  ;;  %v3158_v2 = vmul.f32 %v13449_v0, %v10450_v20 }
 0x635   :  { %v10890_v19 = vpop.permute.xlu1 %3529 }
 0x636   :  { %13435 = vst [vmem:[#allocation9_spill] sm:$0xff] %v10890_v19  ;;  %v3157_v19 = vmul.f32 %v13442_v12, %v10443_v40 }
 0x637   :  { %3659 = vrot.lane.b32.xlu1 %v3156_v7, %s8065_s0  ;;  %v13444_v7 = vld [vmem:[#allocation71_spill] sm:$0xff] }
 0x638   :  { %v2726_v24 = vmul.f32 %v13444_v7, %v13375_v5  ;;  %v13447_v7 = vld [vmem:[#allocation73_spill] sm:$0xff] }
 0x639   :  { %v10897_v16 = vpop.permute.xlu1 %3531  ;;  %v3078_v5 = vmul.f32 %v13447_v7, %v10438_v34 }
 0x63a   :  { %13438 = vst [vmem:[#allocation129_spill] sm:$0xff] %v10897_v16  ;;  %v10913_v16 = vpop.permute.xlu0 %3547 }
 0x63b   :  { %3597 = vrot.lane.b32.xlu1 %v3077_v27, %s8070_s30  ;;  %13445 = vst [vmem:[#allocation13_spill] sm:$0xff] %v10913_v16  ;;  %v12712_v27 = vand.u32 4294901760, %v10548_v15  ;;  %v4191_v16 = vand.u32 4294901760, %v4190_v32  ;;  %v13451_v32 = vld [vmem:[#allocation77_spill] sm:$0xff] }
 0x63d   :  { %v10904_v4 = vpop.permute.xlu1 %3533 }
 0x63e   :  { %13441 = vst [vmem:[#allocation128_spill] sm:$0xff] %v10904_v4  ;;  %v3262_v4 = vpop.permute.xlu0 %3261 }
 0x63f   :  { %3661 = vrot.lane.b32.xlu1 %v3157_v19, %s8065_s0  ;;  %v4197_v19 = vsub.f32 %v10548_v15, %v12712_v27  ;;  %v12714_v27 = vand.u32 4294901760, %v10572_v42 }
 0x641   :  { %v10909_v58 = vpop.permute.xlu1 %3535 }
 0x642   :  { %13443 = vst [vmem:[#allocation70_spill] sm:$0xff] %v10909_v58  ;;  %v4198_v58 = vand.u32 4294901760, %v4197_v19  ;;  %v3079_v19 = vmul.f32 %v13451_v32, %v10443_v40 }
 0x643   :  { %3281 = vrot.lane.b32.xlu1 %v2726_v24, %s8054_s5 }
 0x644   :  { %v10929_v63 = vpack.c.bf16 %v4198_v58, %v4191_v16  ;;  %v4204_v16 = vsub.f32 %v10572_v42, %v12714_v27  ;;  %v13454_v27 = vld [vmem:[#allocation107_spill] sm:$0xff] }
 0x645   :  { %v10924_v12 = vpop.permute.xlu1 %3537  ;;  %v3230_v42 = vmul.f32 %v13454_v27, %v13398_v60  ;;  %v13458_v27 = vld [vmem:[#allocation84_spill] sm:$0xff] }
 0x646   :  { %13446 = vst [vmem:[#allocation94_spill] sm:$0xff] %v10924_v12  ;;  %v12718_v12 = vand.u32 4294901760, %v10574_v11 }
 0x647   :  { %3599 = vrot.lane.b32.xlu1 %v3078_v5, %s8070_s30  ;;  %v3264_v5 = vpop.permute.xlu0 %3263 }
 0x648   :  { %v4211_v58 = vsub.f32 %v10574_v11, %v12718_v12  ;;  %v13456_v12 = vld [vmem:[#allocation80_spill] sm:$0xff] }
 0x649   :  { %v10931_v24 = vpop.permute.xlu1 %3539 }
 0x64a   :  { %13448 = vst [vmem:[#allocation17_spill] sm:$0xff] %v10931_v24  ;;  %v4212_v0 = vand.u32 4294901760, %v4211_v58  ;;  %v12721_v58 = vand.u32 4294901760, %v10590_v44 }
 0x64b   :  { %3663 = vrot.lane.b32.xlu1 %v3158_v2, %s8065_s0  ;;  %v4205_v2 = vand.u32 4294901760, %v4204_v16  ;;  %v3328_v32 = vpop.permute.xlu0 %3327  ;;  %v12720_v16 = vand.u32 4294901760, %v10581_v21 }
 0x64c   :  { %v4225_v60 = vsub.f32 %v10590_v44, %v12721_v58 }
 0x64d   :  { %v10938_v45 = vpop.permute.xlu1 %3541  ;;  %v10953_v55 = vpack.c.bf16 %v4212_v0, %v4205_v2  ;;  %v3819_v2 = vsel %vm1815_vm2, %v3230_v42, 0 }
 0x64e   :  { %13450 = vst [vmem:[#allocation72_spill] sm:$0xff] %v10938_v45  ;;  %v13453_v45 = vld [vmem:[#allocation39_spill] sm:$0xff]  ;;  %v10981_v58 = vand.u32 4294901760, %v3819_v2 }
 0x64f   :  { %3601 = vrot.lane.b32.xlu1 %v3079_v19, %s8070_s30  ;;  %v3159_v24 = vmul.f32 %v13453_v45, %v10454_v8  ;;  %v2728_v19 = vmul.f32 %v13456_v12, %v10378_v18  ;;  %v3080_v12 = vmul.f32 %v13458_v27, %v10450_v20 }
 0x650   :  { %13459 = vst [vmem:[#allocation102_spill] sm:$0xff] %v10981_v58 }
 0x651   :  { %v10949_v7 = vpop.permute.xlu1 %3543 }
 0x652   :  { %13452 = vst [vmem:[#allocation130_spill] sm:$0xff] %v10949_v7  ;;  %v13457_v7 = vld [vmem:[#allocation98_spill] sm:$0xff] }
 0x653   :  { %3665 = vrot.lane.b32.xlu1 %v3159_v24, %s8065_s0  ;;  %v2636_v45 = vmul.f32 %v13457_v7, %v13400_v37  ;;  %v4218_v24 = vsub.f32 %v10581_v21, %v12720_v16  ;;  %v4226_v7 = vand.u32 4294901760, %v4225_v60 }
 0x655   :  { %v10958_v40 = vpop.permute.xlu1 %3419  ;;  %v3693_v0 = vsel %vm1815_vm2, %v2636_v45, %v3262_v4  ;;  %v4219_v37 = vand.u32 4294901760, %v4218_v24  ;;  %v13460_v45 = vld [vmem:[#allocation45_spill] sm:$0xff] }
 0x656   :  { %13455 = vst [vmem:[#allocation32_spill] sm:$0xff] %v10958_v40  ;;  %v3160_v24 = vmul.f32 %v13460_v45, %v10461_v52 }
 0x657   :  { %3285 = vrot.lane.b32.xlu1 %v2728_v19, %s8054_s5  ;;  %v3330_v19 = vpop.permute.xlu0 %3329  ;;  %v10983_v27 = vpack.c.bf16 %v4226_v7, %v4219_v37  ;;  %v13464_v7 = vld [vmem:[#allocation91_spill] sm:$0xff] }
 0x659   :  { %v3326_v40 = vpop.permute.xlu1 %3325 }
 0x65a   :  { %v3710_v18 = vsel %vm3709_vm5, %v3693_v0, %v3326_v40 }
 0x65b   :  { %v3727_v16 = vsel %vm3726_vm6, %v3710_v18, %v10740_v29  ;;  %3603 = vrot.lane.b32.xlu1 %v3080_v12, %s8070_s30  ;;  %v10993_v18 = vsub.f32 %v3819_v2, %v10981_v58  ;;  %v13462_v29 = vld [vmem:[#allocation109_spill] sm:$0xff]  ;;  %v10999_v12 = vpop.permute.xlu0 %3267 }
 0x65c   :  { %v3744_v42 = vsel %vm3743_vm7, %v3727_v16, %v10670_v35  ;;  %v3231_v60 = vmul.f32 %v13462_v29, %v13408_v46  ;;  %v13463_v35 = vld [vmem:[#allocation85_spill] sm:$0xff] }
 0x65d   :  { %v3582_v4 = vpop.permute.xlu1 %3581  ;;  %v3761_v40 = vsel %vm3760_vm8, %v3744_v42, %v10840_v1  ;;  %13461 = vst [vmem:[#allocation49_spill] sm:$0xff] %v10993_v18  ;;  %v2637_v16 = vmul.f32 %v13463_v35, %v13410_v43  ;;  %v3081_v1 = vmul.f32 %v13464_v7, %v10454_v8  ;;  %v13467_v35 = vld [vmem:[#allocation86_spill] sm:$0xff] }
 0x65e   :  { %v3778_v0 = vsel %vm3777_vm9, %v3761_v40, %v3582_v4  ;;  %v3822_v29 = vsel %vm1815_vm2, %v3231_v60, 0  ;;  %v2638_v7 = vmul.f32 %v13467_v35, %v10254_v22  ;;  %v12726_v60 = vand.u32 4294901760, %v10652_v30  ;;  %v13471_v22 = vld [vmem:[#allocation97_spill] sm:$0xff] }
 0x65f   :  { %3667 = vrot.lane.b32.xlu1 %v3160_v24, %s8065_s0  ;;  %v3694_v42 = vsel %vm1815_vm2, %v2637_v16, %v3264_v5  ;;  %v13468_v5 = vld [vmem:[#allocation46_spill] sm:$0xff]  ;;  %v3082_v35 = vmul.f32 %v13471_v22, %v10461_v52 }
 0x660   :  { %v3711_v2 = vsel %vm3709_vm5, %v3694_v42, %v3328_v32  ;;  %v3161_v16 = vmul.f32 %v13468_v5, %v13421_v28  ;;  %v13469_v32 = vld [vmem:[#allocation75_spill] sm:$0xff]  ;;  %v11025_v42 = vand.u32 4294901760, %v3822_v29 }
 0x661   :  { %v3646_v37 = vpop.permute.xlu1 %3645 }
 0x662   :  { %v3795_v45 = vsel %vm3794_vm10, %v3778_v0, %v3646_v37  ;;  %v3232_v0 = vmul.f32 %v13469_v32, %v13419_v56  ;;  %v3728_v37 = vsel %vm3726_vm6, %v3711_v2, %v10752_v61  ;;  %13470 = vst [vmem:[#allocation33_spill] sm:$0xff] %v11025_v42  ;;  %v13472_v56 = vand.u32 4294901760, %v10993_v18 }
 0x663   :  { %v11007_v24 = vand.u32 4294901760, %v3795_v45  ;;  %3605 = vrot.lane.b32.xlu1 %v3081_v1, %s8070_s30  ;;  %v11023_v1 = vpop.permute.xlu0 %3331  ;;  %v4260_v32 = vsub.f32 %v10652_v30, %v12726_v60  ;;  %v13476_v2 = vand.u32 4294901760, %v10610_v14 }
 0x664   :  { %v3963_v5 = vsub.f32 %v10993_v18, %v13472_v56  ;;  %v3745_v56 = vsel %vm3743_vm7, %v3728_v37, %v10668_v49  ;;  %v11053_v18 = vsub.f32 %v3822_v29, %v11025_v42  ;;  %v3825_v60 = vsel %vm1815_vm2, %v3232_v0, 0 }
 0x665   :  { %13465 = vst [vmem:[#allocation104_spill] sm:$0xff] %v11007_v24  ;;  %v11013_v4 = vsub.f32 %v3795_v45, %v11007_v24  ;;  %v3266_v40 = vpop.permute.xlu1 %3265  ;;  %v12729_v45 = vand.u32 4294901760, %v10654_v25  ;;  %v4261_v24 = vand.u32 4294901760, %v4260_v32  ;;  %v12733_v49 = vand.u32 4294901760, %v10700_v6 }
 0x666   :  { %v3695_v61 = vsel %vm1815_vm2, %v2638_v7, %v3266_v40  ;;  %v13474_v40 = vld [vmem:[#allocation99_spill] sm:$0xff]  ;;  %13475 = vst [vmem:[#allocation106_spill] sm:$0xff] %v11053_v18  ;;  %v3964_v29 = vand.u32 4294901760, %v3963_v5  ;;  %v4232_v0 = vsub.f32 %v10610_v14, %v13476_v2  ;;  %v12735_v5 = vand.u32 4294901760, %v10632_v33 }
 0x667   :  { %13466 = vst [vmem:[#allocation132_spill] sm:$0xff] %v11013_v4  ;;  %3669 = vrot.lane.b32.xlu1 %v3161_v16, %s8065_s0  ;;  %v4267_v46 = vsub.f32 %v10654_v25, %v12729_v45  ;;  %v13473_v16 = vand.u32 4294901760, %v11013_v4  ;;  %v3162_v7 = vmul.f32 %v13474_v40, %v10469_v17  ;;  %v3712_v28 = vsel %vm3709_vm5, %v3695_v61, %v3330_v19  ;;  %v11060_v37 = vpop.permute.xlu0 %3333 }
 0x668   :  { %v3762_v40 = vsel %vm3760_vm8, %v3745_v56, %v10850_v13  ;;  %v13477_v61 = vand.u32 4294901760, %v10612_v41  ;;  %v4281_v13 = vsub.f32 %v10700_v6, %v12733_v49 }
 0x669   :  { %v3954_v22 = vsub.f32 %v11013_v4, %v13473_v16  ;;  %v3584_v58 = vpop.permute.xlu1 %3583  ;;  %v4268_v45 = vand.u32 4294901760, %v4267_v46  ;;  %v12734_v4 = vand.u32 4294901760, %v10698_v31 }
 0x66a   :  { %v3779_v19 = vsel %vm3777_vm9, %v3762_v40, %v3584_v58  ;;  %v4239_v32 = vsub.f32 %v10612_v41, %v13477_v61  ;;  %v12739_v58 = vand.u32 4294901760, %v10630_v10  ;;  %v13479_v40 = vld [vmem:[#allocation108_spill] sm:$0xff] }
 0x66b   :  { %3607 = vrot.lane.b32.xlu1 %v3082_v35, %s8070_s30  ;;  %v3955_v16 = vand.u32 4294901760, %v3954_v22  ;;  %v11067_v46 = vpack.c.bf16 %v4268_v45, %v4261_v24  ;;  %v4274_v22 = vsub.f32 %v10698_v31, %v12734_v4  ;;  %v3729_v24 = vsel %vm3726_vm6, %v3712_v28, %v10762_v48 }
 0x66c   :  { %v2639_v48 = vmul.f32 %v13479_v40, %v10263_v36  ;;  %v12746_v28 = vand.u32 4294901760, %v11053_v18  ;;  %v4240_v40 = vand.u32 4294901760, %v4239_v32  ;;  %v4253_v4 = vsub.f32 %v10632_v33, %v12735_v5 }
 0x66d   :  { %v3648_v35 = vpop.permute.xlu1 %3647  ;;  %3956 = vmatmul.mubr.f32.vlgmr.msra.gmra.mrb[2].mxu1 %v3955_v16  ;;  %v4275_v56 = vand.u32 4294901760, %v4274_v22  ;;  %v4282_v16 = vand.u32 4294901760, %v4281_v13  ;;  %v11103_v22 = vpop.permute.xlu0 %3271  ;;  %v4233_v13 = vand.u32 4294901760, %v4232_v0 }
 0x66e   :  { %v3796_v45 = vsel %vm3794_vm10, %v3779_v19, %v3648_v35  ;;  %3965 = vmatprep.mubr.f32.mxu1 %v3964_v29  ;;  %7301 = vmatpush1.bf16.msra.mxu1 %v10929_v63  ;;  %v11092_v29 = vand.u32 4294901760, %v3825_v60  ;;  %v3746_v35 = vsel %vm3743_vm7, %v3729_v24, %v10704_v23  ;;  %v3978_v32 = vsub.f32 %v11053_v18, %v12746_v28 }
 0x66f   :  { %v11085_v2 = vand.u32 4294901760, %v3796_v45  ;;  %3671 = vrot.lane.b32.xlu1 %v3162_v7, %s8065_s0  ;;  %7302 = vmatprep.subr.bf16.mxu1 %v13338_v26  ;;  %v13482_v7 = vld [vmem:[#allocation100_spill] sm:$0xff]  ;;  %v11101_v49 = vpack.c.bf16 %v4282_v16, %v4275_v56  ;;  %v3763_v0 = vsel %vm3760_vm8, %v3746_v35, %v10860_v51  ;;  %v4254_v35 = vand.u32 4294901760, %v4253_v4 }
 0x670   :  { %13480 = vst [vmem:[#allocation60_spill] sm:$0xff] %v11092_v29  ;;  %v2731_v61 = vmul.f32 %v13482_v7, %v13410_v43  ;;  %v13483_v43 = vld [vmem:[#allocation110_spill] sm:$0xff]  ;;  %v11125_v56 = vsub.f32 %v3825_v60, %v11092_v29 }
 0x671   :  { %13478 = vst [vmem:[#allocation57_spill] sm:$0xff] %v11085_v2  ;;  %v11095_v63 = vsub.f32 %v3796_v45, %v11085_v2  ;;  %v3586_v19 = vpop.permute.xlu1 %3585  ;;  %v4246_v45 = vsub.f32 %v10630_v10, %v12739_v58  ;;  %v3233_v24 = vmul.f32 %v13483_v43, %v13426_v62 }
 0x672   :  { %7304 = vmatpush1.bf16.msra.mxu1 %v10953_v55  ;;  %v3696_v55 = vsel %vm1815_vm2, %v2639_v48, %v10999_v12  ;;  %13484 = vst [vmem:[#allocation68_spill] sm:$0xff] %v11125_v56  ;;  %v3780_v62 = vsel %vm3777_vm9, %v3763_v0, %v3586_v19  ;;  %v7309_v48 = vpack.c.bf16 %v4240_v40, %v4233_v13  ;;  %v11141_v19 = vpop.permute.xlu0 %3335  ;;  %v3979_v0 = vand.u32 4294901760, %v3978_v32 }
 0x673   :  { %13481 = vst [vmem:[#allocation37_spill] sm:$0xff] %v11095_v63  ;;  %3291 = vrot.lane.b32.xlu1 %v2731_v61, %s8054_s5  ;;  %v12747_v23 = vand.u32 4294901760, %v11095_v63  ;;  %7305 = vmatprep.subr.bf16.mxu1 %v13338_v26  ;;  %v3713_v16 = vsel %vm3709_vm5, %v3696_v55, %v11023_v1  ;;  %v13485_v61 = vld [vmem:[#allocation101_spill] sm:$0xff]  ;;  %v4247_v60 = vand.u32 4294901760, %v4246_v45  ;;  %v12740_v32 = vand.u32 4294901760, %v10712_v57 }
 0x674   :  { %v2811_v43 = vmul.f32 %v13485_v61, %v10263_v36  ;;  %v13487_v36 = vld [vmem:[#allocation88_spill] sm:$0xff]  ;;  %v3730_v4 = vsel %vm3726_vm6, %v3713_v16, %v10772_v53  ;;  %v13489_v45 = vld [vmem:[#allocation105_spill] sm:$0xff]  ;;  %v12738_v61 = vand.u32 4294901760, %v10702_v38 }
 0x675   :  { %v3650_v7 = vpop.permute.xlu1 %3649  ;;  %v3969_v51 = vsub.f32 %v11095_v63, %v12747_v23  ;;  %v2640_v55 = vmul.f32 %v13487_v36, %v10297_v39  ;;  %v7312_v39 = vpack.c.bf16 %v4254_v35, %v4247_v60 }
 0x676   :  { %v3797_v12 = vsel %vm3794_vm10, %v3780_v62, %v3650_v7  ;;  %7307 = vmatpush1.bf16.msra.mxu1 %v10983_v27  ;;  %v12741_v62 = vand.u32 4294901760, %v11125_v56  ;;  %v3828_v27 = vsel %vm1815_vm2, %v3233_v24, 0  ;;  %v3084_v7 = vmul.f32 %v13489_v45, %v10469_v17  ;;  %v11183_v45 = vpop.permute.xlu0 %3337 }
 0x677   :  { %v11137_v5 = vand.u32 4294901760, %v3797_v12  ;;  %3355 = vrot.lane.b32.xlu1 %v2811_v43, %s8069_s20  ;;  %v3970_v1 = vand.u32 4294901760, %v3969_v51  ;;  %7308 = vmatprep.subr.bf16.mxu1 %v13338_v26  ;;  %v12737_v24 = vand.u32 4294901760, %v10714_v3  ;;  %v12736_v43 = vand.u32 4294901760, %v10719_v59 }
 0x678   :  { %v11160_v16 = vand.u32 4294901760, %v3828_v27 }
 0x679   :  { %13486 = vst [vmem:[#allocation38_spill] sm:$0xff] %v11137_v5  ;;  %v11150_v13 = vsub.f32 %v3797_v12, %v11137_v5  ;;  %v3270_v40 = vpop.permute.xlu1 %3269  ;;  %3971 = vmatmul.mubr.f32.gmra.mrb[4].mxu1 %v3970_v1  ;;  %v3993_v12 = vsub.f32 %v11125_v56, %v12741_v62  ;;  %v4309_v60 = vsub.f32 %v10719_v59, %v12736_v43 }
 0x67a   :  { %3980 = vmatprep.mubr.f32.mxu1 %v3979_v0  ;;  %7310 = vmatpush1.bf16.msra.mxu1 %v7309_v48  ;;  %13490 = vst [vmem:[#allocation73_spill] sm:$0xff] %v11160_v16  ;;  %v3697_v51 = vsel %vm1815_vm2, %v2640_v55, %v3270_v40  ;;  %v4302_v48 = vsub.f32 %v10714_v3, %v12737_v24  ;;  %v13491_v55 = vld [vmem:[#allocation76_spill] sm:$0xff] }
 0x67b   :  { %13488 = vst [vmem:[#allocation71_spill] sm:$0xff] %v11150_v13  ;;  %3611 = vrot.lane.b32.xlu1 %v3084_v7, %s8070_s30  ;;  %v12744_v53 = vand.u32 4294901760, %v11150_v13  ;;  %7311 = vmatprep.subr.bf16.mxu1 %v13338_v26  ;;  %v3747_v1 = vsel %vm3743_vm7, %v3730_v4, %v10724_v9  ;;  %v3234_v0 = vmul.f32 %v13491_v55, %v10438_v34  ;;  %v4310_v24 = vand.u32 4294901760, %v4309_v60  ;;  %v11207_v60 = vpop.permute.xlu0 %3275 }
 0x67c   :  { %v4288_v40 = vsub.f32 %v10702_v38, %v12738_v61  ;;  %v4295_v7 = vsub.f32 %v10712_v57, %v12740_v32  ;;  %v4303_v43 = vand.u32 4294901760, %v4302_v48  ;;  %v3714_v9 = vsel %vm3709_vm5, %v3697_v51, %v11060_v37 }
 0x67d   :  { %v3588_v35 = vpop.permute.xlu1 %3587  ;;  %v3984_v36 = vsub.f32 %v11150_v13, %v12744_v53  ;;  %v3764_v34 = vsel %vm3760_vm8, %v3747_v1, %v10868_v47  ;;  %v3994_v55 = vand.u32 4294901760, %v3993_v12  ;;  %v11194_v61 = vsub.f32 %v3828_v27, %v11160_v16  ;;  %v13512_v53 = vld [vmem:[#allocation69_spill] sm:$0xff]  ;;  %v13565_v13 = vld [vmem:[#allocation114_spill] sm:$0xff] }
 0x67e   :  { %7313 = vmatpush1.bf16.msra.mxu1 %v7312_v39  ;;  %v3781_v39 = vsel %vm3777_vm9, %v3764_v34, %v3588_v35  ;;  %v3831_v48 = vsel %vm1815_vm2, %v3234_v0, 0  ;;  %v4289_v32 = vand.u32 4294901760, %v4288_v40  ;;  %v7324_v62 = vpack.c.bf16 %v4310_v24, %v4303_v43  ;;  %v13496_v35 = vld [vmem:[#allocation20_spill] sm:$0xff]  ;;  %v13497_v0 = vld [vmem:[#allocation35_spill] sm:$0xff]  ;;  %v13498_v40 = vld [vmem:[#allocation90_spill] sm:$0xff] }
 0x67f   :  { %v3985_v4 = vand.u32 4294901760, %v3984_v36  ;;  %7314 = vmatprep.subr.bf16.mxu1 %v13338_v26  ;;  %13492 = vst [vmem:[#allocation42_spill] sm:$0xff] %v11194_v61  ;;  %v3731_v37 = vsel %vm3726_vm6, %v3714_v9, %v10782_v50  ;;  %v4296_v47 = vand.u32 4294901760, %v4295_v7  ;;  %v12742_v24 = vand.u32 4294901760, %v11194_v61  ;;  %v13499_v9 = vld [vmem:[#allocation27_spill] sm:$0xff] }
 0x680   :  { %v11210_v43 = vand.u32 4294901760, %v3831_v48  ;;  %v2641_v7 = vmul.f32 %v13498_v40, %v13497_v0  ;;  %v13503_v40 = vld [vmem:[#allocation138_spill] sm:$0xff] }
 0x681   :  { %v3652_v58 = vpop.permute.xlu1 %3651  ;;  %3986 = vmatmul.mubr.f32.gmra.mrb[6].mxu1 %v3985_v4  ;;  %v7321_v1 = vpack.c.bf16 %v4296_v47, %v4289_v32  ;;  %v4008_v34 = vsub.f32 %v11194_v61, %v12742_v24  ;;  %v13544_v61 = vld [vmem:[#allocation113_spill] sm:$0xff] }
 0x682   :  { %v3798_v51 = vsel %vm3794_vm10, %v3781_v39, %v3652_v58  ;;  %3995 = vmatprep.mubr.f32.mxu1 %v3994_v55  ;;  %7316 = vmatpush1.bf16.msra.mxu1 %v11067_v46  ;;  %13494 = vst [vmem:[#allocation39_spill] sm:$0xff] %v11210_v43  ;;  %v3748_v46 = vsel %vm3743_vm7, %v3731_v37, %v13496_v35  ;;  %v13501_v37 = vld [vmem:[#allocation133_spill] sm:$0xff] }
 0x683   :  { %v11204_v12 = vand.u32 4294901760, %v3798_v51  ;;  %7317 = vmatprep.subr.bf16.mxu1 %v13338_v26  ;;  %v3765_v4 = vsel %vm3760_vm8, %v3748_v46, %v13499_v9  ;;  %v11228_v55 = vsub.f32 %v3831_v48, %v11210_v43  ;;  %v3698_v35 = vsel %vm1815_vm2, %v2641_v7, %v11103_v22  ;;  %v3340_v46 = vpop.permute.xlu0 %3339 }
 0x684   :  { %v4009_v24 = vand.u32 4294901760, %v4008_v34 }
 0x685   :  { %13493 = vst [vmem:[#allocation77_spill] sm:$0xff] %v11204_v12  ;;  %v11213_v50 = vsub.f32 %v3798_v51, %v11204_v12  ;;  %v3590_v58 = vpop.permute.xlu1 %3589  ;;  %13500 = vst [vmem:[#allocation80_spill] sm:$0xff] %v11228_v55  ;;  %v13502_v51 = vld [vmem:[#allocation111_spill] sm:$0xff] }
 0x686   :  { %7319 = vmatpush1.bf16.msra.mxu1 %v11101_v49  ;;  %v3782_v49 = vsel %vm3777_vm9, %v3765_v4, %v3590_v58  ;;  %v3235_v47 = vmul.f32 %v13502_v51, %v13501_v37  ;;  %v3715_v58 = vsel %vm3709_vm5, %v3698_v35, %v11141_v19  ;;  %v12745_v37 = vand.u32 4294901760, %v11228_v55  ;;  %v13507_v51 = vld [vmem:[#allocation40_spill] sm:$0xff] }
 0x687   :  { %13495 = vst [vmem:[#allocation107_spill] sm:$0xff] %v11213_v50  ;;  %v12743_v36 = vand.u32 4294901760, %v11213_v50  ;;  %7320 = vmatprep.subr.bf16.mxu1 %v13338_v26  ;;  %v13508_v19 = vld [vmem:[#allocation92_spill] sm:$0xff] }
 0x688   :  { %v2642_v35 = vmul.f32 %v13508_v19, %v13507_v51  ;;  %v13510_v51 = vld [vmem:[#allocation47_spill] sm:$0xff]  ;;  %v13511_v19 = vld [vmem:[#allocation78_spill] sm:$0xff] }
 0x689   :  { %v3654_v32 = vpop.permute.xlu1 %3653  ;;  %v3999_v39 = vsub.f32 %v11213_v50, %v12743_v36  ;;  %v3236_v36 = vmul.f32 %v13511_v19, %v10450_v20  ;;  %v13514_v20 = vld [vmem:[#allocation3_spill] sm:$0xff] }
 0x68a   :  { %v3799_v0 = vsel %vm3794_vm10, %v3782_v49, %v3654_v32  ;;  %7322 = vmatpush1.bf16.msra.mxu1 %v7321_v1  ;;  %v3834_v1 = vsel %vm1815_vm2, %v3235_v47, 0  ;;  %v13506_v49 = vld [vmem:[#allocation24_spill] sm:$0xff]  ;;  %v4023_v47 = vsub.f32 %v11228_v55, %v12745_v37 }
 0x68b   :  { %v11243_v9 = vand.u32 4294901760, %v3799_v0  ;;  %v4000_v4 = vand.u32 4294901760, %v3999_v39  ;;  %7323 = vmatprep.subr.bf16.mxu1 %v13338_v26  ;;  %v3732_v32 = vsel %vm3726_vm6, %v3715_v58, %v13506_v49  ;;  %v11263_v58 = vand.u32 4294901760, %v3834_v1 }
 0x68c   :  { %v4024_v28 = vand.u32 4294901760, %v4023_v47 }
 0x68d   :  { %13504 = vst [vmem:[#allocation98_spill] sm:$0xff] %v11243_v9  ;;  %v11248_v22 = vsub.f32 %v3799_v0, %v11243_v9  ;;  %v3274_v7 = vpop.permute.xlu1 %3273  ;;  %4001 = vmatmul.mubr.f32.gmra.mrb[8].mxu1 %v4000_v4  ;;  %v3342_v0 = vpop.permute.xlu0 %3341  ;;  %13509 = vst [vmem:[#allocation45_spill] sm:$0xff] %v11263_v58  ;;  %v11277_v23 = vsub.f32 %v3834_v1, %v11263_v58 }
 0x68e   :  { %4010 = vmatprep.mubr.f32.mxu1 %v4009_v24  ;;  %7325 = vmatpush1.bf16.msra.mxu1 %v7324_v62  ;;  %v3699_v4 = vsel %vm1815_vm2, %v2642_v35, %v3274_v7  ;;  %v3749_v62 = vsel %vm3743_vm7, %v3732_v32, %v13510_v51 }
 0x68f   :  { %13505 = vst [vmem:[#allocation84_spill] sm:$0xff] %v11248_v22  ;;  %v12748_v39 = vand.u32 4294901760, %v11248_v22  ;;  %7326 = vmatprep.subr.bf16.mxu1 %v13338_v26  ;;  %v3716_v7 = vsel %vm3709_vm5, %v3699_v4, %v11183_v45  ;;  %v3766_v37 = vsel %vm3760_vm8, %v3749_v62, %v13512_v53  ;;  %13513 = vst [vmem:[#allocation109_spill] sm:$0xff] %v11277_v23  ;;  %v12749_v53 = vand.u32 4294901760, %v11277_v23 }
 0x690   :  { %v3733_v19 = vsel %vm3726_vm6, %v3716_v7, %v13514_v20  ;;  %v13520_v7 = vld [vmem:[#allocation93_spill] sm:$0xff] }
 0x691   :  { %v3592_v49 = vpop.permute.xlu1 %3591  ;;  %v4014_v24 = vsub.f32 %v11248_v22, %v12748_v39  ;;  %v3837_v39 = vsel %vm1815_vm2, %v3236_v36, 0  ;;  %v11281_v34 = vpop.permute.xlu0 %3279  ;;  %v4038_v20 = vsub.f32 %v11277_v23, %v12749_v53  ;;  %v13543_v22 = vld [vmem:[#allocation131_spill] sm:$0xff] }
 0x692   :  { %v3783_v32 = vsel %vm3777_vm9, %v3766_v37, %v3592_v49  ;;  %v11289_v1 = vand.u32 4294901760, %v3837_v39  ;;  %v13518_v49 = vld [vmem:[#allocation2_spill] sm:$0xff] }
 0x693   :  { %v4015_v35 = vand.u32 4294901760, %v4014_v24  ;;  %v3750_v36 = vsel %vm3743_vm7, %v3733_v19, %v13518_v49  ;;  %v13519_v24 = vld [vmem:[#allocation44_spill] sm:$0xff]  ;;  %v4039_v23 = vand.u32 4294901760, %v4038_v20 }
 0x694   :  { %13516 = vst [vmem:[#allocation91_spill] sm:$0xff] %v11289_v1 }
 0x695   :  { %v3656_v51 = vpop.permute.xlu1 %3655  ;;  %4016 = vmatmul.mubr.f32.gmra.mrb[10].mxu1 %v4015_v35  ;;  %v2643_v35 = vmul.f32 %v13520_v7, %v13519_v24  ;;  %v13523_v24 = vld [vmem:[#allocation112_spill] sm:$0xff] }
 0x696   :  { %v3800_v45 = vsel %vm3794_vm10, %v3783_v32, %v3656_v51  ;;  %4025 = vmatprep.mubr.f32.mxu1 %v4024_v28  ;;  %v11299_v32 = vpop.permute.xlu0 %3343  ;;  %v13521_v28 = vld [vmem:[#allocation9_spill] sm:$0xff]  ;;  %v3237_v7 = vmul.f32 %v13523_v24, %v10454_v8 }
 0x697   :  { %v11286_v4 = vand.u32 4294901760, %v3800_v45  ;;  %v3767_v51 = vsel %vm3760_vm8, %v3750_v36, %v13521_v28  ;;  %v3700_v36 = vsel %vm1815_vm2, %v2643_v35, %v11207_v60  ;;  %v13526_v24 = vld [vmem:[#allocation117_spill] sm:$0xff] }
 0x698   :  { %v3717_v53 = vsel %vm3709_vm5, %v3700_v36, %v3340_v46  ;;  %v3840_v8 = vsel %vm1815_vm2, %v3237_v7, 0  ;;  %v13528_v46 = vld [vmem:[#allocation95_spill] sm:$0xff] }
 0x699   :  { %13515 = vst [vmem:[#allocation85_spill] sm:$0xff] %v11286_v4  ;;  %v11292_v37 = vsub.f32 %v3800_v45, %v11286_v4  ;;  %v3594_v47 = vpop.permute.xlu1 %3593  ;;  %v11307_v45 = vsub.f32 %v3837_v39, %v11289_v1  ;;  %v3734_v60 = vsel %vm3726_vm6, %v3717_v53, %v13526_v24 }
 0x69a   :  { %v3784_v48 = vsel %vm3777_vm9, %v3767_v51, %v3594_v47  ;;  %v11328_v35 = vpop.permute.xlu0 %3345 }
 0x69b   :  { %13517 = vst [vmem:[#allocation86_spill] sm:$0xff] %v11292_v37  ;;  %v12752_v62 = vand.u32 4294901760, %v11292_v37  ;;  %13522 = vst [vmem:[#allocation46_spill] sm:$0xff] %v11307_v45  ;;  %v12753_v47 = vand.u32 4294901760, %v11307_v45 }
 0x69d   :  { %v3658_v19 = vpop.permute.xlu1 %3657  ;;  %v4029_v49 = vsub.f32 %v11292_v37, %v12752_v62  ;;  %v4053_v36 = vsub.f32 %v11307_v45, %v12753_v47  ;;  %v13532_v45 = vld [vmem:[#allocation129_spill] sm:$0xff] }
 0x69e   :  { %v3801_v28 = vsel %vm3794_vm10, %v3784_v48, %v3658_v19  ;;  %v13527_v48 = vld [vmem:[#allocation50_spill] sm:$0xff]  ;;  %v11349_v47 = vpop.permute.xlu0 %3283 }
 0x69f   :  { %v11319_v27 = vand.u32 4294901760, %v3801_v28  ;;  %v4030_v39 = vand.u32 4294901760, %v4029_v49  ;;  %v2644_v19 = vmul.f32 %v13528_v46, %v13527_v48  ;;  %v4054_v55 = vand.u32 4294901760, %v4053_v36 }
 0x6a1   :  { %13524 = vst [vmem:[#allocation75_spill] sm:$0xff] %v11319_v27  ;;  %v11323_v51 = vsub.f32 %v3801_v28, %v11319_v27  ;;  %v3278_v62 = vpop.permute.xlu1 %3277  ;;  %4031 = vmatmul.mubr.f32.gmra.mrb[12].mxu1 %v4030_v39  ;;  %v11337_v28 = vand.u32 4294901760, %v3840_v8  ;;  %v13530_v39 = vld [vmem:[#allocation56_spill] sm:$0xff] }
 0x6a2   :  { %4040 = vmatprep.mubr.f32.mxu1 %v4039_v23  ;;  %v3701_v49 = vsel %vm1815_vm2, %v2644_v19, %v3278_v62  ;;  %v3751_v53 = vsel %vm3743_vm7, %v3734_v60, %v13530_v39  ;;  %v13531_v23 = vld [vmem:[#allocation79_spill] sm:$0xff] }
 0x6a3   :  { %13525 = vst [vmem:[#allocation97_spill] sm:$0xff] %v11323_v51  ;;  %v12760_v20 = vand.u32 4294901760, %v11323_v51  ;;  %13529 = vst [vmem:[#allocation99_spill] sm:$0xff] %v11337_v28  ;;  %v3238_v48 = vmul.f32 %v13531_v23, %v10461_v52  ;;  %v3718_v46 = vsel %vm3709_vm5, %v3701_v49, %v3342_v0  ;;  %v3768_v37 = vsel %vm3760_vm8, %v3751_v53, %v13532_v45  ;;  %v13534_v23 = vld [vmem:[#allocation65_spill] sm:$0xff]  ;;  %v13538_v53 = vld [vmem:[#allocation12_spill] sm:$0xff] }
 0x6a4   :  { %v11354_v60 = vsub.f32 %v3840_v8, %v11337_v28  ;;  %v3735_v62 = vsel %vm3726_vm6, %v3718_v46, %v13534_v23  ;;  %v13540_v46 = vld [vmem:[#allocation134_spill] sm:$0xff] }
 0x6a5   :  { %v3596_v7 = vpop.permute.xlu1 %3595  ;;  %v4044_v24 = vsub.f32 %v11323_v51, %v12760_v20  ;;  %v3843_v52 = vsel %vm1815_vm2, %v3238_v48, 0  ;;  %v11373_v48 = vpop.permute.xlu0 %3347 }
 0x6a6   :  { %13533 = vst [vmem:[#allocation108_spill] sm:$0xff] %v11354_v60  ;;  %v3785_v39 = vsel %vm3777_vm9, %v3768_v37, %v3596_v7  ;;  %v12767_v8 = vand.u32 4294901760, %v11354_v60  ;;  %v11366_v36 = vand.u32 4294901760, %v3843_v52 }
 0x6a7   :  { %v4045_v19 = vand.u32 4294901760, %v4044_v24  ;;  %v3752_v24 = vsel %vm3743_vm7, %v3735_v62, %v13538_v53 }
 0x6a8   :  { %13536 = vst [vmem:[#allocation110_spill] sm:$0xff] %v11366_v36  ;;  %v4068_v45 = vsub.f32 %v11354_v60, %v12767_v8 }
 0x6a9   :  { %v3660_v20 = vpop.permute.xlu1 %3659  ;;  %4046 = vmatmul.mubr.f32.gmra.mrb[14].mxu1 %v4045_v19 }
 0x6aa   :  { %v3802_v0 = vsel %vm3794_vm10, %v3785_v39, %v3660_v20  ;;  %4055 = vmatprep.mubr.f32.mxu1 %v4054_v55  ;;  %v13539_v20 = vld [vmem:[#allocation52_spill] sm:$0xff] }
 0x6ab   :  { %v11361_v49 = vand.u32 4294901760, %v3802_v0  ;;  %v2645_v19 = vmul.f32 %v13540_v46, %v13539_v20  ;;  %v13541_v39 = vld [vmem:[#allocation128_spill] sm:$0xff]  ;;  %v3239_v20 = vmul.f32 %v13544_v61, %v13543_v22 }
 0x6ac   :  { %v3769_v23 = vsel %vm3760_vm8, %v3752_v24, %v13541_v39 }
 0x6ad   :  { %13535 = vst [vmem:[#allocation100_spill] sm:$0xff] %v11361_v49  ;;  %v11369_v37 = vsub.f32 %v3802_v0, %v11361_v49  ;;  %v3598_v7 = vpop.permute.xlu1 %3597  ;;  %v11384_v0 = vsub.f32 %v3843_v52, %v11366_v36  ;;  %v3702_v24 = vsel %vm1815_vm2, %v2645_v19, %v11281_v34  ;;  %v3846_v22 = vsel %vm1815_vm2, %v3239_v20, 0  ;;  %v13547_v34 = vld [vmem:[#allocation74_spill] sm:$0xff] }
 0x6ae   :  { %v3786_v51 = vsel %vm3777_vm9, %v3769_v23, %v3598_v7  ;;  %v3719_v39 = vsel %vm3709_vm5, %v3702_v24, %v11299_v32  ;;  %v11399_v7 = vpop.permute.xlu0 %3349  ;;  %v4069_v23 = vand.u32 4294901760, %v4068_v45  ;;  %v13548_v19 = vld [vmem:[#allocation58_spill] sm:$0xff]  ;;  %v13549_v32 = vld [vmem:[#allocation135_spill] sm:$0xff] }
 0x6af   :  { %13537 = vst [vmem:[#allocation101_spill] sm:$0xff] %v11369_v37  ;;  %v12770_v55 = vand.u32 4294901760, %v11369_v37  ;;  %13542 = vst [vmem:[#allocation88_spill] sm:$0xff] %v11384_v0  ;;  %v12773_v60 = vand.u32 4294901760, %v11384_v0 }
 0x6b1   :  { %v3662_v62 = vpop.permute.xlu1 %3661  ;;  %v4059_v53 = vsub.f32 %v11369_v37, %v12770_v55  ;;  %v4083_v24 = vsub.f32 %v11384_v0, %v12773_v60  ;;  %v13551_v37 = vld [vmem:[#allocation61_spill] sm:$0xff]  ;;  %v13553_v60 = vld [vmem:[#allocation70_spill] sm:$0xff] }
 0x6b2   :  { %v3803_v46 = vsel %vm3794_vm10, %v3786_v51, %v3662_v62  ;;  %v3736_v51 = vsel %vm3726_vm6, %v3719_v39, %v13547_v34  ;;  %v2646_v62 = vmul.f32 %v13549_v32, %v13548_v19  ;;  %v11424_v19 = vpop.permute.xlu0 %3287 }
 0x6b3   :  { %v11397_v52 = vand.u32 4294901760, %v3803_v46  ;;  %v4060_v8 = vand.u32 4294901760, %v4059_v53  ;;  %v3753_v20 = vsel %vm3743_vm7, %v3736_v51, %v13551_v37  ;;  %v4084_v37 = vand.u32 4294901760, %v4083_v24 }
 0x6b4   :  { %v3770_v0 = vsel %vm3760_vm8, %v3753_v20, %v13553_v60 }
 0x6b5   :  { %13545 = vst [vmem:[#allocation105_spill] sm:$0xff] %v11397_v52  ;;  %v11403_v55 = vsub.f32 %v3803_v46, %v11397_v52  ;;  %v3282_v61 = vpop.permute.xlu1 %3281  ;;  %4061 = vmatmul.mubr.f32.gmra.mrb[16].mxu1 %v4060_v8  ;;  %v11415_v46 = vand.u32 4294901760, %v3846_v22 }
 0x6b6   :  { %4070 = vmatprep.mubr.f32.mxu1 %v4069_v23  ;;  %v3703_v45 = vsel %vm1815_vm2, %v2646_v62, %v3282_v61  ;;  %v13552_v23 = vld [vmem:[#allocation81_spill] sm:$0xff] }
 0x6b7   :  { %13546 = vst [vmem:[#allocation76_spill] sm:$0xff] %v11403_v55  ;;  %v12776_v53 = vand.u32 4294901760, %v11403_v55  ;;  %13550 = vst [vmem:[#allocation20_spill] sm:$0xff] %v11415_v46  ;;  %v3240_v34 = vmul.f32 %v13552_v23, %v10469_v17  ;;  %v3720_v32 = vsel %vm3709_vm5, %v3703_v45, %v11328_v35  ;;  %v11433_v51 = vsub.f32 %v3846_v22, %v11415_v46  ;;  %v13555_v23 = vld [vmem:[#allocation5_spill] sm:$0xff]  ;;  %v11442_v45 = vpop.permute.xlu0 %3351 }
 0x6b8   :  { %v3737_v61 = vsel %vm3726_vm6, %v3720_v32, %v13555_v23  ;;  %v13562_v32 = vld [vmem:[#allocation94_spill] sm:$0xff] }
 0x6b9   :  { %v3600_v8 = vpop.permute.xlu1 %3599  ;;  %v4074_v39 = vsub.f32 %v11403_v55, %v12776_v53  ;;  %13554 = vst [vmem:[#allocation35_spill] sm:$0xff] %v11433_v51  ;;  %v3849_v17 = vsel %vm1815_vm2, %v3240_v34, 0  ;;  %v12785_v60 = vand.u32 4294901760, %v11433_v51  ;;  %v13560_v34 = vld [vmem:[#allocation120_spill] sm:$0xff] }
 0x6ba   :  { %v3787_v53 = vsel %vm3777_vm9, %v3770_v0, %v3600_v8  ;;  %v11445_v22 = vand.u32 4294901760, %v3849_v17  ;;  %v13559_v8 = vld [vmem:[#allocation64_spill] sm:$0xff] }
 0x6bb   :  { %v4075_v62 = vand.u32 4294901760, %v4074_v39  ;;  %v3754_v20 = vsel %vm3743_vm7, %v3737_v61, %v13559_v8  ;;  %v13564_v8 = vld [vmem:[#allocation54_spill] sm:$0xff] }
 0x6bc   :  { %13557 = vst [vmem:[#allocation27_spill] sm:$0xff] %v11445_v22  ;;  %v11461_v23 = vsub.f32 %v3849_v17, %v11445_v22 }
 0x6bd   :  { %v3664_v55 = vpop.permute.xlu1 %3663  ;;  %4076 = vmatmul.mubr.f32.gmra.mrb[18].mxu1 %v4075_v62  ;;  %v3771_v62 = vsel %vm3760_vm8, %v3754_v20, %v13562_v32 }
 0x6be   :  { %v3804_v50 = vsel %vm3794_vm10, %v3787_v53, %v3664_v55  ;;  %4085 = vmatprep.mubr.f32.mxu1 %v4084_v37  ;;  %v13561_v55 = vld [vmem:[#allocation136_spill] sm:$0xff]  ;;  %v4098_v37 = vsub.f32 %v11433_v51, %v12785_v60  ;;  %13563 = vst [vmem:[#allocation111_spill] sm:$0xff] %v11461_v23  ;;  %v13573_v18 = vand.u32 4294901760, %v11461_v23 }
 0x6bf   :  { %v11440_v35 = vand.u32 4294901760, %v3804_v50  ;;  %v2647_v53 = vmul.f32 %v13561_v55, %v13560_v34  ;;  %v3241_v34 = vmul.f32 %v13565_v13, %v13564_v8  ;;  %v3290_v55 = vpop.permute.xlu0 %3289 }
 0x6c1   :  { %13556 = vst [vmem:[#allocation90_spill] sm:$0xff] %v11440_v35  ;;  %v11448_v0 = vsub.f32 %v3804_v50, %v11440_v35  ;;  %v3602_v24 = vpop.permute.xlu1 %3601  ;;  %v3704_v20 = vsel %vm1815_vm2, %v2647_v53, %v11349_v47  ;;  %v3852_v13 = vsel %vm1815_vm2, %v3241_v34, 0  ;;  %v13568_v47 = vld [vmem:[#allocation67_spill] sm:$0xff] }
 0x6c2   :  { %v3788_v50 = vsel %vm3777_vm9, %v3771_v62, %v3602_v24  ;;  %v3721_v17 = vsel %vm3709_vm5, %v3704_v20, %v11373_v48  ;;  %v4099_v62 = vand.u32 4294901760, %v4098_v37  ;;  %v13572_v37 = vld [vmem:[#allocation96_spill] sm:$0xff]  ;;  %v11492_v34 = vand.u32 4294901760, %v3852_v13 }
 0x6c3   :  { %13558 = vst [vmem:[#allocation133_spill] sm:$0xff] %v11448_v0  ;;  %v12788_v39 = vand.u32 4294901760, %v11448_v0  ;;  %v3738_v53 = vsel %vm3726_vm6, %v3721_v17, %v13568_v47  ;;  %v3354_v51 = vpop.permute.xlu0 %3353  ;;  %v13575_v17 = vld [vmem:[#allocation63_spill] sm:$0xff] }
 0x6c4   :  { %13574 = vst [vmem:[#allocation40_spill] sm:$0xff] %v11492_v34  ;;  %v3755_v47 = vsel %vm3743_vm7, %v3738_v53, %v13575_v17  ;;  %v11508_v53 = vsub.f32 %v3852_v13, %v11492_v34  ;;  %v13583_v13 = vld [vmem:[#allocation123_spill] sm:$0xff] }
 0x6c5   :  { %v3666_v56 = vpop.permute.xlu1 %3665  ;;  %v4089_v61 = vsub.f32 %v11448_v0, %v12788_v39 }
 0x6c6   :  { %v3805_v32 = vsel %vm3794_vm10, %v3788_v50, %v3666_v56  ;;  %v13569_v56 = vld [vmem:[#allocation122_spill] sm:$0xff]  ;;  %v13570_v50 = vld [vmem:[#allocation139_spill] sm:$0xff]  ;;  %13579 = vst [vmem:[#allocation92_spill] sm:$0xff] %v11508_v53 }
 0x6c7   :  { %v11474_v60 = vand.u32 4294901760, %v3805_v32  ;;  %v4090_v24 = vand.u32 4294901760, %v4089_v61  ;;  %v2648_v8 = vmul.f32 %v13570_v50, %v13569_v56  ;;  %v13571_v61 = vld [vmem:[#allocation124_spill] sm:$0xff]  ;;  %v13576_v56 = vld [vmem:[#allocation119_spill] sm:$0xff] }
 0x6c8   :  { %v2650_v20 = vmul.f32 %v13572_v37, %v13571_v61  ;;  %v13577_v50 = vld [vmem:[#allocation83_spill] sm:$0xff] }
 0x6c9   :  { %13566 = vst [vmem:[#allocation138_spill] sm:$0xff] %v11474_v60  ;;  %v11478_v39 = vsub.f32 %v3805_v32, %v11474_v60  ;;  %v3286_v0 = vpop.permute.xlu1 %3285  ;;  %4091 = vmatmul.mubr.f32.gmra.mrb[20].mxu1 %v4090_v24  ;;  %v4113_v24 = vsub.f32 %v11461_v23, %v13573_v18  ;;  %v3242_v61 = vmul.f32 %v13577_v50, %v13576_v56  ;;  %v13578_v23 = vld [vmem:[#allocation17_spill] sm:$0xff]  ;;  %v13586_v50 = vld [vmem:[#allocation11_spill] sm:$0xff] }
 0x6ca   :  { %4100 = vmatprep.mubr.f32.mxu1 %v4099_v62  ;;  %v3705_v32 = vsel %vm1815_vm2, %v2648_v8, %v3286_v0  ;;  %v3707_v37 = vsel %vm1815_vm2, %v2650_v20, %v3290_v55  ;;  %v3772_v22 = vsel %vm3760_vm8, %v3755_v47, %v13578_v23  ;;  %v13580_v55 = vld [vmem:[#allocation87_spill] sm:$0xff]  ;;  %v13581_v20 = vld [vmem:[#allocation126_spill] sm:$0xff]  ;;  %v3610_v23 = vpop.permute.xlu0 %3609  ;;  %v13584_v47 = vld [vmem:[#allocation16_spill] sm:$0xff] }
 0x6cb   :  { %13567 = vst [vmem:[#allocation24_spill] sm:$0xff] %v11478_v39  ;;  %v12801_v48 = vand.u32 4294901760, %v11478_v39  ;;  %v3724_v0 = vsel %vm3709_vm5, %v3707_v37, %v3354_v51  ;;  %v3722_v18 = vsel %vm3709_vm5, %v3705_v32, %v11399_v7  ;;  %v4114_v60 = vand.u32 4294901760, %v4113_v24 }
 0x6cc   :  { %v3855_v56 = vsel %vm1815_vm2, %v3242_v61, 0  ;;  %v3741_v51 = vsel %vm3726_vm6, %v3724_v0, %v13580_v55  ;;  %v3739_v7 = vsel %vm3726_vm6, %v3722_v18, %v13581_v20  ;;  %v13588_v18 = vld [vmem:[#allocation25_spill] sm:$0xff] }
 0x6cd   :  { %v3604_v63 = vpop.permute.xlu1 %3603  ;;  %v4104_v62 = vsub.f32 %v11478_v39, %v12801_v48  ;;  %v3758_v61 = vsel %vm3743_vm7, %v3741_v51, %v13586_v50 }
 0x6ce   :  { %v3789_v17 = vsel %vm3777_vm9, %v3772_v22, %v3604_v63  ;;  %v12802_v63 = vand.u32 4294901760, %v11508_v53  ;;  %v11522_v22 = vand.u32 4294901760, %v3855_v56 }
 0x6cf   :  { %v4105_v8 = vand.u32 4294901760, %v4104_v62  ;;  %v2649_v62 = vmul.f32 %v13584_v47, %v13583_v13  ;;  %v13591_v47 = vld [vmem:[#allocation30_spill] sm:$0xff] }
 0x6d0   :  { %13585 = vst [vmem:[#allocation78_spill] sm:$0xff] %v11522_v22  ;;  %v3775_v51 = vsel %vm3760_vm8, %v3758_v61, %v13591_v47  ;;  %v13596_v47 = vld [vmem:[#allocation127_spill] sm:$0xff] }
 0x6d1   :  { %v3668_v48 = vpop.permute.xlu1 %3667  ;;  %4106 = vmatmul.mubr.f32.gmra.mrb[22].mxu1 %v4105_v8  ;;  %v13590_v8 = vld [vmem:[#allocation115_spill] sm:$0xff]  ;;  %v3706_v55 = vsel %vm1815_vm2, %v2649_v62, %v11424_v19 }
 0x6d2   :  { %v3806_v32 = vsel %vm3794_vm10, %v3789_v17, %v3668_v48  ;;  %4115 = vmatprep.mubr.f32.mxu1 %v4114_v60  ;;  %v3756_v60 = vsel %vm3743_vm7, %v3739_v7, %v13588_v18  ;;  %v13589_v48 = vld [vmem:[#allocation118_spill] sm:$0xff]  ;;  %v3723_v20 = vsel %vm3709_vm5, %v3706_v55, %v11442_v45  ;;  %v4128_v7 = vsub.f32 %v11508_v53, %v12802_v63  ;;  %v13595_v55 = vld [vmem:[#allocation116_spill] sm:$0xff] }
 0x6d3   :  { %v11517_v24 = vand.u32 4294901760, %v3806_v32  ;;  %v3243_v17 = vmul.f32 %v13590_v8, %v13589_v48  ;;  %v11546_v18 = vsub.f32 %v3855_v56, %v11522_v22  ;;  %v3674_v48 = vpop.permute.xlu0 %3673  ;;  %v13594_v8 = vld [vmem:[#allocation121_spill] sm:$0xff]  ;;  %v3792_v56 = vsel %vm3777_vm9, %v3775_v51, %v3610_v23 }
 0x6d4   :  { %v4129_v39 = vand.u32 4294901760, %v4128_v7  ;;  %v13602_v7 = vld [vmem:[#allocation130_spill] sm:$0xff] }
 0x6d5   :  { %13582 = vst [vmem:[#allocation47_spill] sm:$0xff] %v11517_v24  ;;  %v11527_v37 = vsub.f32 %v3806_v32, %v11517_v24  ;;  %v3606_v0 = vpop.permute.xlu1 %3605  ;;  %v13592_v32 = vld [vmem:[#allocation72_spill] sm:$0xff]  ;;  %13593 = vst [vmem:[#allocation3_spill] sm:$0xff] %v11546_v18  ;;  %v3858_v61 = vsel %vm1815_vm2, %v3243_v17, 0 }
 0x6d6   :  { %v3773_v50 = vsel %vm3760_vm8, %v3756_v60, %v13592_v32  ;;  %v3244_v60 = vmul.f32 %v13595_v55, %v13594_v8  ;;  %v3740_v32 = vsel %vm3726_vm6, %v3723_v20, %v13596_v47  ;;  %v13600_v55 = vld [vmem:[#allocation10_spill] sm:$0xff] }
 0x6d7   :  { %13587 = vst [vmem:[#allocation69_spill] sm:$0xff] %v11527_v37  ;;  %v12807_v13 = vand.u32 4294901760, %v11527_v37  ;;  %v3790_v19 = vsel %vm3777_vm9, %v3773_v50, %v3606_v0  ;;  %v3809_v50 = vsel %vm3794_vm10, %v3792_v56, %v3674_v48  ;;  %v3757_v20 = vsel %vm3743_vm7, %v3740_v32, %v13600_v55 }
 0x6d8   :  { %v3861_v23 = vsel %vm1815_vm2, %v3244_v60, 0  ;;  %v11571_v51 = vand.u32 4294901760, %v3809_v50 }
 0x6d9   :  { %v3670_v62 = vpop.permute.xlu1 %3669  ;;  %v4119_v45 = vsub.f32 %v11527_v37, %v12807_v13  ;;  %v12810_v13 = vand.u32 4294901760, %v11546_v18  ;;  %v11563_v37 = vand.u32 4294901760, %v3858_v61 }
 0x6da   :  { %v3807_v63 = vsel %vm3794_vm10, %v3790_v19, %v3670_v62  ;;  %13601 = vst [vmem:[#allocation9_spill] sm:$0xff] %v11571_v51  ;;  %v3774_v19 = vsel %vm3760_vm8, %v3757_v20, %v13602_v7  ;;  %v11590_v56 = vsub.f32 %v3809_v50, %v11571_v51 }
 0x6db   :  { %v11559_v53 = vand.u32 4294901760, %v3807_v63  ;;  %v4120_v0 = vand.u32 4294901760, %v4119_v45  ;;  %13598 = vst [vmem:[#allocation44_spill] sm:$0xff] %v11563_v37  ;;  %v11580_v62 = vsub.f32 %v3858_v61, %v11563_v37  ;;  %v11582_v45 = vand.u32 4294901760, %v3861_v23 }
 0x6dd   :  { %13597 = vst [vmem:[#allocation2_spill] sm:$0xff] %v11559_v53  ;;  %v11566_v17 = vsub.f32 %v3807_v63, %v11559_v53  ;;  %v3608_v8 = vpop.permute.xlu1 %3607  ;;  %4121 = vmatmul.mubr.f32.gmra.mrb[24].mxu1 %v4120_v0  ;;  %v4143_v63 = vsub.f32 %v11546_v18, %v12810_v13  ;;  %13603 = vst [vmem:[#allocation112_spill] sm:$0xff] %v11580_v62  ;;  %v12816_v61 = vand.u32 4294901760, %v11580_v62  ;;  %v13606_v13 = vld [vmem:[#allocation125_spill] sm:$0xff] }
 0x6de   :  { %4130 = vmatprep.mubr.f32.mxu1 %v4129_v39  ;;  %13604 = vst [vmem:[#allocation117_spill] sm:$0xff] %v11582_v45  ;;  %v3791_v47 = vsel %vm3777_vm9, %v3774_v19, %v3608_v8  ;;  %v11596_v7 = vsub.f32 %v3861_v23, %v11582_v45  ;;  %v13611_v45 = vld [vmem:[#allocation13_spill] sm:$0xff] }
 0x6df   :  { %13599 = vst [vmem:[#allocation93_spill] sm:$0xff] %v11566_v17  ;;  %v12811_v48 = vand.u32 4294901760, %v11566_v17  ;;  %v4144_v20 = vand.u32 4294901760, %v4143_v63  ;;  %v4158_v63 = vsub.f32 %v11580_v62, %v12816_v61  ;;  %v13609_v61 = vld [vmem:[#allocation4_spill] sm:$0xff] }
 0x6e1   :  { %v3672_v60 = vpop.permute.xlu1 %3671  ;;  %v4134_v39 = vsub.f32 %v11566_v17, %v12811_v48  ;;  %v12822_v48 = vand.u32 4294901760, %v11590_v56  ;;  %v4159_v62 = vand.u32 4294901760, %v4158_v63 }
 0x6e2   :  { %v3808_v32 = vsel %vm3794_vm10, %v3791_v47, %v3672_v60  ;;  %v13607_v47 = vld [vmem:[#allocation103_spill] sm:$0xff] }
 0x6e3   :  { %v11592_v0 = vand.u32 4294901760, %v3808_v32  ;;  %v4135_v55 = vand.u32 4294901760, %v4134_v39  ;;  %v2651_v60 = vmul.f32 %v13607_v47, %v13606_v13  ;;  %v13608_v13 = vld [vmem:[#allocation32_spill] sm:$0xff]  ;;  %v4164_v17 = vsub.f32 %v11590_v56, %v12822_v48 }
 0x6e5   :  { %13605 = vst [vmem:[#allocation50_spill] sm:$0xff] %v11592_v0  ;;  %v11599_v8 = vsub.f32 %v3808_v32, %v11592_v0  ;;  %v3292_v19 = vpop.permute.xlu1 %3291  ;;  %4136 = vmatmul.mubr.f32.gmra.mrb[26].mxu1 %v4135_v55 }
 0x6e6   :  { %4145 = vmatprep.mubr.f32.mxu1 %v4144_v20  ;;  %v3708_v39 = vsel %vm1815_vm2, %v2651_v60, %v3292_v19  ;;  %v13610_v19 = vand.u32 4294901760, %v11596_v7 }
 0x6e7   :  { %v12821_v50 = vand.u32 4294901760, %v11599_v8 }
 0x6e8   :  { %v4173_v60 = vsub.f32 %v11596_v7, %v13610_v19  ;;  %v13617_v19 = vpack.c.bf16 %v10574_v11, %v13503_v40 }
 0x6e9   :  { %v3356_v32 = vpop.permute.xlu1 %3355  ;;  %v4149_v55 = vsub.f32 %v11599_v8, %v12821_v50 }
 0x6ea   :  { %v3725_v20 = vsel %vm3709_vm5, %v3708_v39, %v3356_v32  ;;  %v3676_v32 = vpop.permute.xlu0 %3675 }
 0x6eb   :  { %v3742_v47 = vsel %vm3726_vm6, %v3725_v20, %v13608_v13  ;;  %v4150_v18 = vand.u32 4294901760, %v4149_v55  ;;  %v4165_v13 = vand.u32 4294901760, %v4164_v17  ;;  %v13615_v17 = vld [vmem:[#allocation102_spill] sm:$0xff] }
 0x6ec   :  { %v3759_v23 = vsel %vm3743_vm7, %v3742_v47, %v13609_v61  ;;  %v4174_v61 = vand.u32 4294901760, %v4173_v60  ;;  %v13618_v60 = vpack.c.bf16 %v10590_v44, %v10581_v21 }
 0x6ed   :  { %v3776_v50 = vsel %vm3760_vm8, %v3759_v23, %v13611_v45  ;;  %v3612_v39 = vpop.permute.xlu1 %3611  ;;  %4151 = vmatmul.mubr.f32.gmra.mrb[28].mxu1 %v4150_v18  ;;  %v13616_v23 = vpack.c.bf16 %v10548_v15, %v10546_v54 }
 0x6ee   :  { %v3793_v55 = vsel %vm3777_vm9, %v3776_v50, %v3612_v39  ;;  %4160 = vmatprep.mubr.f32.mxu1 %v4159_v62  ;;  %v13613_v62 = vld [vmem:[#allocation28_spill] sm:$0xff]  ;;  %v7336_v39 = vpack.c.bf16 %v10612_v41, %v10610_v14 }
 0x6ef   :  { %v3810_v20 = vsel %vm3794_vm10, %v3793_v55, %v3676_v32  ;;  %v13614_v50 = vld [vmem:[#allocation104_spill] sm:$0xff]  ;;  %v7339_v32 = vpack.c.bf16 %v10632_v33, %v10630_v10  ;;  %v13619_v55 = vpack.c.bf16 %v10654_v25, %v10652_v30 }
 0x6f0   :  { %v11628_v48 = vand.u32 4294901760, %v3810_v20 }
 0x6f1   :  { %4166 = vmatmul.mubr.f32.gmra.mrb[30].mxu1 %v4165_v13  ;;  %v7348_v13 = vpack.c.bf16 %v10712_v57, %v10702_v38 }
 0x6f2   :  { %13612 = vst [vmem:[#allocation95_spill] sm:$0xff] %v11628_v48  ;;  %v11631_v63 = vsub.f32 %v3810_v20, %v11628_v48  ;;  %4175 = vmatprep.mubr.f32.mxu1 %v4174_v61  ;;  %v13620_v20 = vpack.c.bf16 %v10700_v6, %v10698_v31  ;;  %v13621_v61 = vpack.c.bf16 %v10719_v59, %v10714_v3 }
 0x6f4   :  { %v12823_v47 = vand.u32 4294901760, %v11631_v63 }
 0x6f6   :  { %v4179_v18 = vsub.f32 %v11631_v63, %v12823_v47  ;;  %v13633_v47 = vld [vmem:[#allocation68_spill] sm:$0xff] }
 0x6f8   :  { %v4180_v45 = vand.u32 4294901760, %v4179_v18  ;;  %v13622_v18 = vld [vmem:[#allocation138_spill] sm:$0xff] }
 0x6fa   :  { %4181 = vmatmul.mubr.f32.gmra.mrb[32].mxu1 %v4180_v45  ;;  %v13623_v45 = vld [vmem:[#allocation27_spill] sm:$0xff] }
 0x6fb   :  { %4341 = vmatprep.mubr.f32.mxu1 %v13613_v62 }
 0x6fe   :  { %4343 = vmatmul.mubr.f32.vlgmr.msra.gmra.mrb[2].mxu1 %v13614_v50 }
 0x6ff   :  { %4348 = vmatprep.mubr.f32.mxu1 %v13615_v17  ;;  %7328 = vmatpush1.bf16.msra.mxu1 %v13616_v23  ;;  %v13624_v23 = vld [vmem:[#allocation117_spill] sm:$0xff] }
 0x700   :  { %7329 = vmatprep.subr.bf16.mxu1 %v13338_v26 }
 0x702   :  { %4350 = vmatmul.mubr.f32.gmra.mrb[4].mxu1 %v11085_v2 }
 0x703   :  { %4355 = vmatprep.mubr.f32.mxu1 %v11025_v42  ;;  %7331 = vmatpush1.bf16.msra.mxu1 %v13617_v19  ;;  %v13625_v19 = vld [vmem:[#allocation31_spill] sm:$0xff]  ;;  %v13668_v42 = vand.u32 4294901760, %v10574_v11  ;;  %v13674_v11 = vand.u32 4294901760, %v13633_v47 }
 0x704   :  { %7332 = vmatprep.subr.bf16.mxu1 %v13338_v26 }
 0x706   :  { %4357 = vmatmul.mubr.f32.gmra.mrb[6].mxu1 %v11137_v5 }
 0x707   :  { %4362 = vmatprep.mubr.f32.mxu1 %v11092_v29  ;;  %7334 = vmatpush1.bf16.msra.mxu1 %v13618_v60  ;;  %v13626_v60 = vld [vmem:[#allocation132_spill] sm:$0xff] }
 0x708   :  { %7335 = vmatprep.subr.bf16.mxu1 %v13338_v26  ;;  %v13665_v29 = vand.u32 4294901760, %v13626_v60 }
 0x70a   :  { %4364 = vmatmul.mubr.f32.gmra.mrb[8].mxu1 %v11204_v12  ;;  %v13664_v12 = vand.u32 4294901760, %v10548_v15  ;;  %v13671_v15 = vand.u32 4294901760, %v10581_v21 }
 0x70b   :  { %4369 = vmatprep.mubr.f32.mxu1 %v11160_v16  ;;  %7337 = vmatpush1.bf16.msra.mxu1 %v7336_v39  ;;  %v13627_v39 = vld [vmem:[#allocation49_spill] sm:$0xff]  ;;  %v13663_v16 = vand.u32 4294901760, %v10546_v54 }
 0x70c   :  { %7338 = vmatprep.subr.bf16.mxu1 %v13338_v26  ;;  %v13666_v5 = vand.u32 4294901760, %v13627_v39 }
 0x70e   :  { %4371 = vmatmul.mubr.f32.gmra.mrb[10].mxu1 %v11243_v9  ;;  %v13660_v9 = vld [vmem:[#allocation3_spill] sm:$0xff] }
 0x70f   :  { %4376 = vmatprep.mubr.f32.mxu1 %v11210_v43  ;;  %7340 = vmatpush1.bf16.msra.mxu1 %v7339_v32  ;;  %v13628_v32 = vld [vmem:[#allocation137_spill] sm:$0xff] }
 0x710   :  { %7341 = vmatprep.subr.bf16.mxu1 %v13338_v26  ;;  %v13659_v43 = vld [vmem:[#allocation93_spill] sm:$0xff] }
 0x712   :  { %4378 = vmatmul.mubr.f32.gmra.mrb[12].mxu1 %v11286_v4  ;;  %v13656_v4 = vld [vmem:[#allocation111_spill] sm:$0xff] }
 0x713   :  { %4383 = vmatprep.mubr.f32.mxu1 %v11263_v58  ;;  %7343 = vmatpush1.bf16.msra.mxu1 %v13619_v55  ;;  %v13629_v55 = vld [vmem:[#allocation37_spill] sm:$0xff]  ;;  %v13655_v58 = vld [vmem:[#allocation24_spill] sm:$0xff] }
 0x714   :  { %7344 = vmatprep.subr.bf16.mxu1 %v13338_v26 }
 0x716   :  { %4385 = vmatmul.mubr.f32.gmra.mrb[14].mxu1 %v11319_v27  ;;  %v13652_v27 = vld [vmem:[#allocation22_spill] sm:$0xff] }
 0x717   :  { %4390 = vmatprep.mubr.f32.mxu1 %v11289_v1  ;;  %7346 = vmatpush1.bf16.msra.mxu1 %v13620_v20  ;;  %v13630_v20 = vld [vmem:[#allocation106_spill] sm:$0xff]  ;;  %v13651_v1 = vld [vmem:[#allocation88_spill] sm:$0xff] }
 0x718   :  { %7347 = vmatprep.subr.bf16.mxu1 %v13338_v26  ;;  %v13670_v54 = vand.u32 4294901760, %v13630_v20 }
 0x71a   :  { %4392 = vmatmul.mubr.f32.gmra.mrb[16].mxu1 %v11361_v49  ;;  %v13650_v49 = vld [vmem:[#allocation76_spill] sm:$0xff] }
 0x71b   :  { %4397 = vmatprep.mubr.f32.mxu1 %v11337_v28  ;;  %7349 = vmatpush1.bf16.msra.mxu1 %v7348_v13  ;;  %v13631_v13 = vld [vmem:[#allocation18_spill] sm:$0xff]  ;;  %v13649_v28 = vld [vmem:[#allocation55_spill] sm:$0xff] }
 0x71c   :  { %7350 = vmatprep.subr.bf16.mxu1 %v13338_v26 }
 0x71e   :  { %4399 = vmatmul.mubr.f32.gmra.mrb[18].mxu1 %v11397_v52  ;;  %v13648_v52 = vld [vmem:[#allocation108_spill] sm:$0xff] }
 0x71f   :  { %4404 = vmatprep.mubr.f32.mxu1 %v11366_v36  ;;  %7352 = vmatpush1.bf16.msra.mxu1 %v13621_v61  ;;  %v13632_v61 = vld [vmem:[#allocation71_spill] sm:$0xff]  ;;  %v13647_v36 = vld [vmem:[#allocation101_spill] sm:$0xff] }
 0x720   :  { %7353 = vmatprep.subr.bf16.mxu1 %v13338_v26 }
 0x722   :  { %4406 = vmatmul.mubr.f32.gmra.mrb[20].mxu1 %v11440_v35  ;;  %v13646_v35 = vld [vmem:[#allocation7_spill] sm:$0xff] }
 0x723   :  { %4411 = vmatprep.mubr.f32.mxu1 %v11415_v46  ;;  %v13645_v46 = vld [vmem:[#allocation46_spill] sm:$0xff] }
 0x726   :  { %4413 = vmatmul.mubr.f32.gmra.mrb[22].mxu1 %v13622_v18  ;;  %v13644_v18 = vld [vmem:[#allocation97_spill] sm:$0xff] }
 0x727   :  { %4418 = vmatprep.mubr.f32.mxu1 %v13623_v45  ;;  %v13643_v45 = vld [vmem:[#allocation21_spill] sm:$0xff] }
 0x72a   :  { %4420 = vmatmul.mubr.f32.gmra.mrb[24].mxu1 %v11517_v24  ;;  %v13642_v24 = vld [vmem:[#allocation109_spill] sm:$0xff] }
 0x72b   :  { %4425 = vmatprep.mubr.f32.mxu1 %v11492_v34  ;;  %v13641_v34 = vld [vmem:[#allocation86_spill] sm:$0xff] }
 0x72e   :  { %4427 = vmatmul.mubr.f32.gmra.mrb[26].mxu1 %v11559_v53  ;;  %v13640_v53 = vld [vmem:[#allocation48_spill] sm:$0xff] }
 0x72f   :  { %4432 = vmatprep.mubr.f32.mxu1 %v11522_v22  ;;  %v13639_v22 = vld [vmem:[#allocation80_spill] sm:$0xff] }
 0x732   :  { %4434 = vmatmul.mubr.f32.gmra.mrb[28].mxu1 %v11592_v0  ;;  %v13638_v0 = vld [vmem:[#allocation84_spill] sm:$0xff] }
 0x733   :  { %4439 = vmatprep.mubr.f32.mxu1 %v11563_v37  ;;  %v13637_v37 = vld [vmem:[#allocation89_spill] sm:$0xff] }
 0x736   :  { %4441 = vmatmul.mubr.f32.gmra.mrb[30].mxu1 %v11571_v51  ;;  %v13636_v51 = vld [vmem:[#allocation42_spill] sm:$0xff] }
 0x737   :  { %4446 = vmatprep.mubr.f32.mxu1 %v13624_v23  ;;  %v13635_v23 = vld [vmem:[#allocation107_spill] sm:$0xff] }
 0x738   :  { %v13677_v21 = vand.u32 4294901760, %v13635_v23 }
 0x73a   :  { %4448 = vmatmul.mubr.f32.gmra.mrb[32].mxu1 %v11628_v48  ;;  %v13634_v48 = vld [vmem:[#allocation82_spill] sm:$0xff] }
 0x73b   :  { %4555 = vmatprep.mubr.f32.mxu1 %v13625_v19 }
 0x73e   :  { %4558 = vmatmul.mubr.f32.vlgmr.msra.gmra.mrb[2].mxu1 %v13626_v60 }
 0x73f   :  { %4564 = vmatprep.mubr.f32.mxu1 %v13627_v39  ;;  %7355 = vmatpush1.bf16.msra.mxu1 %v13628_v32 }
 0x740   :  { %7356 = vmatprep.subr.bf16.mxu1 %v13338_v26 }
 0x742   :  { %4567 = vmatmul.mubr.f32.gmra.mrb[4].mxu1 %v13629_v55 }
 0x743   :  { %4573 = vmatprep.mubr.f32.mxu1 %v13630_v20  ;;  %7358 = vmatpush1.bf16.msra.mxu1 %v13631_v13  ;;  %v13667_v13 = vand.u32 4294901760, %v13503_v40  ;;  %v13705_v20 = vand.u32 4294901760, %v13659_v43 }
 0x744   :  { %7359 = vmatprep.subr.bf16.mxu1 %v13338_v26 }
 0x745   :  { %v7384_v2 = vpack.c.bf16 %v13668_v42, %v13667_v13  ;;  %v13675_v42 = vand.u32 4294901760, %v10610_v14  ;;  %v13681_v14 = vand.u32 4294901760, %v13638_v0  ;;  %v13720_v13 = vld [vmem:[#allocation89_spill] sm:$0xff] }
 0x746   :  { %4576 = vmatmul.mubr.f32.gmra.mrb[6].mxu1 %v13632_v61 }
 0x747   :  { %4582 = vmatprep.mubr.f32.mxu1 %v13633_v47  ;;  %7361 = vmatpush1.bf16.msra.mxu1 %v13634_v48  ;;  %v7381_v48 = vpack.c.bf16 %v13664_v12, %v13663_v16  ;;  %v13673_v16 = vand.u32 4294901760, %v13632_v61  ;;  %v13676_v12 = vand.u32 4294901760, %v10612_v41  ;;  %v13682_v41 = vand.u32 4294901760, %v13639_v22  ;;  %v13721_v61 = vld [vmem:[#allocation98_spill] sm:$0xff] }
 0x748   :  { %7362 = vmatprep.subr.bf16.mxu1 %v13338_v26 }
 0x749   :  { %v7390_v40 = vpack.c.bf16 %v13676_v12, %v13675_v42  ;;  %v13729_v42 = vld [vmem:[#allocation7_spill] sm:$0xff]  ;;  %v13730_v12 = vld [vmem:[#allocation100_spill] sm:$0xff] }
 0x74a   :  { %4585 = vmatmul.mubr.f32.gmra.mrb[8].mxu1 %v13635_v23  ;;  %v13683_v23 = vand.u32 4294901760, %v10652_v30  ;;  %v13689_v30 = vand.u32 4294901760, %v13644_v18 }
 0x74b   :  { %4591 = vmatprep.mubr.f32.mxu1 %v13636_v51  ;;  %7364 = vmatpush1.bf16.msra.mxu1 %v13637_v37  ;;  %v13662_v37 = vand.u32 4294901760, %v13625_v19 }
 0x74c   :  { %7365 = vmatprep.subr.bf16.mxu1 %v13338_v26 }
 0x74e   :  { %4594 = vmatmul.mubr.f32.gmra.mrb[10].mxu1 %v13638_v0  ;;  %v13687_v0 = vand.u32 4294901760, %v10698_v31  ;;  %v13693_v31 = vand.u32 4294901760, %v13647_v36 }
 0x74f   :  { %4600 = vmatprep.mubr.f32.mxu1 %v13639_v22  ;;  %7367 = vmatpush1.bf16.msra.mxu1 %v13640_v53  ;;  %v13657_v53 = vld [vmem:[#allocation69_spill] sm:$0xff]  ;;  %v13688_v22 = vand.u32 4294901760, %v10700_v6  ;;  %v13694_v6 = vand.u32 4294901760, %v13648_v52 }
 0x750   :  { %7368 = vmatprep.subr.bf16.mxu1 %v13338_v26 }
 0x751   :  { %v7399_v60 = vpack.c.bf16 %v13688_v22, %v13687_v0  ;;  %v13744_v0 = vld [vmem:[#allocation50_spill] sm:$0xff]  ;;  %v13745_v22 = vld [vmem:[#allocation44_spill] sm:$0xff] }
 0x752   :  { %4603 = vmatmul.mubr.f32.gmra.mrb[12].mxu1 %v13641_v34 }
 0x753   :  { %4609 = vmatprep.mubr.f32.mxu1 %v13642_v24  ;;  %7370 = vmatpush1.bf16.msra.mxu1 %v13643_v45  ;;  %v13653_v45 = vld [vmem:[#allocation133_spill] sm:$0xff] }
 0x754   :  { %7371 = vmatprep.subr.bf16.mxu1 %v13338_v26 }
 0x756   :  { %4612 = vmatmul.mubr.f32.gmra.mrb[14].mxu1 %v13644_v18  ;;  %v13695_v18 = vand.u32 4294901760, %v10714_v3  ;;  %v13701_v3 = vand.u32 4294901760, %v13655_v58 }
 0x757   :  { %4618 = vmatprep.mubr.f32.mxu1 %v13645_v46  ;;  %7373 = vmatpush1.bf16.msra.mxu1 %v13646_v35  ;;  %v13654_v35 = vld [vmem:[#allocation35_spill] sm:$0xff] }
 0x758   :  { %7374 = vmatprep.subr.bf16.mxu1 %v13338_v26 }
 0x75a   :  { %4621 = vmatmul.mubr.f32.gmra.mrb[16].mxu1 %v13647_v36  ;;  %v13699_v36 = vand.u32 4294901760, %v13653_v45 }
 0x75b   :  { %4627 = vmatprep.mubr.f32.mxu1 %v13648_v52  ;;  %7376 = vmatpush1.bf16.msra.mxu1 %v13649_v28  ;;  %v13658_v28 = vld [vmem:[#allocation92_spill] sm:$0xff]  ;;  %v13700_v52 = vand.u32 4294901760, %v13654_v35 }
 0x75c   :  { %7377 = vmatprep.subr.bf16.mxu1 %v13338_v26 }
 0x75e   :  { %4630 = vmatmul.mubr.f32.gmra.mrb[18].mxu1 %v13650_v49 }
 0x75f   :  { %4636 = vmatprep.mubr.f32.mxu1 %v13651_v1  ;;  %7379 = vmatpush1.bf16.msra.mxu1 %v13652_v27  ;;  %v13661_v27 = vld [vmem:[#allocation112_spill] sm:$0xff] }
 0x760   :  { %7380 = vmatprep.subr.bf16.mxu1 %v13338_v26 }
 0x762   :  { %4639 = vmatmul.mubr.f32.gmra.mrb[20].mxu1 %v13653_v45  ;;  %v13706_v45 = vand.u32 4294901760, %v13660_v9 }
 0x763   :  { %4645 = vmatprep.mubr.f32.mxu1 %v13654_v35  ;;  %v13707_v35 = vand.u32 4294901760, %v11599_v8 }
 0x766   :  { %4648 = vmatmul.mubr.f32.gmra.mrb[22].mxu1 %v13655_v58  ;;  %v13708_v58 = vand.u32 4294901760, %v13661_v27 }
 0x767   :  { %4654 = vmatprep.mubr.f32.mxu1 %v13656_v4 }
 0x76a   :  { %4657 = vmatmul.mubr.f32.gmra.mrb[24].mxu1 %v13657_v53 }
 0x76b   :  { %4663 = vmatprep.mubr.f32.mxu1 %v13658_v28 }
 0x76e   :  { %4666 = vmatmul.mubr.f32.gmra.mrb[26].mxu1 %v13659_v43  ;;  %v13713_v43 = vld [vmem:[#allocation33_spill] sm:$0xff] }
 0x76f   :  { %4672 = vmatprep.mubr.f32.mxu1 %v13660_v9  ;;  %v13714_v9 = vld [vmem:[#allocation18_spill] sm:$0xff] }
 0x772   :  { %4675 = vmatmul.mubr.f32.gmra.mrb[28].mxu1 %v11599_v8  ;;  %v13717_v8 = vld [vmem:[#allocation82_spill] sm:$0xff] }
 0x773   :  { %4681 = vmatprep.mubr.f32.mxu1 %v13661_v27  ;;  %v13712_v27 = vld [vmem:[#allocation57_spill] sm:$0xff] }
 0x776   :  { %4684 = vmatmul.mubr.f32.gmra.mrb[30].mxu1 %v11590_v56 }
 0x777   :  { %4690 = vmatprep.mubr.f32.mxu1 %v11596_v7 }
 0x77a   :  { %4693 = vmatmul.mubr.f32.gmra.mrb[32].mxu1 %v11631_v63 }
 0x77b   :  { %4783 = vmatprep.mubr.f32.mxu1 %v13662_v37  ;;  %v13669_v37 = vand.u32 4294901760, %v13629_v55 }
 0x77e   :  { %4787 = vmatmul.mubr.f32.vlgmr.msra.gmra.mrb[2].mxu1 %v13665_v29  ;;  %v13672_v29 = vand.u32 4294901760, %v10590_v44  ;;  %v13678_v44 = vand.u32 4294901760, %v13636_v51  ;;  %v13684_v51 = vand.u32 4294901760, %v10654_v25  ;;  %v13690_v25 = vand.u32 4294901760, %v13645_v46 }
 0x77f   :  { %4794 = vmatprep.mubr.f32.mxu1 %v13666_v5  ;;  %7382 = vmatpush1.bf16.msra.mxu1 %v7381_v48  ;;  %v13680_v48 = vand.u32 4294901760, %v10632_v33  ;;  %v13686_v33 = vand.u32 4294901760, %v13642_v24  ;;  %v13692_v24 = vand.u32 4294901760, %v10712_v57  ;;  %v13696_v46 = vand.u32 4294901760, %v10719_v59 }
 0x780   :  { %7383 = vmatprep.subr.bf16.mxu1 %v13338_v26  ;;  %v7387_v5 = vpack.c.bf16 %v13672_v29, %v13671_v15  ;;  %v7396_v19 = vpack.c.bf16 %v13684_v51, %v13683_v23  ;;  %v13698_v57 = vand.u32 4294901760, %v13651_v1  ;;  %v13702_v59 = vand.u32 4294901760, %v13656_v4  ;;  %v13724_v15 = vld [vmem:[#allocation85_spill] sm:$0xff]  ;;  %v13739_v23 = vld [vmem:[#allocation27_spill] sm:$0xff] }
 0x781   :  { %v7405_v55 = vpack.c.bf16 %v13696_v46, %v13695_v18  ;;  %v13704_v1 = vand.u32 4294901760, %v13658_v28  ;;  %v13709_v4 = vand.u32 4294901760, %v11590_v56  ;;  %v13711_v28 = vand.u32 4294901760, %v11631_v63  ;;  %v13715_v56 = vld [vmem:[#allocation38_spill] sm:$0xff]  ;;  %v13718_v63 = vld [vmem:[#allocation77_spill] sm:$0xff]  ;;  %v13740_v51 = vld [vmem:[#allocation47_spill] sm:$0xff] }
 0x782   :  { %4798 = vmatmul.mubr.f32.gmra.mrb[4].mxu1 %v13669_v37  ;;  %v13722_v37 = vld [vmem:[#allocation39_spill] sm:$0xff]  ;;  %v13725_v29 = vld [vmem:[#allocation45_spill] sm:$0xff] }
 0x783   :  { %4805 = vmatprep.mubr.f32.mxu1 %v13670_v54  ;;  %7385 = vmatpush1.bf16.msra.mxu1 %v7384_v2  ;;  %v13679_v2 = vand.u32 4294901760, %v10630_v10  ;;  %v13685_v10 = vand.u32 4294901760, %v13641_v34  ;;  %v13691_v34 = vand.u32 4294901760, %v10702_v38  ;;  %v13697_v38 = vand.u32 4294901760, %v13650_v49  ;;  %v13723_v54 = vld [vmem:[#allocation48_spill] sm:$0xff] }
 0x784   :  { %7386 = vmatprep.subr.bf16.mxu1 %v13338_v26  ;;  %v13703_v49 = vand.u32 4294901760, %v13657_v53  ;;  %v13710_v53 = vand.u32 4294901760, %v11596_v7  ;;  %v13716_v7 = vld [vmem:[#allocation60_spill] sm:$0xff] }
 0x785   :  { %v7393_v47 = vpack.c.bf16 %v13680_v48, %v13679_v2  ;;  %v7402_v39 = vpack.c.bf16 %v13692_v24, %v13691_v34  ;;  %v13734_v2 = vld [vmem:[#allocation110_spill] sm:$0xff] }
 0x786   :  { %4809 = vmatmul.mubr.f32.gmra.mrb[6].mxu1 %v13673_v16  ;;  %v13727_v16 = vld [vmem:[#allocation75_spill] sm:$0xff]  ;;  %v13735_v48 = vld [vmem:[#allocation22_spill] sm:$0xff] }
 0x787   :  { %4816 = vmatprep.mubr.f32.mxu1 %v13674_v11  ;;  %7388 = vmatpush1.bf16.msra.mxu1 %v7387_v5  ;;  %v13726_v5 = vld [vmem:[#allocation21_spill] sm:$0xff]  ;;  %v13728_v11 = vld [vmem:[#allocation91_spill] sm:$0xff] }
 0x788   :  { %7389 = vmatprep.subr.bf16.mxu1 %v13338_v26 }
 0x78a   :  { %4820 = vmatmul.mubr.f32.gmra.mrb[8].mxu1 %v13677_v21  ;;  %v13732_v21 = vld [vmem:[#allocation55_spill] sm:$0xff] }
 0x78b   :  { %4827 = vmatprep.mubr.f32.mxu1 %v13678_v44  ;;  %7391 = vmatpush1.bf16.msra.mxu1 %v7390_v40  ;;  %v13731_v40 = vld [vmem:[#allocation99_spill] sm:$0xff]  ;;  %v13733_v44 = vld [vmem:[#allocation105_spill] sm:$0xff] }
 0x78c   :  { %7392 = vmatprep.subr.bf16.mxu1 %v13338_v26 }
 0x78e   :  { %4831 = vmatmul.mubr.f32.gmra.mrb[10].mxu1 %v13681_v14  ;;  %v13737_v14 = vld [vmem:[#allocation20_spill] sm:$0xff] }
 0x78f   :  { %4838 = vmatprep.mubr.f32.mxu1 %v13682_v41  ;;  %7394 = vmatpush1.bf16.msra.mxu1 %v7393_v47  ;;  %v13736_v47 = vld [vmem:[#allocation90_spill] sm:$0xff] }
 0x790   :  { %7395 = vmatprep.subr.bf16.mxu1 %v13338_v26  ;;  %v13738_v41 = vld [vmem:[#allocation138_spill] sm:$0xff] }
 0x792   :  { %4842 = vmatmul.mubr.f32.gmra.mrb[12].mxu1 %v13685_v10  ;;  %v13742_v10 = vld [vmem:[#allocation2_spill] sm:$0xff] }
 0x793   :  { %4849 = vmatprep.mubr.f32.mxu1 %v13686_v33  ;;  %7397 = vmatpush1.bf16.msra.mxu1 %v7396_v19  ;;  %v13741_v19 = vld [vmem:[#allocation40_spill] sm:$0xff]  ;;  %v13743_v33 = vld [vmem:[#allocation78_spill] sm:$0xff] }
 0x794   :  { %7398 = vmatprep.subr.bf16.mxu1 %v13338_v26 }
 0x796   :  { %4853 = vmatmul.mubr.f32.gmra.mrb[14].mxu1 %v13689_v30  ;;  %v13747_v30 = vld [vmem:[#allocation117_spill] sm:$0xff] }
 0x797   :  { %4860 = vmatprep.mubr.f32.mxu1 %v13690_v25  ;;  %7400 = vmatpush1.bf16.msra.mxu1 %v7399_v60  ;;  %v13746_v60 = vld [vmem:[#allocation9_spill] sm:$0xff]  ;;  %v13748_v25 = vld [vmem:[#allocation95_spill] sm:$0xff] }
 0x798   :  { %7401 = vmatprep.subr.bf16.mxu1 %v13338_v26 }
 0x79a   :  { %4864 = vmatmul.mubr.f32.gmra.mrb[16].mxu1 %v13693_v31 }
 0x79b   :  { %4871 = vmatprep.mubr.f32.mxu1 %v13694_v6  ;;  %7403 = vmatpush1.bf16.msra.mxu1 %v7402_v39 }
 0x79c   :  { %7404 = vmatprep.subr.bf16.mxu1 %v13338_v26 }
 0x79e   :  { %4875 = vmatmul.mubr.f32.gmra.mrb[18].mxu1 %v13697_v38 }
 0x79f   :  { %4882 = vmatprep.mubr.f32.mxu1 %v13698_v57  ;;  %7406 = vmatpush1.bf16.msra.mxu1 %v7405_v55 }
 0x7a0   :  { %7407 = vmatprep.subr.bf16.mxu1 %v13338_v26 }
 0x7a2   :  { %4886 = vmatmul.mubr.f32.gmra.mrb[20].mxu1 %v13699_v36 }
 0x7a3   :  { %4893 = vmatprep.mubr.f32.mxu1 %v13700_v52 }
 0x7a6   :  { %4897 = vmatmul.mubr.f32.gmra.mrb[22].mxu1 %v13701_v3 }
 0x7a7   :  { %4904 = vmatprep.mubr.f32.mxu1 %v13702_v59 }
 0x7aa   :  { %4908 = vmatmul.mubr.f32.gmra.mrb[24].mxu1 %v13703_v49 }
 0x7ab   :  { %4915 = vmatprep.mubr.f32.mxu1 %v13704_v1 }
 0x7ae   :  { %4919 = vmatmul.mubr.f32.gmra.mrb[26].mxu1 %v13705_v20 }
 0x7af   :  { %4926 = vmatprep.mubr.f32.mxu1 %v13706_v45 }
 0x7b2   :  { %4930 = vmatmul.mubr.f32.gmra.mrb[28].mxu1 %v13707_v35 }
 0x7b3   :  { %4937 = vmatprep.mubr.f32.mxu1 %v13708_v58 }
 0x7b6   :  { %4941 = vmatmul.mubr.f32.gmra.mrb[30].mxu1 %v13709_v4 }
 0x7b7   :  { %4948 = vmatprep.mubr.f32.mxu1 %v13710_v53 }
 0x7ba   :  { %4952 = vmatmul.mubr.f32.gmra.mrb[32].mxu1 %v13711_v28 }
 0x7bb   :  { %5076 = vmatprep.mubr.f32.mxu1 %v13613_v62 }
 0x7be   :  { %5078 = vmatmul.mubr.f32.vlgmr.msra.gmra.mrb[2].mxu1 %v13614_v50 }
 0x7bf   :  { %5083 = vmatprep.mubr.f32.mxu1 %v13615_v17  ;;  %7409 = vmatpush1.bf16.msra.mxu1 %v13628_v32  ;;  %v13719_v32 = vld [vmem:[#allocation73_spill] sm:$0xff] }
 0x7c0   :  { %7410 = vmatprep.subr.bf16.mxu1 %v13338_v26 }
 0x7c2   :  { %5085 = vmatmul.mubr.f32.gmra.mrb[4].mxu1 %v13712_v27 }
 0x7c3   :  { %5090 = vmatprep.mubr.f32.mxu1 %v13713_v43  ;;  %7412 = vmatpush1.bf16.msra.mxu1 %v13714_v9 }
 0x7c4   :  { %7413 = vmatprep.subr.bf16.mxu1 %v13338_v26 }
 0x7c6   :  { %5092 = vmatmul.mubr.f32.gmra.mrb[6].mxu1 %v13715_v56 }
 0x7c7   :  { %5097 = vmatprep.mubr.f32.mxu1 %v13716_v7  ;;  %7415 = vmatpush1.bf16.msra.mxu1 %v13717_v8 }
 0x7c8   :  { %7416 = vmatprep.subr.bf16.mxu1 %v13338_v26 }
 0x7ca   :  { %5099 = vmatmul.mubr.f32.gmra.mrb[8].mxu1 %v13718_v63 }
 0x7cb   :  { %5104 = vmatprep.mubr.f32.mxu1 %v13719_v32  ;;  %7418 = vmatpush1.bf16.msra.mxu1 %v13720_v13 }
 0x7cc   :  { %7419 = vmatprep.subr.bf16.mxu1 %v13338_v26 }
 0x7ce   :  { %5106 = vmatmul.mubr.f32.gmra.mrb[10].mxu1 %v13721_v61 }
 0x7cf   :  { %5111 = vmatprep.mubr.f32.mxu1 %v13722_v37  ;;  %7421 = vmatpush1.bf16.msra.mxu1 %v13723_v54 }
 0x7d0   :  { %7422 = vmatprep.subr.bf16.mxu1 %v13338_v26 }
 0x7d2   :  { %5113 = vmatmul.mubr.f32.gmra.mrb[12].mxu1 %v13724_v15 }
 0x7d3   :  { %5118 = vmatprep.mubr.f32.mxu1 %v13725_v29  ;;  %7424 = vmatpush1.bf16.msra.mxu1 %v13726_v5 }
 0x7d4   :  { %7425 = vmatprep.subr.bf16.mxu1 %v13338_v26 }
 0x7d6   :  { %5120 = vmatmul.mubr.f32.gmra.mrb[14].mxu1 %v13727_v16 }
 0x7d7   :  { %5125 = vmatprep.mubr.f32.mxu1 %v13728_v11  ;;  %7427 = vmatpush1.bf16.msra.mxu1 %v13729_v42 }
 0x7d8   :  { %7428 = vmatprep.subr.bf16.mxu1 %v13338_v26 }
 0x7da   :  { %5127 = vmatmul.mubr.f32.gmra.mrb[16].mxu1 %v13730_v12 }
 0x7db   :  { %5132 = vmatprep.mubr.f32.mxu1 %v13731_v40  ;;  %7430 = vmatpush1.bf16.msra.mxu1 %v13732_v21 }
 0x7dc   :  { %7431 = vmatprep.subr.bf16.mxu1 %v13338_v26 }
 0x7de   :  { %5134 = vmatmul.mubr.f32.gmra.mrb[18].mxu1 %v13733_v44 }
 0x7df   :  { %5139 = vmatprep.mubr.f32.mxu1 %v13734_v2  ;;  %7433 = vmatpush1.bf16.msra.mxu1 %v13735_v48 }
 0x7e2   :  { %5141 = vmatmul.mubr.f32.gmra.mrb[20].mxu1 %v13736_v47 }
 0x7e3   :  { %5146 = vmatprep.mubr.f32.mxu1 %v13737_v14 }
 0x7e6   :  { %5148 = vmatmul.mubr.f32.gmra.mrb[22].mxu1 %v13738_v41 }
 0x7e7   :  { %5153 = vmatprep.mubr.f32.mxu1 %v13739_v23 }
 0x7ea   :  { %5155 = vmatmul.mubr.f32.gmra.mrb[24].mxu1 %v13740_v51 }
 0x7eb   :  { %5160 = vmatprep.mubr.f32.mxu1 %v13741_v19 }
 0x7ee   :  { %5162 = vmatmul.mubr.f32.gmra.mrb[26].mxu1 %v13742_v10 }
 0x7ef   :  { %5167 = vmatprep.mubr.f32.mxu1 %v13743_v33 }
 0x7f2   :  { %5169 = vmatmul.mubr.f32.gmra.mrb[28].mxu1 %v13744_v0 }
 0x7f3   :  { %5174 = vmatprep.mubr.f32.mxu1 %v13745_v22 }
 0x7f6   :  { %5176 = vmatmul.mubr.f32.gmra.mrb[30].mxu1 %v13746_v60 }
 0x7f7   :  { %5181 = vmatprep.mubr.f32.mxu1 %v13747_v30 }
 0x7fa   :  { %5183 = vmatmul.mubr.f32.gmra.mrb[32].mxu1 %v13748_v25 }
 0x7fb   :  { %5271 = vmatprep.mubr.f32.mxu1 %v13613_v62  ;;  %v13749_v62 = vld [vmem:[#allocation8_spill] sm:$0xff] }
 0x7fe   :  { %5273 = vmatmul.mubr.f32.vlgmr.msra.gmra.mrb[2].mxu1 %v13614_v50  ;;  %v3813_v50 = vsub.s32 3, %v13749_v62 }
 0x7ff   :  { %5278 = vmatprep.mubr.f32.mxu1 %v13615_v17  ;;  %v11946_v17 = vld [vmem:[%s12439_s1 + $0x138] sm:$0xff] }
 0x800   :  { %v11949_v34 = vrot.slane %v11946_v17, %v3813_v50 }
 0x802   :  { %5280 = vmatmul.mubr.f32.gmra.mrb[4].mxu1 %v13712_v27 }
 0x803   :  { %5285 = vmatprep.mubr.f32.mxu1 %v13713_v43 }
 0x806   :  { %5287 = vmatmul.mubr.f32.gmra.mrb[6].mxu1 %v13715_v56 }
 0x807   :  { %5292 = vmatprep.mubr.f32.mxu1 %v13716_v7 }
 0x80a   :  { %5294 = vmatmul.mubr.f32.gmra.mrb[8].mxu1 %v13718_v63 }
 0x80b   :  { %5299 = vmatprep.mubr.f32.mxu1 %v13719_v32 }
 0x80e   :  { %5301 = vmatmul.mubr.f32.gmra.mrb[10].mxu1 %v13721_v61 }
 0x80f   :  { %5306 = vmatprep.mubr.f32.mxu1 %v13722_v37 }
 0x812   :  { %5308 = vmatmul.mubr.f32.gmra.mrb[12].mxu1 %v13724_v15 }
 0x813   :  { %5313 = vmatprep.mubr.f32.mxu1 %v13725_v29 }
 0x816   :  { %5315 = vmatmul.mubr.f32.gmra.mrb[14].mxu1 %v13727_v16 }
 0x817   :  { %5320 = vmatprep.mubr.f32.mxu1 %v13728_v11 }
 0x81a   :  { %5322 = vmatmul.mubr.f32.gmra.mrb[16].mxu1 %v13730_v12 }
 0x81b   :  { %5327 = vmatprep.mubr.f32.mxu1 %v13731_v40 }
 0x81e   :  { %5329 = vmatmul.mubr.f32.gmra.mrb[18].mxu1 %v13733_v44 }
 0x81f   :  { %5334 = vmatprep.mubr.f32.mxu1 %v13734_v2 }
 0x822   :  { %5336 = vmatmul.mubr.f32.gmra.mrb[20].mxu1 %v13736_v47 }
 0x823   :  { %5341 = vmatprep.mubr.f32.mxu1 %v13737_v14 }
 0x826   :  { %5343 = vmatmul.mubr.f32.gmra.mrb[22].mxu1 %v13738_v41 }
 0x827   :  { %5348 = vmatprep.mubr.f32.mxu1 %v13739_v23 }
 0x82a   :  { %5350 = vmatmul.mubr.f32.gmra.mrb[24].mxu1 %v13740_v51 }
 0x82b   :  { %5355 = vmatprep.mubr.f32.mxu1 %v13741_v19 }
 0x82e   :  { %5357 = vmatmul.mubr.f32.gmra.mrb[26].mxu1 %v13742_v10 }
 0x82f   :  { %5362 = vmatprep.mubr.f32.mxu1 %v13743_v33 }
 0x832   :  { %5364 = vmatmul.mubr.f32.gmra.mrb[28].mxu1 %v13744_v0 }
 0x833   :  { %5369 = vmatprep.mubr.f32.mxu1 %v13745_v22 }
 0x836   :  { %5371 = vmatmul.mubr.f32.gmra.mrb[30].mxu1 %v13746_v60 }
 0x837   :  { %5376 = vmatprep.mubr.f32.mxu1 %v13747_v30 }
 0x83a   :  { %5378 = vmatmul.mubr.f32.gmra.mrb[32].mxu1 %v13748_v25 }
 0x8d1   :  { %v5274_v24 = vpop.f32.mrb[2].mxu1 }
 0x8d2   :  { %v11952_v39 = vadd.f32 %v5274_v24, %v11949_v34  ;;  %v5276_v31 = vpop.f32.mrb[3].mxu1 }
 0x8d4   :  { %v5383_v6 = vmul.f32 %v11952_v39, %v11952_v39 }
 0x8d5   :  { %v5281_v18 = vpop.f32.mrb[4].mxu1 }
 0x8d6   :  { %v11957_v46 = vadd.f32 %v5281_v18, %v11949_v34  ;;  %v5283_v55 = vpop.f32.mrb[5].mxu1  ;;  %5415 = vrot.lane.b32.xlu1 %v5383_v6, %s8054_s5 }
 0x8d8   :  { %v5384_v38 = vmul.f32 %v11957_v46, %v11957_v46 }
 0x8d9   :  { %v5288_v57 = vpop.f32.mrb[6].mxu1 }
 0x8da   :  { %v11963_v36 = vadd.f32 %v5288_v57, %v11949_v34  ;;  %v5290_v52 = vpop.f32.mrb[7].mxu1  ;;  %5417 = vrot.lane.b32.xlu0 %v5384_v38, %s8054_s5 }
 0x8dc   :  { %13750 = vst [vmem:[#allocation56_spill] sm:$0xff] %v11963_v36  ;;  %v5385_v3 = vmul.f32 %v11963_v36, %v11963_v36 }
 0x8dd   :  { %v5295_v59 = vpop.f32.mrb[8].mxu1 }
 0x8de   :  { %v11969_v49 = vadd.f32 %v5295_v59, %v11949_v34  ;;  %v5297_v1 = vpop.f32.mrb[9].mxu1  ;;  %5419 = vrot.lane.b32.xlu1 %v5385_v3, %s8054_s5 }
 0x8e0   :  { %13751 = vst [vmem:[#allocation79_spill] sm:$0xff] %v11969_v49  ;;  %v5386_v20 = vmul.f32 %v11969_v49, %v11969_v49 }
 0x8e1   :  { %v5302_v45 = vpop.f32.mrb[10].mxu1 }
 0x8e2   :  { %v11975_v35 = vadd.f32 %v5302_v45, %v11949_v34  ;;  %v5304_v58 = vpop.f32.mrb[11].mxu1  ;;  %5421 = vrot.lane.b32.xlu0 %v5386_v20, %s8054_s5 }
 0x8e4   :  { %v5387_v4 = vmul.f32 %v11975_v35, %v11975_v35 }
 0x8e5   :  { %v5309_v53 = vpop.f32.mrb[12].mxu1 }
 0x8e6   :  { %v11981_v28 = vadd.f32 %v5309_v53, %v11949_v34  ;;  %v5311_v27 = vpop.f32.mrb[13].mxu1  ;;  %5423 = vrot.lane.b32.xlu1 %v5387_v4, %s8054_s5 }
 0x8e8   :  { %v5388_v43 = vmul.f32 %v11981_v28, %v11981_v28 }
 0x8e9   :  { %v5316_v9 = vpop.f32.mrb[14].mxu1 }
 0x8ea   :  { %v11987_v56 = vadd.f32 %v5316_v9, %v11949_v34  ;;  %v5318_v7 = vpop.f32.mrb[15].mxu1  ;;  %5425 = vrot.lane.b32.xlu0 %v5388_v43, %s8054_s5 }
 0x8ec   :  { %v5389_v8 = vmul.f32 %v11987_v56, %v11987_v56 }
 0x8ed   :  { %v5323_v63 = vpop.f32.mrb[16].mxu1 }
 0x8ee   :  { %v11993_v32 = vadd.f32 %v5323_v63, %v11949_v34  ;;  %v5325_v13 = vpop.f32.mrb[17].mxu1  ;;  %5427 = vrot.lane.b32.xlu1 %v5389_v8, %s8054_s5 }
 0x8f0   :  { %v5390_v61 = vmul.f32 %v11993_v32, %v11993_v32 }
 0x8f1   :  { %v5330_v37 = vpop.f32.mrb[18].mxu1 }
 0x8f2   :  { %v11999_v54 = vadd.f32 %v5330_v37, %v11949_v34  ;;  %v5332_v15 = vpop.f32.mrb[19].mxu1  ;;  %5429 = vrot.lane.b32.xlu0 %v5390_v61, %s8054_s5 }
 0x8f4   :  { %13752 = vst [vmem:[#allocation129_spill] sm:$0xff] %v11999_v54  ;;  %v5391_v29 = vmul.f32 %v11999_v54, %v11999_v54 }
 0x8f5   :  { %v5337_v5 = vpop.f32.mrb[20].mxu1 }
 0x8f6   :  { %v12005_v16 = vadd.f32 %v5337_v5, %v11949_v34  ;;  %v5339_v11 = vpop.f32.mrb[21].mxu1  ;;  %5431 = vrot.lane.b32.xlu1 %v5391_v29, %s8054_s5 }
 0x8f8   :  { %v5392_v42 = vmul.f32 %v12005_v16, %v12005_v16 }
 0x8f9   :  { %v5344_v12 = vpop.f32.mrb[22].mxu1 }
 0x8fa   :  { %v12011_v40 = vadd.f32 %v5344_v12, %v11949_v34  ;;  %v5346_v21 = vpop.f32.mrb[23].mxu1  ;;  %5433 = vrot.lane.b32.xlu0 %v5392_v42, %s8054_s5 }
 0x8fc   :  { %13753 = vst [vmem:[#allocation65_spill] sm:$0xff] %v12011_v40  ;;  %v5393_v44 = vmul.f32 %v12011_v40, %v12011_v40 }
 0x8fd   :  { %v5351_v2 = vpop.f32.mrb[24].mxu1 }
 0x8fe   :  { %v12017_v48 = vadd.f32 %v5351_v2, %v11949_v34  ;;  %v5353_v47 = vpop.f32.mrb[25].mxu1  ;;  %5435 = vrot.lane.b32.xlu1 %v5393_v44, %s8054_s5 }
 0x900   :  { %13754 = vst [vmem:[#allocation12_spill] sm:$0xff] %v12017_v48  ;;  %v5394_v14 = vmul.f32 %v12017_v48, %v12017_v48 }
 0x901   :  { %v5358_v41 = vpop.f32.mrb[26].mxu1 }
 0x902   :  { %v12023_v23 = vadd.f32 %v5358_v41, %v11949_v34  ;;  %v5360_v51 = vpop.f32.mrb[27].mxu1  ;;  %5437 = vrot.lane.b32.xlu0 %v5394_v14, %s8054_s5 }
 0x904   :  { %13755 = vst [vmem:[#allocation52_spill] sm:$0xff] %v12023_v23  ;;  %v5395_v19 = vmul.f32 %v12023_v23, %v12023_v23 }
 0x905   :  { %v5365_v10 = vpop.f32.mrb[28].mxu1 }
 0x906   :  { %v12029_v33 = vadd.f32 %v5365_v10, %v11949_v34  ;;  %v5367_v0 = vpop.f32.mrb[29].mxu1  ;;  %5439 = vrot.lane.b32.xlu1 %v5395_v19, %s8054_s5 }
 0x908   :  { %13756 = vst [vmem:[#allocation134_spill] sm:$0xff] %v12029_v33  ;;  %v5396_v22 = vmul.f32 %v12029_v33, %v12029_v33 }
 0x909   :  { %v5372_v60 = vpop.f32.mrb[30].mxu1 }
 0x90a   :  { %v12035_v30 = vadd.f32 %v5372_v60, %v11949_v34  ;;  %v5374_v25 = vpop.f32.mrb[31].mxu1  ;;  %5441 = vrot.lane.b32.xlu0 %v5396_v22, %s8054_s5 }
 0x90c   :  { %13757 = vst [vmem:[#allocation128_spill] sm:$0xff] %v12035_v30  ;;  %v5397_v50 = vmul.f32 %v12035_v30, %v12035_v30 }
 0x90d   :  { %v5379_v24 = vpop.f32.mrb[32].mxu1 }
 0x90e   :  { %v12041_v31 = vadd.f32 %v5379_v24, %v11949_v34  ;;  %v5381_v6 = vpop.f32.mrb[33].mxu1  ;;  %5443 = vrot.lane.b32.xlu1 %v5397_v50, %s8054_s5 }
 0x910   :  { %13758 = vst [vmem:[#allocation131_spill] sm:$0xff] %v12041_v31  ;;  %v5398_v18 = vmul.f32 %v12041_v31, %v12041_v31 }
 0x912   :  { %5445 = vrot.lane.b32.xlu0 %v5398_v18, %s8054_s5 }
 0x948   :  { %v5416_v55 = vpop.permute.xlu1 %5415 }
 0x949   :  { %v5463_v38 = vsel %vm1815_vm2, %v11952_v39, %v5416_v55 }
 0x94a   :  { %v5480_v57 = vand.u32 4294901760, %v5463_v38 }
 0x94c   :  { %v5418_v52 = vpop.permute.xlu0 %5417  ;;  %v12051_v59 = vsub.f32 %v5463_v38, %v5480_v57 }
 0x94d   :  { %v5464_v3 = vsel %vm1815_vm2, %v11957_v46, %v5418_v52 }
 0x94e   :  { %v5483_v34 = vand.u32 4294901760, %v5464_v3  ;;  %v5568_v4 = vand.u32 4294901760, %v12051_v59 }
 0x950   :  { %v12053_v1 = vpack.c.bf16 %v5483_v34, %v5480_v57  ;;  %v12055_v20 = vsub.f32 %v5464_v3, %v5483_v34  ;;  %v5420_v45 = vpop.permute.xlu1 %5419 }
 0x951   :  { %v5465_v58 = vsel %vm1815_vm2, %v11963_v36, %v5420_v45 }
 0x952   :  { %v5575_v53 = vand.u32 4294901760, %v12055_v20  ;;  %v5486_v27 = vand.u32 4294901760, %v5465_v58  ;;  %7436 = vmatpush3.bf16.msra.mxu0 %v12053_v1 }
 0x953   :  { %7437 = vmatprep.subr.bf16.mxu0 %v13338_v26 }
 0x954   :  { %v5422_v43 = vpop.permute.xlu0 %5421  ;;  %v12067_v9 = vpack.c.bf16 %v5575_v53, %v5568_v4  ;;  %v12071_v8 = vsub.f32 %v5465_v58, %v5486_v27 }
 0x955   :  { %v5466_v7 = vsel %vm1815_vm2, %v11969_v49, %v5422_v43 }
 0x956   :  { %v5489_v63 = vand.u32 4294901760, %v5466_v7  ;;  %v12883_v29 = vand.u32 4294901760, %v12071_v8  ;;  %v13759_v49 = vand.u32 4294901760, %v12071_v8 }
 0x958   :  { %v12073_v13 = vpack.c.bf16 %v5489_v63, %v5486_v27  ;;  %v12075_v61 = vsub.f32 %v5466_v7, %v5489_v63  ;;  %v5424_v37 = vpop.permute.xlu1 %5423 }
 0x959   :  { %v5467_v15 = vsel %vm1815_vm2, %v11975_v35, %v5424_v37 }
 0x95a   :  { %v5589_v5 = vand.u32 4294901760, %v12075_v61  ;;  %v5492_v11 = vand.u32 4294901760, %v5467_v15  ;;  %7439 = vmatpush3.bf16.msra.mxu0 %v12073_v13 }
 0x95b   :  { %7440 = vmatprep.subr.bf16.mxu0 %v13338_v26 }
 0x95c   :  { %v5426_v42 = vpop.permute.xlu0 %5425  ;;  %v12087_v12 = vpack.c.bf16 %v5589_v5, %v12883_v29  ;;  %v12091_v44 = vsub.f32 %v5467_v15, %v5492_v11 }
 0x95d   :  { %v5468_v21 = vsel %vm1815_vm2, %v11981_v28, %v5426_v42 }
 0x95e   :  { %v5495_v2 = vand.u32 4294901760, %v5468_v21  ;;  %v12881_v19 = vand.u32 4294901760, %v12091_v44 }
 0x960   :  { %v12093_v47 = vpack.c.bf16 %v5495_v2, %v5492_v11  ;;  %v12095_v14 = vsub.f32 %v5468_v21, %v5495_v2  ;;  %v5428_v41 = vpop.permute.xlu1 %5427 }
 0x961   :  { %v5469_v51 = vsel %vm1815_vm2, %v11987_v56, %v5428_v41 }
 0x962   :  { %v12882_v10 = vand.u32 4294901760, %v12095_v14  ;;  %v5498_v0 = vand.u32 4294901760, %v5469_v51  ;;  %7442 = vmatpush3.bf16.msra.mxu0 %v12093_v47 }
 0x963   :  { %7443 = vmatprep.subr.bf16.mxu0 %v13338_v26 }
 0x964   :  { %v5430_v22 = vpop.permute.xlu0 %5429  ;;  %v12107_v60 = vpack.c.bf16 %v12882_v10, %v12881_v19  ;;  %v12111_v50 = vsub.f32 %v5469_v51, %v5498_v0  ;;  %v5590_v10 = vsub.f32 %v12075_v61, %v5589_v5  ;;  %v13760_v5 = vand.u32 4294901760, %v12095_v14 }
 0x965   :  { %v5470_v25 = vsel %vm1815_vm2, %v11993_v32, %v5430_v22 }
 0x966   :  { %v5501_v24 = vand.u32 4294901760, %v5470_v25  ;;  %v12878_v57 = vand.u32 4294901760, %v12111_v50 }
 0x968   :  { %v12113_v6 = vpack.c.bf16 %v5501_v24, %v5498_v0  ;;  %v12115_v18 = vsub.f32 %v5470_v25, %v5501_v24  ;;  %v5432_v55 = vpop.permute.xlu1 %5431 }
 0x969   :  { %v5471_v38 = vsel %vm1815_vm2, %v11999_v54, %v5432_v55 }
 0x96a   :  { %v12880_v52 = vand.u32 4294901760, %v12115_v18  ;;  %v5504_v3 = vand.u32 4294901760, %v5471_v38  ;;  %7445 = vmatpush3.bf16.msra.mxu0 %v12113_v6 }
 0x96b   :  { %7446 = vmatprep.subr.bf16.mxu0 %v13338_v26 }
 0x96c   :  { %v5434_v34 = vpop.permute.xlu0 %5433  ;;  %v12127_v45 = vpack.c.bf16 %v12880_v52, %v12878_v57  ;;  %v12131_v27 = vsub.f32 %v5471_v38, %v5504_v3 }
 0x96d   :  { %v5472_v58 = vsel %vm1815_vm2, %v12005_v16, %v5434_v34 }
 0x96e   :  { %v5507_v43 = vand.u32 4294901760, %v5472_v58  ;;  %v12876_v11 = vand.u32 4294901760, %v12131_v27  ;;  %v13766_v54 = vand.u32 4294901760, %v12131_v27 }
 0x970   :  { %v12133_v7 = vpack.c.bf16 %v5507_v43, %v5504_v3  ;;  %v12135_v63 = vsub.f32 %v5472_v58, %v5507_v43  ;;  %v5436_v37 = vpop.permute.xlu1 %5435 }
 0x971   :  { %v5473_v15 = vsel %vm1815_vm2, %v12011_v40, %v5436_v37 }
 0x972   :  { %v12877_v42 = vand.u32 4294901760, %v12135_v63  ;;  %v5510_v21 = vand.u32 4294901760, %v5473_v15  ;;  %7448 = vmatpush3.bf16.msra.mxu0 %v12133_v7 }
 0x973   :  { %7449 = vmatprep.subr.bf16.mxu0 %v13338_v26 }
 0x974   :  { %v5438_v2 = vpop.permute.xlu0 %5437  ;;  %v12147_v41 = vpack.c.bf16 %v12877_v42, %v12876_v11  ;;  %v12151_v0 = vsub.f32 %v5473_v15, %v5510_v21 }
 0x975   :  { %v5474_v51 = vsel %vm1815_vm2, %v12017_v48, %v5438_v2 }
 0x976   :  { %v5513_v22 = vand.u32 4294901760, %v5474_v51  ;;  %v12879_v3 = vand.u32 4294901760, %v12151_v0 }
 0x978   :  { %v12153_v25 = vpack.c.bf16 %v5513_v22, %v5510_v21  ;;  %v12155_v24 = vsub.f32 %v5474_v51, %v5513_v22  ;;  %v5440_v55 = vpop.permute.xlu1 %5439 }
 0x979   :  { %v5475_v38 = vsel %vm1815_vm2, %v12023_v23, %v5440_v55  ;;  %v13763_v23 = vand.u32 4294901760, %v12115_v18 }
 0x97a   :  { %v5645_v34 = vand.u32 4294901760, %v12155_v24  ;;  %v5516_v58 = vand.u32 4294901760, %v5475_v38  ;;  %7451 = vmatpush3.bf16.msra.mxu0 %v12153_v25 }
 0x97b   :  { %7452 = vmatprep.subr.bf16.mxu0 %v13338_v26 }
 0x97c   :  { %v5442_v43 = vpop.permute.xlu0 %5441  ;;  %v12165_v37 = vpack.c.bf16 %v5645_v34, %v12879_v3  ;;  %v12169_v21 = vsub.f32 %v5475_v38, %v5516_v58  ;;  %v5576_v38 = vsub.f32 %v12055_v20, %v5575_v53 }
 0x97d   :  { %v5476_v15 = vsel %vm1815_vm2, %v12029_v33, %v5442_v43  ;;  %v13764_v33 = vand.u32 4294901760, %v12111_v50 }
 0x97e   :  { %v5519_v2 = vand.u32 4294901760, %v5476_v15  ;;  %v5652_v42 = vand.u32 4294901760, %v12169_v21  ;;  %v5577_v19 = vand.u32 4294901760, %v5576_v38 }
 0x980   :  { %v12171_v51 = vpack.c.bf16 %v5519_v2, %v5516_v58  ;;  %v12173_v22 = vsub.f32 %v5476_v15, %v5519_v2  ;;  %v5444_v55 = vpop.permute.xlu1 %5443  ;;  %v5569_v2 = vsub.f32 %v12051_v59, %v5568_v4 }
 0x981   :  { %v5477_v11 = vsel %vm1815_vm2, %v12035_v30, %v5444_v55 }
 0x982   :  { %v5659_v57 = vand.u32 4294901760, %v12173_v22  ;;  %v5522_v3 = vand.u32 4294901760, %v5477_v11  ;;  %7454 = vmatpush3.bf16.msra.mxu0 %v12171_v51  ;;  %v5570_v36 = vand.u32 4294901760, %v5569_v2 }
 0x983   :  { %7455 = vmatprep.subr.bf16.mxu0 %v13338_v26 }
 0x984   :  { %v5446_v58 = vpop.permute.xlu0 %5445  ;;  %v12184_v43 = vpack.c.bf16 %v5659_v57, %v5652_v42  ;;  %v12191_v55 = vsub.f32 %v5477_v11, %v5522_v3  ;;  %v5591_v11 = vand.u32 4294901760, %v5590_v10 }
 0x985   :  { %v5478_v15 = vsel %vm1815_vm2, %v12041_v31, %v5446_v58  ;;  %v5583_v58 = vsub.f32 %v12071_v8, %v13759_v49  ;;  %v13762_v49 = vand.u32 4294901760, %v12091_v44 }
 0x986   :  { %v5525_v52 = vand.u32 4294901760, %v5478_v15  ;;  %v5666_v30 = vand.u32 4294901760, %v12191_v55 }
 0x987   :  { %v5584_v2 = vand.u32 4294901760, %v5583_v58  ;;  %v5597_v31 = vsub.f32 %v12091_v44, %v13762_v49  ;;  %v5611_v58 = vsub.f32 %v12111_v50, %v13764_v33  ;;  %v13765_v49 = vand.u32 4294901760, %v12135_v63 }
 0x988   :  { %v12196_v29 = vpack.c.bf16 %v5525_v52, %v5522_v3  ;;  %v12198_v53 = vsub.f32 %v5478_v15, %v5525_v52  ;;  %v5604_v3 = vsub.f32 %v12095_v14, %v13760_v5  ;;  %v7459_v52 = vpack.c.bf16 %v5577_v19, %v5570_v36 }
 0x989   :  { %v13761_v15 = vmov 0.0   ;;  %v5618_v36 = vsub.f32 %v12115_v18, %v13763_v23  ;;  %v7462_v19 = vpack.c.bf16 %v5591_v11, %v5584_v2  ;;  %v5598_v5 = vand.u32 4294901760, %v5597_v31 }
 0x98a   :  { %v5673_v4 = vand.u32 4294901760, %v12198_v53  ;;  %7457 = vmatpush3.bf16.msra.mxu0 %v12196_v29  ;;  %v5605_v10 = vand.u32 4294901760, %v5604_v3  ;;  %v5632_v40 = vsub.f32 %v12135_v63, %v13765_v49  ;;  %v5612_v3 = vand.u32 4294901760, %v5611_v58 }
 0x98b   :  { %7458 = vmatprep.subr.bf16.mxu0 %v13338_v26  ;;  %v5625_v23 = vsub.f32 %v12131_v27, %v13766_v54  ;;  %v5646_v33 = vsub.f32 %v12155_v24, %v5645_v34 }
 0x98c   :  { %v12210_v38 = vpack.c.bf16 %v5673_v4, %v5666_v30  ;;  %v7465_v48 = vpack.c.bf16 %v5605_v10, %v5598_v5  ;;  %v5633_v31 = vand.u32 4294901760, %v5632_v40  ;;  %v5660_v5 = vsub.f32 %v12173_v22, %v5659_v57 }
 0x98d   :  { %6771 = vmatmul.mubr.f32.vlgmr.msra.gmra.mrb[32].mxu0 %v13761_v15  ;;  %v5626_v2 = vand.u32 4294901760, %v5625_v23  ;;  %v5647_v10 = vand.u32 4294901760, %v5646_v33  ;;  %v5674_v34 = vsub.f32 %v12198_v53, %v5673_v4  ;;  %v7483_v4 = vpack.c.bf16 %v12055_v20, %v12051_v59 }
 0x98e   :  { %7460 = vmatpush3.bf16.msra.mxu0 %v7459_v52  ;;  %6805 = vmatprep.mubr.msk.f32.mxu0 %vm8055_vm1, %v13761_v15  ;;  %v5619_v52 = vand.u32 4294901760, %v5618_v36  ;;  %v13767_v36 = vand.u32 4294901760, %v12151_v0  ;;  %v5661_v40 = vand.u32 4294901760, %v5660_v5  ;;  %v7492_v59 = vpack.c.bf16 %v12115_v18, %v12111_v50 }
 0x98f   :  { %7461 = vmatprep.subr.bf16.mxu0 %v13338_v26  ;;  %v7471_v58 = vpack.c.bf16 %v5633_v31, %v5626_v2  ;;  %v5675_v23 = vand.u32 4294901760, %v5674_v34  ;;  %v13768_v31 = vmov 0.0078125   ;;  %v7495_v20 = vpack.c.bf16 %v12135_v63, %v12131_v27 }
 0x990   :  { %v7468_v11 = vpack.c.bf16 %v5619_v52, %v5612_v3  ;;  %v5667_v3 = vsub.f32 %v12191_v55, %v5666_v30  ;;  %v7486_v30 = vpack.c.bf16 %v12075_v61, %v12071_v8  ;;  %v7498_v8 = vpack.c.bf16 %v12155_v24, %v12151_v0 }
 0x991   :  { %v7501_v61 = vpack.c.bf16 %v12173_v22, %v12169_v21  ;;  %v6122_v18 = vsub.s32 4, %v13749_v62 }
 0x992   :  { %7463 = vmatpush3.bf16.msra.mxu0 %v7462_v19  ;;  %v5639_v19 = vsub.f32 %v12151_v0, %v13767_v36  ;;  %v5668_v57 = vand.u32 4294901760, %v5667_v3  ;;  %v13770_v36 = vld [vmem:[#allocation12_spill] sm:$0xff] }
 0x993   :  { %7464 = vmatprep.subr.bf16.mxu0 %v13338_v26  ;;  %v13775_v3 = vld [vmem:[#allocation128_spill] sm:$0xff] }
 0x994   :  { %v5640_v54 = vand.u32 4294901760, %v5639_v19  ;;  %v13771_v19 = vld [vmem:[#allocation65_spill] sm:$0xff] }
 0x996   :  { %7466 = vmatpush3.bf16.msra.mxu0 %v7465_v48  ;;  %v5653_v48 = vsub.f32 %v12169_v21, %v5652_v42  ;;  %v7474_v52 = vpack.c.bf16 %v5647_v10, %v5640_v54  ;;  %v7480_v42 = vpack.c.bf16 %v5675_v23, %v5668_v57  ;;  %v13773_v54 = vld [vmem:[#allocation52_spill] sm:$0xff] }
 0x997   :  { %7467 = vmatprep.subr.bf16.mxu0 %v13338_v26 }
 0x998   :  { %v5654_v49 = vand.u32 4294901760, %v5653_v48 }
 0x99a   :  { %7469 = vmatpush3.bf16.msra.mxu0 %v7468_v11  ;;  %v7477_v33 = vpack.c.bf16 %v5661_v40, %v5654_v49  ;;  %v7489_v11 = vpack.c.bf16 %v12095_v14, %v12091_v44  ;;  %v7504_v44 = vpack.c.bf16 %v12198_v53, %v12191_v55 }
 0x99b   :  { %7470 = vmatprep.subr.bf16.mxu0 %v13338_v26 }
 0x99e   :  { %7472 = vmatpush3.bf16.msra.mxu0 %v7471_v58  ;;  %v13772_v58 = vld [vmem:[#allocation134_spill] sm:$0xff] }
 0x99f   :  { %7473 = vmatprep.subr.bf16.mxu0 %v13338_v26 }
 0x9a2   :  { %7475 = vmatpush3.bf16.msra.mxu0 %v7474_v52  ;;  %v13774_v52 = vld [vmem:[#allocation131_spill] sm:$0xff] }
 0x9a3   :  { %7476 = vmatprep.subr.bf16.mxu0 %v13338_v26 }
 0x9a6   :  { %7478 = vmatpush3.bf16.msra.mxu0 %v7477_v33 }
 0x9a7   :  { %7479 = vmatprep.subr.bf16.mxu0 %v13338_v26 }
 0x9aa   :  { %7481 = vmatpush3.bf16.msra.mxu0 %v7480_v42  ;;  %v13776_v42 = vld [vmem:[#allocation79_spill] sm:$0xff] }
 0x9ab   :  { %7482 = vmatprep.subr.bf16.mxu0 %v13338_v26 }
 0x9ad   :  { %6806 = vmatmul.mubr.f32.vlgmr.msra.gmra.mrb[32].mxu0 %v13768_v31 }
 0x9ae   :  { %7484 = vmatpush3.bf16.msra.mxu0 %v7483_v4  ;;  %6840 = vmatprep.mubr.msk.f32.mxu0 %vm8055_vm1, %v13761_v15 }
 0x9af   :  { %7485 = vmatprep.subr.bf16.mxu0 %v13338_v26 }
 0x9b2   :  { %7487 = vmatpush3.bf16.msra.mxu0 %v7486_v30 }
 0x9b3   :  { %7488 = vmatprep.subr.bf16.mxu0 %v13338_v26 }
 0x9b6   :  { %7490 = vmatpush3.bf16.msra.mxu0 %v7489_v11 }
 0x9b7   :  { %7491 = vmatprep.subr.bf16.mxu0 %v13338_v26 }
 0x9ba   :  { %7493 = vmatpush3.bf16.msra.mxu0 %v7492_v59 }
 0x9bb   :  { %7494 = vmatprep.subr.bf16.mxu0 %v13338_v26 }
 0x9be   :  { %7496 = vmatpush3.bf16.msra.mxu0 %v7495_v20 }
 0x9bf   :  { %7497 = vmatprep.subr.bf16.mxu0 %v13338_v26 }
 0x9c2   :  { %7499 = vmatpush3.bf16.msra.mxu0 %v7498_v8  ;;  %v13778_v8 = vld [vmem:[#allocation14_spill] sm:$0xff] }
 0x9c3   :  { %7500 = vmatprep.subr.bf16.mxu0 %v13338_v26 }
 0x9c6   :  { %7502 = vmatpush3.bf16.msra.mxu0 %v7501_v61 }
 0x9c7   :  { %7503 = vmatprep.subr.bf16.mxu0 %v13338_v26 }
 0x9ca   :  { %7505 = vmatpush3.bf16.msra.mxu0 %v7504_v44  ;;  %v13779_v44 = vld [vmem:[#allocation15_spill] sm:$0xff] }
 0x9cb   :  { %7506 = vmatprep.subr.bf16.mxu0 %v13338_v26 }
 0x9cd   :  { %6841 = vmatmul.mubr.f32.vlgmr.msra.gmra.mrb[32].mxu0 %v13761_v15 }
 0x9ce   :  { %7508 = vmatpush3.bf16.msra.mxu0 %v12053_v1  ;;  %6875 = vmatprep.mubr.msk.f32.mxu0 %vm8055_vm1, %v13761_v15 }
 0x9cf   :  { %7509 = vmatprep.subr.bf16.mxu0 %v13338_v26 }
 0x9d2   :  { %7511 = vmatpush3.bf16.msra.mxu0 %v12073_v13 }
 0x9d3   :  { %7512 = vmatprep.subr.bf16.mxu0 %v13338_v26 }
 0x9d6   :  { %7514 = vmatpush3.bf16.msra.mxu0 %v12093_v47 }
 0x9d7   :  { %7515 = vmatprep.subr.bf16.mxu0 %v13338_v26 }
 0x9da   :  { %7517 = vmatpush3.bf16.msra.mxu0 %v12113_v6 }
 0x9db   :  { %7518 = vmatprep.subr.bf16.mxu0 %v13338_v26 }
 0x9de   :  { %7520 = vmatpush3.bf16.msra.mxu0 %v12133_v7 }
 0x9df   :  { %7521 = vmatprep.subr.bf16.mxu0 %v13338_v26 }
 0x9e2   :  { %7523 = vmatpush3.bf16.msra.mxu0 %v12153_v25 }
 0x9e3   :  { %7524 = vmatprep.subr.bf16.mxu0 %v13338_v26 }
 0x9e6   :  { %7526 = vmatpush3.bf16.msra.mxu0 %v12171_v51 }
 0x9e7   :  { %7527 = vmatprep.subr.bf16.mxu0 %v13338_v26 }
 0x9ea   :  { %7529 = vmatpush3.bf16.msra.mxu0 %v12196_v29 }
 0x9eb   :  { %7530 = vmatprep.subr.bf16.mxu0 %v13338_v26 }
 0x9ed   :  { %6876 = vmatmul.mubr.f32.vlgmr.msra.gmra.mrb[32].mxu0 %v13761_v15 }
 0x9ee   :  { %7532 = vmatpush3.bf16.msra.mxu0 %v12067_v9  ;;  %6910 = vmatprep.mubr.msk.f32.mxu0 %vm8055_vm1, %v13761_v15 }
 0x9ef   :  { %7533 = vmatprep.subr.bf16.mxu0 %v13338_v26 }
 0x9f2   :  { %7535 = vmatpush3.bf16.msra.mxu0 %v12087_v12 }
 0x9f3   :  { %7536 = vmatprep.subr.bf16.mxu0 %v13338_v26 }
 0x9f6   :  { %7538 = vmatpush3.bf16.msra.mxu0 %v12107_v60 }
 0x9f7   :  { %7539 = vmatprep.subr.bf16.mxu0 %v13338_v26 }
 0x9fa   :  { %7541 = vmatpush3.bf16.msra.mxu0 %v12127_v45 }
 0x9fb   :  { %7542 = vmatprep.subr.bf16.mxu0 %v13338_v26 }
 0x9fe   :  { %7544 = vmatpush3.bf16.msra.mxu0 %v12147_v41 }
 0x9ff   :  { %7545 = vmatprep.subr.bf16.mxu0 %v13338_v26 }
 0xa02   :  { %7547 = vmatpush3.bf16.msra.mxu0 %v12165_v37 }
 0xa03   :  { %7548 = vmatprep.subr.bf16.mxu0 %v13338_v26 }
 0xa06   :  { %7550 = vmatpush3.bf16.msra.mxu0 %v12184_v43 }
 0xa07   :  { %7551 = vmatprep.subr.bf16.mxu0 %v13338_v26 }
 0xa0a   :  { %7553 = vmatpush3.bf16.msra.mxu0 %v12210_v38  ;;  %v13769_v38 = vld [vmem:[#allocation129_spill] sm:$0xff] }
 0xa0b   :  { %7554 = vmatprep.subr.bf16.mxu0 %v13338_v26 }
 0xa0d   :  { %6911 = vmatmul.mubr.f32.vlgmr.msra.gmra.mrb[32].mxu0 %v13768_v31 }
 0xa0e   :  { %7556 = vmatpush3.bf16.msra.mxu0 %v12053_v1  ;;  %6945 = vmatprep.mubr.msk.f32.mxu0 %vm8055_vm1, %v13761_v15  ;;  %v1713_v1 = vsub.s32 6, %v13749_v62 }
 0xa0f   :  { %7557 = vmatprep.subr.bf16.mxu0 %v13338_v26 }
 0xa12   :  { %7559 = vmatpush3.bf16.msra.mxu0 %v12073_v13 }
 0xa13   :  { %7560 = vmatprep.subr.bf16.mxu0 %v13338_v26 }
 0xa16   :  { %7562 = vmatpush3.bf16.msra.mxu0 %v12093_v47  ;;  %v1714_v47 = vrot.slane %v11946_v17, %v1713_v1 }
 0xa17   :  { %7563 = vmatprep.subr.bf16.mxu0 %v13338_v26 }
 0xa1a   :  { %7565 = vmatpush3.bf16.msra.mxu0 %v12113_v6 }
 0xa1b   :  { %7566 = vmatprep.subr.bf16.mxu0 %v13338_v26 }
 0xa1e   :  { %7568 = vmatpush3.bf16.msra.mxu0 %v12133_v7  ;;  %v6150_v7 = vsub.s32 5, %v13749_v62 }
 0xa1f   :  { %7569 = vmatprep.subr.bf16.mxu0 %v13338_v26 }
 0xa22   :  { %7571 = vmatpush3.bf16.msra.mxu0 %v12153_v25 }
 0xa23   :  { %7572 = vmatprep.subr.bf16.mxu0 %v13338_v26 }
 0xa26   :  { %7574 = vmatpush3.bf16.msra.mxu0 %v12171_v51 }
 0xa27   :  { %7575 = vmatprep.subr.bf16.mxu0 %v13338_v26 }
 0xa2a   :  { %7577 = vmatpush3.bf16.msra.mxu0 %v12196_v29 }
 0xa2d   :  { %6946 = vmatmul.mubr.f32.vlgmr.msra.gmra.mrb[32].mxu0 %v13768_v31  ;;  %v13777_v31 = vld [vmem:[#allocation56_spill] sm:$0xff] }
 0xb00   :  { %v6103_v9 = vpop.f32.mrb[32].mxu0 }
 0xb01   :  { %v6107_v13 = vmul.f32 %v6103_v9, %v6103_v9  ;;  %v6947_v12 = vpop.f32.mrb[33].mxu0  ;;  %v6141_v6 = vrot.slane %v6103_v9, 4 }
 0xb03   :  { %6109 = vrot.lane.b32.xlu1 %v6107_v13, %s8054_s5 }
 0xb07   :  { %1716 = vrot.lane.b32.xlu1 %v1714_v47, %s8054_s5 }
 0xb75   :  { %v6110_v14 = vpop.permute.xlu1 %6109 }
 0xb76   :  { %v6112_v60 = vsub.f32 %v6103_v9, %v6110_v14  ;;  %v13780_v14 = vld [vmem:[#allocation26_spill] sm:$0xff] }
 0xb78   :  { %8032 = vrsqrt.f32 %v6112_v60 }
 0xb79   :  { %v12371_v20 = vpop.permute.xlu1 %1716 }
 0xb7a   :  { %v1719_v61 = vadd.f32 %v12371_v20, %v13778_v8  ;;  %v1720_v1 = vadd.f32 %v12371_v20, %v13779_v44  ;;  %v1723_v60 = vadd.f32 %v12371_v20, %v13780_v14 }
 0xb82   :  { %v8033_v50 = vpop.eup %8032 }
 0xb83   :  { %v6115_v26 = vrot.slane %v8033_v50, 4  ;;  %v13781_v50 = vld [vmem:[#allocation29_spill] sm:$0xff] }
 0xb85   :  { %6116 = vrot.lane.b32.xlu0 %v6115_v26, %s8065_s0  ;;  %v1724_v26 = vadd.f32 %v12371_v20, %v13781_v50 }
 0xbf7   :  { %v6117_v29 = vpop.permute.xlu0 %6116 }
 0xbf8   :  { %v6119_v45 = vmul.f32 %v11946_v17, %v6117_v29 }
 0xbfa   :  { %v6143_v27 = vmul.f32 %v6141_v6, %v6119_v45  ;;  %v6123_v63 = vrot.slane %v6119_v45, %v6122_v18 }
 0xbfc   :  { %v6145_v41 = vrot.slane %v6143_v27, 7  ;;  %v6125_v24 = vmul.f32 %v11957_v46, %v6123_v63  ;;  %v6124_v37 = vmul.f32 %v11952_v39, %v6123_v63  ;;  %v6129_v22 = vmul.f32 %v11981_v28, %v6123_v63  ;;  %v13782_v27 = vld [vmem:[#allocation34_spill] sm:$0xff] }
 0xbfd   :  { %v6128_v43 = vmul.f32 %v11975_v35, %v6123_v63  ;;  %v6130_v39 = vmul.f32 %v11987_v56, %v6123_v63  ;;  %v6133_v28 = vmul.f32 %v12005_v16, %v6123_v63  ;;  %v6132_v35 = vmul.f32 %v13769_v38, %v6123_v63 }
 0xbfe   :  { %v6147_v0 = vsub.f32 %v11946_v17, %v6145_v41  ;;  %v6131_v17 = vmul.f32 %v11993_v32, %v6123_v63  ;;  %v6135_v32 = vmul.f32 %v13770_v36, %v6123_v63  ;;  %v6134_v56 = vmul.f32 %v13771_v19, %v6123_v63 }
 0xbff   :  { %v6137_v16 = vmul.f32 %v13772_v58, %v6123_v63  ;;  %v6136_v48 = vmul.f32 %v13773_v54, %v6123_v63  ;;  %v6139_v49 = vmul.f32 %v13774_v52, %v6123_v63  ;;  %v6138_v23 = vmul.f32 %v13775_v3, %v6123_v63 }
 0xc00   :  { %v6151_v25 = vrot.slane %v6147_v0, %v6150_v7  ;;  %v6127_v4 = vmul.f32 %v13776_v42, %v6123_v63  ;;  %v6126_v30 = vmul.f32 %v13777_v31, %v6123_v63  ;;  %v1725_v7 = vadd.f32 %v12371_v20, %v13782_v27  ;;  %v13783_v63 = vld [vmem:[#allocation36_spill] sm:$0xff] }
 0xc01   :  { %v1726_v41 = vadd.f32 %v12371_v20, %v13783_v63 }
 0xc02   :  { %v6153_v21 = vadd.f32 %v6151_v25, %v6125_v24  ;;  %v6152_v51 = vadd.f32 %v6151_v25, %v6124_v37  ;;  %v6157_v62 = vadd.f32 %v6151_v25, %v6129_v22  ;;  %v6156_v55 = vadd.f32 %v6151_v25, %v6128_v43  ;;  %v13785_v22 = vld [vmem:[#allocation43_spill] sm:$0xff] }
 0xc03   :  { %v6159_v46 = vadd.f32 %v6151_v25, %v6131_v17  ;;  %v6158_v53 = vadd.f32 %v6151_v25, %v6130_v39  ;;  %v6161_v15 = vadd.f32 %v6151_v25, %v6133_v28  ;;  %v6160_v2 = vadd.f32 %v6151_v25, %v6132_v35  ;;  %v13787_v28 = vld [vmem:[#allocation53_spill] sm:$0xff] }
 0xc04   :  { %6186 = vrot.lane.b32.xlu1 %v6153_v21, %s8054_s5  ;;  %6184 = vrot.lane.b32.xlu0 %v6152_v51, %s8054_s5  ;;  %v6163_v10 = vadd.f32 %v6151_v25, %v6135_v32  ;;  %v6162_v5 = vadd.f32 %v6151_v25, %v6134_v56  ;;  %v6165_v40 = vadd.f32 %v6151_v25, %v6137_v16  ;;  %v13784_v21 = vld [vmem:[#allocation41_spill] sm:$0xff]  ;;  %v13788_v32 = vld [vmem:[#allocation59_spill] sm:$0xff]  ;;  %v13789_v56 = vld [vmem:[#allocation62_spill] sm:$0xff] }
 0xc05   :  { %v6164_v34 = vadd.f32 %v6151_v25, %v6136_v48  ;;  %v6167_v33 = vadd.f32 %v6151_v25, %v6139_v49  ;;  %v6166_v57 = vadd.f32 %v6151_v25, %v6138_v23  ;;  %v6155_v11 = vadd.f32 %v6151_v25, %v6127_v4  ;;  %v13790_v48 = vld [vmem:[#allocation66_spill] sm:$0xff] }
 0xc06   :  { %v6154_v59 = vadd.f32 %v6151_v25, %v6126_v30  ;;  %v1727_v51 = vadd.f32 %v12371_v20, %v13784_v21  ;;  %v1728_v43 = vadd.f32 %v12371_v20, %v13785_v22  ;;  %v1730_v38 = vadd.f32 %v12371_v20, %v13787_v28 }
 0xc07   :  { %v1731_v19 = vadd.f32 %v12371_v20, %v13788_v32 }
 0xc08   :  { %6194 = vrot.lane.b32.xlu1 %v6157_v62, %s8054_s5  ;;  %6192 = vrot.lane.b32.xlu0 %v6156_v55, %s8054_s5 }
 0xc0c   :  { %6198 = vrot.lane.b32.xlu1 %v6159_v46, %s8054_s5  ;;  %6196 = vrot.lane.b32.xlu0 %v6158_v53, %s8054_s5  ;;  %v13786_v46 = vld [vmem:[#allocation51_spill] sm:$0xff] }
 0xc0d   :  { %v1729_v53 = vadd.f32 %v12371_v20, %v13786_v46 }
 0xc10   :  { %6202 = vrot.lane.b32.xlu1 %v6161_v15, %s8054_s5  ;;  %6200 = vrot.lane.b32.xlu0 %v6160_v2, %s8054_s5 }
 0xc14   :  { %6206 = vrot.lane.b32.xlu1 %v6163_v10, %s8054_s5  ;;  %6204 = vrot.lane.b32.xlu0 %v6162_v5, %s8054_s5  ;;  %v1732_v10 = vadd.f32 %v12371_v20, %v13789_v56 }
 0xc18   :  { %6210 = vrot.lane.b32.xlu1 %v6165_v40, %s8054_s5  ;;  %6208 = vrot.lane.b32.xlu0 %v6164_v34, %s8054_s5  ;;  %v1733_v40 = vadd.f32 %v12371_v20, %v13790_v48  ;;  %v13791_v34 = vld [vmem:[#allocation6_spill] sm:$0xff] }
 0xc19   :  { %v1734_v52 = vadd.f32 %v12371_v20, %v13791_v34 }
 0xc1c   :  { %6214 = vrot.lane.b32.xlu1 %v6167_v33, %s8054_s5  ;;  %6212 = vrot.lane.b32.xlu0 %v6166_v57, %s8054_s5 }
 0xc20   :  { %6190 = vrot.lane.b32.xlu1 %v6155_v11, %s8054_s5  ;;  %6188 = vrot.lane.b32.xlu0 %v6154_v59, %s8054_s5 }
 0xc76   :  { %v6185_v9 = vpop.permute.xlu0 %6184  ;;  %v6187_v13 = vpop.permute.xlu1 %6186 }
 0xc77   :  { %v6232_v12 = vadd.f32 %v6185_v9, %v1719_v61  ;;  %v6233_v47 = vadd.f32 %v6187_v13, %v1720_v1  ;;  %v13792_v1 = vld [vmem:[#allocation19_spill] sm:$0xff] }
 0xc78   :  { %v1721_v9 = vadd.f32 %v12371_v20, %v13792_v1  ;;  %v13793_v13 = vld [vmem:[#allocation23_spill] sm:$0xff] }
 0xc79   :  { %6250 = vrot.lane.b32.xlu0 %v6232_v12, %s8065_s0  ;;  %6252 = vrot.lane.b32.xlu1 %v6233_v47, %s8065_s0  ;;  %v1722_v12 = vadd.f32 %v12371_v20, %v13793_v13 }
 0xc7a   :  { %v6193_v29 = vpop.permute.xlu0 %6192  ;;  %v6195_v6 = vpop.permute.xlu1 %6194 }
 0xc7b   :  { %v6236_v18 = vadd.f32 %v6193_v29, %v1723_v60  ;;  %v6237_v45 = vadd.f32 %v6195_v6, %v1724_v26 }
 0xc7d   :  { %6258 = vrot.lane.b32.xlu0 %v6236_v18, %s8054_s5  ;;  %6260 = vrot.lane.b32.xlu1 %v6237_v45, %s8054_s5 }
 0xc7e   :  { %v6197_v0 = vpop.permute.xlu0 %6196  ;;  %v6199_v25 = vpop.permute.xlu1 %6198 }
 0xc7f   :  { %v6238_v24 = vadd.f32 %v6197_v0, %v1725_v7  ;;  %v6239_v37 = vadd.f32 %v6199_v25, %v1726_v41 }
 0xc81   :  { %6266 = vrot.lane.b32.xlu0 %v6238_v24, %s8069_s20  ;;  %6268 = vrot.lane.b32.xlu1 %v6239_v37, %s8069_s20 }
 0xc82   :  { %v6201_v62 = vpop.permute.xlu0 %6200  ;;  %v6203_v55 = vpop.permute.xlu1 %6202 }
 0xc83   :  { %v6240_v17 = vadd.f32 %v6201_v62, %v1727_v51  ;;  %v6241_v39 = vadd.f32 %v6203_v55, %v1728_v43 }
 0xc85   :  { %6274 = vrot.lane.b32.xlu0 %v6240_v17, %s8067_s14  ;;  %6276 = vrot.lane.b32.xlu1 %v6241_v39, %s8067_s14 }
 0xc86   :  { %v6205_v35 = vpop.permute.xlu0 %6204  ;;  %v6207_v15 = vpop.permute.xlu1 %6206 }
 0xc87   :  { %v6242_v2 = vadd.f32 %v6205_v35, %v1729_v53  ;;  %v6243_v36 = vadd.f32 %v6207_v15, %v1730_v38 }
 0xc89   :  { %6282 = vrot.lane.b32.xlu0 %v6242_v2, %s8066_s13  ;;  %6284 = vrot.lane.b32.xlu1 %v6243_v36, %s8066_s13 }
 0xc8a   :  { %v6209_v5 = vpop.permute.xlu0 %6208  ;;  %v6211_v58 = vpop.permute.xlu1 %6210 }
 0xc8b   :  { %v6244_v16 = vadd.f32 %v6209_v5, %v1731_v19  ;;  %v6245_v54 = vadd.f32 %v6211_v58, %v1732_v10 }
 0xc8d   :  { %6290 = vrot.lane.b32.xlu0 %v6244_v16, %s8068_s15  ;;  %6292 = vrot.lane.b32.xlu1 %v6245_v54, %s8068_s15 }
 0xc8e   :  { %v6213_v49 = vpop.permute.xlu0 %6212  ;;  %v6215_v3 = vpop.permute.xlu1 %6214 }
 0xc8f   :  { %v6246_v23 = vadd.f32 %v6213_v49, %v1733_v40  ;;  %v6247_v33 = vadd.f32 %v6215_v3, %v1734_v52 }
 0xc91   :  { %6298 = vrot.lane.b32.xlu0 %v6246_v23, %s8070_s30  ;;  %6300 = vrot.lane.b32.xlu1 %v6247_v33, %s8070_s30 }
 0xc92   :  { %v6189_v57 = vpop.permute.xlu0 %6188  ;;  %v6191_v42 = vpop.permute.xlu1 %6190 }
 0xc93   :  { %v6234_v60 = vadd.f32 %v6189_v57, %v1721_v9  ;;  %v6235_v50 = vadd.f32 %v6191_v42, %v1722_v12 }
 0xceb   :  { %v6251_v4 = vpop.permute.xlu0 %6250  ;;  %v6253_v31 = vpop.permute.xlu1 %6252 }
 0xcec   :  { %v6304_v26 = vsel %vm1815_vm2, %v6251_v4, %v6234_v60  ;;  %v6305_v29 = vsel %vm1815_vm2, %v6253_v31, %v6235_v50 }
 0xcef   :  { %v6259_v30 = vpop.permute.xlu0 %6258  ;;  %v6261_v11 = vpop.permute.xlu1 %6260 }
 0xcf0   :  { %v6306_v6 = vsel %vm3709_vm5, %v6304_v26, %v6259_v30  ;;  %v6307_v18 = vsel %vm3709_vm5, %v6305_v29, %v6261_v11 }
 0xcf3   :  { %v6267_v59 = vpop.permute.xlu0 %6266  ;;  %v6269_v8 = vpop.permute.xlu1 %6268 }
 0xcf4   :  { %v6308_v7 = vsel %vm3726_vm6, %v6306_v6, %v6267_v59  ;;  %v6309_v63 = vsel %vm3726_vm6, %v6307_v18, %v6269_v8 }
 0xcf7   :  { %v6275_v61 = vpop.permute.xlu0 %6274  ;;  %v6277_v44 = vpop.permute.xlu1 %6276 }
 0xcf8   :  { %v6310_v20 = vsel %vm3743_vm7, %v6308_v7, %v6275_v61  ;;  %v6311_v41 = vsel %vm3743_vm7, %v6309_v63, %v6277_v44 }
 0xcfb   :  { %v6283_v47 = vpop.permute.xlu0 %6282  ;;  %v6285_v14 = vpop.permute.xlu1 %6284 }
 0xcfc   :  { %v6312_v0 = vsel %vm3760_vm8, %v6310_v20, %v6283_v47  ;;  %v6313_v25 = vsel %vm3760_vm8, %v6311_v41, %v6285_v14 }
 0xcff   :  { %v6291_v45 = vpop.permute.xlu0 %6290  ;;  %v6293_v27 = vpop.permute.xlu1 %6292 }
 0xd00   :  { %v6314_v24 = vsel %vm3777_vm9, %v6312_v0, %v6291_v45  ;;  %v6315_v37 = vsel %vm3777_vm9, %v6313_v25, %v6293_v27 }
 0xd03   :  { %v6299_v21 = vpop.permute.xlu0 %6298  ;;  %v6301_v51 = vpop.permute.xlu1 %6300 }
 0xd04   :  { %v6316_v22 = vsel %vm3794_vm10, %v6314_v24, %v6299_v21  ;;  %v6317_v43 = vsel %vm3794_vm10, %v6315_v37, %v6301_v51 }
 0xd05   :  { %6318 = vst [vmem:[%s12441_s2] sm:$0xff] %v6316_v22  ;;  %6319 = vst [vmem:[%s12441_s2 + $0x8] sm:$0xff] %v6317_v43 }

</bundles_post_ra>
